<compile_context>
chip_gen: v6e
topology: v6e:2x2x1
jax: 0.10.0
libtpu: 0.0.40
codegen_flags: <defaults>
</compile_context>

<pallas_src>
import functools

import jax
import jax.numpy as jnp
from jax.experimental import pallas as pl
from jax.experimental.pallas import tpu as pltpu


def _round_up(x, m):
    return ((x + m - 1) // m) * m


def make_rnn_softmax_kernel(n_layers, T, Bp, Hp, Op):
    """Pallas kernel: GRU(n_layers) -> Linear -> softmax (eval semantics).

    Ref layout (all 2D, time-major rows t*Bp + b, everything tile-padded):
      inputs : z (T*Bp, Ip) bf16, h0 (n_layers*Bp, Hp) f32,
               per layer: Wih (in_lp, 3*Hp) bf16, Whh (Hp, 3*Hp) bf16,
                          bcomb (1, 3*Hp) f32  (= bih+bhh on r/z blocks, bih on n),
                          bhh_n (1, Hp) f32,
               Wl (Hp, Op) bf16, bl (1, Op) f32 (padded lanes = -1e30)
      outputs: logits (T*Bp, Op) f32, probs (T*Bp, Op) f32, h (n_layers*Bp, Hp) f32
      scratch: gi_scr (T*Bp, 3*Hp) f32, seq (T*Bp, Hp) f32
    """

    def kernel(*refs):
        z_ref, h0_ref = refs[0], refs[1]
        idx = 2
        layer_refs = []
        for _ in range(n_layers):
            layer_refs.append(tuple(refs[idx:idx + 4]))
            idx += 4
        Wl_ref, bl_ref = refs[idx], refs[idx + 1]
        logits_ref, probs_ref, h_out_ref = refs[idx + 2], refs[idx + 3], refs[idx + 4]
        gi_scr, seq_ref = refs[idx + 5], refs[idx + 6]

        prev_outs = None  # previous layer's per-step (Bp, Hp) f32 outputs (values)
        for l in range(n_layers):
            Wih_ref, Whh_ref, bcomb_ref, bhhn_ref = layer_refs[l]

            # Hoisted bias broadcasts: done once per layer, off the per-step
            # critical path (JAX does not CSE broadcast_in_dim).
            bhhn_b = jnp.broadcast_to(bhhn_ref[...], (Bp, Hp))
            if l > 0:
                bcomb_b = jnp.broadcast_to(bcomb_ref[...], (Bp, 3 * Hp))

            h = h0_ref[l * Bp:(l + 1) * Bp, :]              # (Bp, Hp) f32, tile-aligned

            if l == 0:
                # Hoisted input-to-hidden matmul for the whole sequence, staged
                # in VMEM scratch (bounded vreg pressure, tile-aligned reads).
                gi_scr[...] = (
                    jnp.dot(z_ref[...], Wih_ref[...],
                            preferred_element_type=jnp.float32)
                    + jnp.broadcast_to(bcomb_ref[...], (T * Bp, 3 * Hp)))

            outs = []
            for t in range(T):                              # static unroll (T small)
                if l == 0:
                    gi = gi_scr[t * Bp:(t + 1) * Bp, :]     # full-tile vld
                else:
                    # depends only on layer l-1 step t -> wavefront-schedulable
                    gi = jnp.dot(prev_outs[t].astype(jnp.bfloat16), Wih_ref[...],
                                 preferred_element_type=jnp.float32) + bcomb_b
                gh = jnp.dot(h.astype(jnp.bfloat16), Whh_ref[...],
                             preferred_element_type=jnp.float32)
                # lane-tile-aligned gate slices (offsets 0 / 128 / 256)
                r_g = jax.nn.sigmoid(gi[:, 0:Hp] + gh[:, 0:Hp])
                z_g = jax.nn.sigmoid(gi[:, Hp:2 * Hp] + gh[:, Hp:2 * Hp])
                n_g = jnp.tanh(gi[:, 2 * Hp:3 * Hp]
                               + r_g * (gh[:, 2 * Hp:3 * Hp] + bhhn_b))
                h = n_g + z_g * (h - n_g)                   # == (1-z)*n + z*h
                if l == n_layers - 1:
                    seq_ref[t * Bp:(t + 1) * Bp, :] = h     # unmasked (8,128) store
                else:
                    outs.append(h)
            h_out_ref[l * Bp:(l + 1) * Bp, :] = h
            prev_outs = outs

        # ---- output projection + softmax (lane-dense, padded to Op lanes) ----
        seq = seq_ref[...]                                  # (T*Bp, Hp) f32
        logits = (jnp.dot(seq.astype(jnp.bfloat16), Wl_ref[...],
                          preferred_element_type=jnp.float32)
                  + jnp.broadcast_to(bl_ref[...], (T * Bp, Op)))
        logits_ref[...] = logits
        m = jnp.max(logits, axis=-1, keepdims=True)         # padded lanes = -1e30
        e = jnp.exp(logits - m)                             # -> exactly 0 on padding
        s = jnp.sum(e, axis=-1, keepdims=True)
        # exact reciprocal: probs may feed sampling / loss; MXU is idle anyway
        probs_ref[...] = e * pl.reciprocal(s, approx=False)

    return kernel


@functools.partial(jax.jit, static_argnames=("n_layers", "n_hidden"))
def rnn_softmax_forward(z, h0, gru_params, lin_w, lin_b, *, n_layers, n_hidden):
    """z: (B, T, n_in) batch_first; h0: (n_layers, B, H).
    gru_params: list of (Wih(3H,in), Whh(3H,H), bih(3H,), bhh(3H,)) per layer
    (PyTorch orientation, gate order r,z,n). lin_w: (n_out, H), lin_b: (n_out,).
    Returns (logits (B,T,n_out), probs (B,T,n_out), h (n_layers,B,H))."""
    B, T, n_in = z.shape
    H = n_hidden
    n_out = lin_w.shape[0]

    Bp = _round_up(B, 8)        # full f32 sublane tile per step
    Hp = _round_up(H, 128)      # one 128-lane block per gate
    Ip = _round_up(n_in, 128)   # lane-dense z
    Op = _round_up(n_out, 128)  # lane-dense logits / probs stores

    # -------- glue: pad & pack inputs (time-major rows t*Bp + b) --------
    z_tm = jnp.transpose(z, (1, 0, 2)).astype(jnp.float32)          # (T, B, n_in)
    z_tm = jnp.pad(z_tm, ((0, 0), (0, Bp - B), (0, Ip - n_in)))
    z_tm = z_tm.reshape(T * Bp, Ip).astype(jnp.bfloat16)

    h0_p = jnp.pad(h0.astype(jnp.float32), ((0, 0), (0, Bp - B), (0, Hp - H)))
    h0_p = h0_p.reshape(n_layers * Bp, Hp)

    def pad_gates_mat(WT, in_dim, in_pad):
        # WT: (in_dim, 3H) -> (in_pad, 3*Hp); each gate gets its own 128-lane block
        blocks = [jnp.pad(WT[:, g * H:(g + 1) * H],
                          ((0, in_pad - in_dim), (0, Hp - H))) for g in range(3)]
        return jnp.concatenate(blocks, axis=1)

    def pad_gates_vec(v):
        # v: (3H,) -> (1, 3*Hp)
        blocks = [jnp.pad(v[g * H:(g + 1) * H], (0, Hp - H)) for g in range(3)]
        return jnp.concatenate(blocks).reshape(1, 3 * Hp)

    args = [z_tm, h0_p]
    for l, (Wih, Whh, bih, bhh) in enumerate(gru_params):
        in_l = n_in if l == 0 else H
        in_lp = Ip if l == 0 else Hp
        bih = bih.astype(jnp.float32)
        bhh = bhh.astype(jnp.float32)
        # fold bhh into the r/z blocks (they are added outside the r-gate product)
        bcomb = jnp.concatenate([bih[:2 * H] + bhh[:2 * H], bih[2 * H:]])
        args += [
            pad_gates_mat(Wih.T.astype(jnp.float32), in_l, in_lp).astype(jnp.bfloat16),
            pad_gates_mat(Whh.T.astype(jnp.float32), H, Hp).astype(jnp.bfloat16),
            pad_gates_vec(bcomb),
            jnp.pad(bhh[2 * H:], (0, Hp - H)).reshape(1, Hp),
        ]

    Wl_p = jnp.pad(lin_w.T.astype(jnp.float32), ((0, Hp - H), (0, Op - n_out)))
    # padded output lanes get a very negative bias so softmax assigns them 0 weight
    bl_p = jnp.pad(lin_b.astype(jnp.float32), (0, Op - n_out),
                   constant_values=-1e30).reshape(1, Op)
    args += [Wl_p.astype(jnp.bfloat16), bl_p]

    kernel = make_rnn_softmax_kernel(n_layers, T, Bp, Hp, Op)
    vmem = pl.BlockSpec(memory_space=pltpu.MemorySpace.VMEM)

    logits2d, probs2d, h_out2d = pl.pallas_call(
        kernel,
        out_shape=(
            jax.ShapeDtypeStruct((T * Bp, Op), jnp.float32),
            jax.ShapeDtypeStruct((T * Bp, Op), jnp.float32),
            jax.ShapeDtypeStruct((n_layers * Bp, Hp), jnp.float32),
        ),
        in_specs=[vmem] * len(args),
        out_specs=(vmem, vmem, vmem),
        scratch_shapes=[pltpu.VMEM((T * Bp, 3 * Hp), jnp.float32),
                        pltpu.VMEM((T * Bp, Hp), jnp.float32)],
        compiler_params=pltpu.CompilerParams(vmem_limit_bytes=32 * 1024 * 1024),
    )(*args)

    # glue: strip padding, back to batch_first / (n_layers, B, H)
    logits = jnp.transpose(logits2d.reshape(T, Bp, Op)[:, :B, :n_out], (1, 0, 2))
    probs = jnp.transpose(probs2d.reshape(T, Bp, Op)[:, :B, :n_out], (1, 0, 2))
    h_out = h_out2d.reshape(n_layers, Bp, Hp)[:, :B, :H]
    return logits, probs, h_out


# ----------------- pure-JAX reference (PyTorch GRU semantics) -----------------
def rnn_softmax_ref(z, h0, gru_params, lin_w, lin_b, matmul_dtype=jnp.float32):
    B, T, _ = z.shape
    H = h0.shape[-1]

    def mm(a, b):
        return jnp.dot(a.astype(matmul_dtype), b.astype(matmul_dtype),
                       preferred_element_type=jnp.float32)

    seq = z
    h_finals = []
    for l, (Wih, Whh, bih, bhh) in enumerate(gru_params):
        h = h0[l]
        outs = []
        for t in range(T):
            x = seq[:, t, :]
            gi = mm(x, Wih.T) + bih
            gh = mm(h, Whh.T) + bhh
            r = jax.nn.sigmoid(gi[:, :H] + gh[:, :H])
            zg = jax.nn.sigmoid(gi[:, H:2 * H] + gh[:, H:2 * H])
            n = jnp.tanh(gi[:, 2 * H:] + r * gh[:, 2 * H:])
            h = (1.0 - zg) * n + zg * h
            outs.append(h)
        seq = jnp.stack(outs, axis=1)
        h_finals.append(h)
    logits = mm(seq, lin_w.T) + lin_b
    probs = jax.nn.softmax(logits, axis=-1)
    return logits, probs, jnp.stack(h_finals, axis=0)


if __name__ == "__main__":
    # small shapes implied by the module: params.n_latent, params.n_hidden, params.n_layers
    B, T = 2, 8
    n_latent = 32          # n_in == n_out == n_latent
    n_hidden = 32
    n_layers = 2

    key = jax.random.PRNGKey(0)
    keys = jax.random.split(key, 4 * n_layers + 4)

    def xavier(k, shape):
        fan_out, fan_in = shape
        scale = (2.0 / (fan_in + fan_out)) ** 0.5
        return scale * jax.random.normal(k, shape, dtype=jnp.float32)

    # deterministic synthetic parameters (PyTorch orientation / gate order r,z,n)
    gru_params = []
    ki = 0
    for l in range(n_layers):
        in_l = n_latent if l == 0 else n_hidden
        Wih = xavier(keys[ki], (3 * n_hidden, in_l)); ki += 1
        Whh = xavier(keys[ki], (3 * n_hidden, n_hidden)); ki += 1
        bih = 0.1 * jax.random.normal(keys[ki], (3 * n_hidden,), dtype=jnp.float32); ki += 1
        bhh = 0.1 * jax.random.normal(keys[ki], (3 * n_hidden,), dtype=jnp.float32); ki += 1
        gru_params.append((Wih, Whh, bih, bhh))
    lin_w = xavier(keys[ki], (n_latent, n_hidden)); ki += 1
    lin_b = 0.1 * jax.random.normal(keys[ki], (n_latent,), dtype=jnp.float32); ki += 1

    z = jax.random.normal(keys[ki], (B, T, n_latent), dtype=jnp.float32); ki += 1
    h0 = jax.random.normal(keys[ki], (n_layers, B, n_hidden), dtype=jnp.float32)

    logits, probs, h_out = rnn_softmax_forward(
        z, h0, gru_params, lin_w, lin_b, n_layers=n_layers, n_hidden=n_hidden)
    jax.block_until_ready((logits, probs, h_out))

    # tight check vs a reference using the same bf16 matmul operands / f32 accum
    ref_logits, ref_probs, ref_h = rnn_softmax_ref(
        z, h0, gru_params, lin_w, lin_b, matmul_dtype=jnp.bfloat16)
    assert jnp.allclose(logits, ref_logits, atol=2e-3, rtol=2e-3)
    assert jnp.allclose(probs, ref_probs, atol=5e-3, rtol=5e-3)
    assert jnp.allclose(h_out, ref_h, atol=2e-3, rtol=2e-3)

    # loose sanity check vs the full-f32 reference (bf16 matmul operand error)
    f32_logits, f32_probs, f32_h = rnn_softmax_ref(z, h0, gru_params, lin_w, lin_b)
    assert jnp.allclose(logits, f32_logits, atol=1e-1, rtol=1e-1)
    assert jnp.allclose(probs, f32_probs, atol=2e-2, rtol=2e-2)
    assert jnp.allclose(h_out, f32_h, atol=1e-1, rtol=1e-1)

    # probs rows should sum to 1 (exact reciprocal in the softmax)
    assert jnp.allclose(probs.sum(-1), 1.0, atol=1e-5)

    print("KERNEL_OK")
</pallas_src>

<mosaic_0001>
module attributes {stable_mosaic.version = 11 : i64} {
  func.func @kernel(%arg0: memref<64x128xbf16, #tpu.memory_space<vmem>>, %arg1: memref<16x128xf32, #tpu.memory_space<vmem>>, %arg2: memref<128x384xbf16, #tpu.memory_space<vmem>>, %arg3: memref<128x384xbf16, #tpu.memory_space<vmem>>, %arg4: memref<1x384xf32, #tpu.memory_space<vmem>>, %arg5: memref<1x128xf32, #tpu.memory_space<vmem>>, %arg6: memref<128x384xbf16, #tpu.memory_space<vmem>>, %arg7: memref<128x384xbf16, #tpu.memory_space<vmem>>, %arg8: memref<1x384xf32, #tpu.memory_space<vmem>>, %arg9: memref<1x128xf32, #tpu.memory_space<vmem>>, %arg10: memref<128x128xbf16, #tpu.memory_space<vmem>>, %arg11: memref<1x128xf32, #tpu.memory_space<vmem>>, %arg12: memref<64x128xf32, #tpu.memory_space<vmem>>, %arg13: memref<64x128xf32, #tpu.memory_space<vmem>>, %arg14: memref<16x128xf32, #tpu.memory_space<vmem>>, %arg15: memref<64x384xf32, #tpu.memory_space<vmem>>, %arg16: memref<64x128xf32, #tpu.memory_space<vmem>>) attributes {dimension_semantics = [], scalar_prefetch = 0 : i64, scratch_operands = 2 : i64, tpu.core_type = #tpu.core_type<tc>} {
    %c0 = arith.constant 0 : index
    %c0_0 = arith.constant 0 : index
    %0 = vector.load %arg5[%c0, %c0_0] : memref<1x128xf32, #tpu.memory_space<vmem>>, vector<1x128xf32>
    %1 = vector.shape_cast %0 : vector<1x128xf32> to vector<1x128xf32>
    %2 = vector.broadcast %1 : vector<1x128xf32> to vector<8x128xf32>
    %c0_1 = arith.constant 0 : index
    %c0_2 = arith.constant 0 : index
    %3 = vector.load %arg1[%c0_1, %c0_2] : memref<16x128xf32, #tpu.memory_space<vmem>>, vector<8x128xf32>
    %c0_3 = arith.constant 0 : index
    %c0_4 = arith.constant 0 : index
    %4 = vector.load %arg0[%c0_3, %c0_4] : memref<64x128xbf16, #tpu.memory_space<vmem>>, vector<64x128xbf16>
    %c0_5 = arith.constant 0 : index
    %c0_6 = arith.constant 0 : index
    %5 = vector.load %arg2[%c0_5, %c0_6] : memref<128x384xbf16, #tpu.memory_space<vmem>>, vector<128x384xbf16>
    %cst = arith.constant dense<0.000000e+00> : vector<64x384xf32>
    %6 = tpu.matmul %4, %5, %cst {dimension_numbers = #tpu.dot_dimension_numbers<[1], [0], [0], [1], [0, 0, 1, 1], [], []>} : vector<64x128xbf16>, vector<128x384xbf16>, vector<64x384xf32> -> vector<64x384xf32>
    %c0_7 = arith.constant 0 : index
    %c0_8 = arith.constant 0 : index
    %7 = vector.load %arg4[%c0_7, %c0_8] : memref<1x384xf32, #tpu.memory_space<vmem>>, vector<1x384xf32>
    %8 = vector.shape_cast %7 : vector<1x384xf32> to vector<1x384xf32>
    %9 = vector.broadcast %8 : vector<1x384xf32> to vector<64x384xf32>
    %10 = arith.addf %6, %9 : vector<64x384xf32>
    %c0_9 = arith.constant 0 : index
    %c0_10 = arith.constant 0 : index
    %11 = vector.load %arg15[%c0_9, %c0_10] : memref<64x384xf32, #tpu.memory_space<vmem>>, vector<64x384xf32>
    tpu.vector_store %arg15[%c0_9, %c0_10], %10 {strides = array<i32>} : memref<64x384xf32, #tpu.memory_space<vmem>>, vector<64x384xf32>,
    %c0_11 = arith.constant 0 : index
    %c0_12 = arith.constant 0 : index
    %12 = vector.load %arg15[%c0_11, %c0_12] : memref<64x384xf32, #tpu.memory_space<vmem>>, vector<8x384xf32>
    %13 = arith.truncf %3 : vector<8x128xf32> to vector<8x128xbf16>
    %c0_13 = arith.constant 0 : index
    %c0_14 = arith.constant 0 : index
    %14 = vector.load %arg3[%c0_13, %c0_14] : memref<128x384xbf16, #tpu.memory_space<vmem>>, vector<128x384xbf16>
    %cst_15 = arith.constant dense<0.000000e+00> : vector<8x384xf32>
    %15 = tpu.matmul %13, %14, %cst_15 {dimension_numbers = #tpu.dot_dimension_numbers<[1], [0], [0], [1], [0, 0, 1, 1], [], []>} : vector<8x128xbf16>, vector<128x384xbf16>, vector<8x384xf32> -> vector<8x384xf32>
    %16 = vector.extract_strided_slice %12 {offsets = [0, 0], sizes = [8, 128], strides = [1, 1]} : vector<8x384xf32> to vector<8x128xf32>
    %17 = vector.extract_strided_slice %15 {offsets = [0, 0], sizes = [8, 128], strides = [1, 1]} : vector<8x384xf32> to vector<8x128xf32>
    %18 = arith.addf %16, %17 : vector<8x128xf32>
    %19 = arith.negf %18 : vector<8x128xf32>
    %20 = math.exp %19 : vector<8x128xf32>
    %cst_16 = arith.constant 1.000000e+00 : f32
    %21 = vector.broadcast %cst_16 : f32 to vector<8x128xf32>
    %22 = arith.addf %21, %20 : vector<8x128xf32>
    %23 = arith.divf %21, %22 : vector<8x128xf32>
    %24 = vector.extract_strided_slice %12 {offsets = [0, 128], sizes = [8, 128], strides = [1, 1]} : vector<8x384xf32> to vector<8x128xf32>
    %25 = vector.extract_strided_slice %15 {offsets = [0, 128], sizes = [8, 128], strides = [1, 1]} : vector<8x384xf32> to vector<8x128xf32>
    %26 = arith.addf %24, %25 : vector<8x128xf32>
    %27 = arith.negf %26 : vector<8x128xf32>
    %28 = math.exp %27 : vector<8x128xf32>
    %cst_17 = arith.constant 1.000000e+00 : f32
    %29 = vector.broadcast %cst_17 : f32 to vector<8x128xf32>
    %30 = arith.addf %29, %28 : vector<8x128xf32>
    %31 = arith.divf %29, %30 : vector<8x128xf32>
    %32 = vector.extract_strided_slice %12 {offsets = [0, 256], sizes = [8, 128], strides = [1, 1]} : vector<8x384xf32> to vector<8x128xf32>
    %33 = vector.extract_strided_slice %15 {offsets = [0, 256], sizes = [8, 128], strides = [1, 1]} : vector<8x384xf32> to vector<8x128xf32>
    %34 = arith.addf %33, %2 : vector<8x128xf32>
    %35 = arith.mulf %23, %34 : vector<8x128xf32>
    %36 = arith.addf %32, %35 : vector<8x128xf32>
    %37 = math.tanh %36 : vector<8x128xf32>
    %38 = arith.subf %3, %37 : vector<8x128xf32>
    %39 = arith.mulf %31, %38 : vector<8x128xf32>
    %40 = arith.addf %37, %39 : vector<8x128xf32>
    %c8 = arith.constant 8 : index
    %c0_18 = arith.constant 0 : index
    %41 = vector.load %arg15[%c8, %c0_18] : memref<64x384xf32, #tpu.memory_space<vmem>>, vector<8x384xf32>
    %42 = arith.truncf %40 : vector<8x128xf32> to vector<8x128xbf16>
    %c0_19 = arith.constant 0 : index
    %c0_20 = arith.constant 0 : index
    %43 = vector.load %arg3[%c0_19, %c0_20] : memref<128x384xbf16, #tpu.memory_space<vmem>>, vector<128x384xbf16>
    %cst_21 = arith.constant dense<0.000000e+00> : vector<8x384xf32>
    %44 = tpu.matmul %42, %43, %cst_21 {dimension_numbers = #tpu.dot_dimension_numbers<[1], [0], [0], [1], [0, 0, 1, 1], [], []>} : vector<8x128xbf16>, vector<128x384xbf16>, vector<8x384xf32> -> vector<8x384xf32>
    %45 = vector.extract_strided_slice %41 {offsets = [0, 0], sizes = [8, 128], strides = [1, 1]} : vector<8x384xf32> to vector<8x128xf32>
    %46 = vector.extract_strided_slice %44 {offsets = [0, 0], sizes = [8, 128], strides = [1, 1]} : vector<8x384xf32> to vector<8x128xf32>
    %47 = arith.addf %45, %46 : vector<8x128xf32>
    %48 = arith.negf %47 : vector<8x128xf32>
    %49 = math.exp %48 : vector<8x128xf32>
    %cst_22 = arith.constant 1.000000e+00 : f32
    %50 = vector.broadcast %cst_22 : f32 to vector<8x128xf32>
    %51 = arith.addf %50, %49 : vector<8x128xf32>
    %52 = arith.divf %50, %51 : vector<8x128xf32>
    %53 = vector.extract_strided_slice %41 {offsets = [0, 128], sizes = [8, 128], strides = [1, 1]} : vector<8x384xf32> to vector<8x128xf32>
    %54 = vector.extract_strided_slice %44 {offsets = [0, 128], sizes = [8, 128], strides = [1, 1]} : vector<8x384xf32> to vector<8x128xf32>
    %55 = arith.addf %53, %54 : vector<8x128xf32>
    %56 = arith.negf %55 : vector<8x128xf32>
    %57 = math.exp %56 : vector<8x128xf32>
    %cst_23 = arith.constant 1.000000e+00 : f32
    %58 = vector.broadcast %cst_23 : f32 to vector<8x128xf32>
    %59 = arith.addf %58, %57 : vector<8x128xf32>
    %60 = arith.divf %58, %59 : vector<8x128xf32>
    %61 = vector.extract_strided_slice %41 {offsets = [0, 256], sizes = [8, 128], strides = [1, 1]} : vector<8x384xf32> to vector<8x128xf32>
    %62 = vector.extract_strided_slice %44 {offsets = [0, 256], sizes = [8, 128], strides = [1, 1]} : vector<8x384xf32> to vector<8x128xf32>
    %63 = arith.addf %62, %2 : vector<8x128xf32>
    %64 = arith.mulf %52, %63 : vector<8x128xf32>
    %65 = arith.addf %61, %64 : vector<8x128xf32>
    %66 = math.tanh %65 : vector<8x128xf32>
    %67 = arith.subf %40, %66 : vector<8x128xf32>
    %68 = arith.mulf %60, %67 : vector<8x128xf32>
    %69 = arith.addf %66, %68 : vector<8x128xf32>
    %c16 = arith.constant 16 : index
    %c0_24 = arith.constant 0 : index
    %70 = vector.load %arg15[%c16, %c0_24] : memref<64x384xf32, #tpu.memory_space<vmem>>, vector<8x384xf32>
    %71 = arith.truncf %69 : vector<8x128xf32> to vector<8x128xbf16>
    %c0_25 = arith.constant 0 : index
    %c0_26 = arith.constant 0 : index
    %72 = vector.load %arg3[%c0_25, %c0_26] : memref<128x384xbf16, #tpu.memory_space<vmem>>, vector<128x384xbf16>
    %cst_27 = arith.constant dense<0.000000e+00> : vector<8x384xf32>
    %73 = tpu.matmul %71, %72, %cst_27 {dimension_numbers = #tpu.dot_dimension_numbers<[1], [0], [0], [1], [0, 0, 1, 1], [], []>} : vector<8x128xbf16>, vector<128x384xbf16>, vector<8x384xf32> -> vector<8x384xf32>
    %74 = vector.extract_strided_slice %70 {offsets = [0, 0], sizes = [8, 128], strides = [1, 1]} : vector<8x384xf32> to vector<8x128xf32>
    %75 = vector.extract_strided_slice %73 {offsets = [0, 0], sizes = [8, 128], strides = [1, 1]} : vector<8x384xf32> to vector<8x128xf32>
    %76 = arith.addf %74, %75 : vector<8x128xf32>
    %77 = arith.negf %76 : vector<8x128xf32>
    %78 = math.exp %77 : vector<8x128xf32>
    %cst_28 = arith.constant 1.000000e+00 : f32
    %79 = vector.broadcast %cst_28 : f32 to vector<8x128xf32>
    %80 = arith.addf %79, %78 : vector<8x128xf32>
    %81 = arith.divf %79, %80 : vector<8x128xf32>
    %82 = vector.extract_strided_slice %70 {offsets = [0, 128], sizes = [8, 128], strides = [1, 1]} : vector<8x384xf32> to vector<8x128xf32>
    %83 = vector.extract_strided_slice %73 {offsets = [0, 128], sizes = [8, 128], strides = [1, 1]} : vector<8x384xf32> to vector<8x128xf32>
    %84 = arith.addf %82, %83 : vector<8x128xf32>
    %85 = arith.negf %84 : vector<8x128xf32>
    %86 = math.exp %85 : vector<8x128xf32>
    %cst_29 = arith.constant 1.000000e+00 : f32
    %87 = vector.broadcast %cst_29 : f32 to vector<8x128xf32>
    %88 = arith.addf %87, %86 : vector<8x128xf32>
    %89 = arith.divf %87, %88 : vector<8x128xf32>
    %90 = vector.extract_strided_slice %70 {offsets = [0, 256], sizes = [8, 128], strides = [1, 1]} : vector<8x384xf32> to vector<8x128xf32>
    %91 = vector.extract_strided_slice %73 {offsets = [0, 256], sizes = [8, 128], strides = [1, 1]} : vector<8x384xf32> to vector<8x128xf32>
    %92 = arith.addf %91, %2 : vector<8x128xf32>
    %93 = arith.mulf %81, %92 : vector<8x128xf32>
    %94 = arith.addf %90, %93 : vector<8x128xf32>
    %95 = math.tanh %94 : vector<8x128xf32>
    %96 = arith.subf %69, %95 : vector<8x128xf32>
    %97 = arith.mulf %89, %96 : vector<8x128xf32>
    %98 = arith.addf %95, %97 : vector<8x128xf32>
    %c24 = arith.constant 24 : index
    %c0_30 = arith.constant 0 : index
    %99 = vector.load %arg15[%c24, %c0_30] : memref<64x384xf32, #tpu.memory_space<vmem>>, vector<8x384xf32>
    %100 = arith.truncf %98 : vector<8x128xf32> to vector<8x128xbf16>
    %c0_31 = arith.constant 0 : index
    %c0_32 = arith.constant 0 : index
    %101 = vector.load %arg3[%c0_31, %c0_32] : memref<128x384xbf16, #tpu.memory_space<vmem>>, vector<128x384xbf16>
    %cst_33 = arith.constant dense<0.000000e+00> : vector<8x384xf32>
    %102 = tpu.matmul %100, %101, %cst_33 {dimension_numbers = #tpu.dot_dimension_numbers<[1], [0], [0], [1], [0, 0, 1, 1], [], []>} : vector<8x128xbf16>, vector<128x384xbf16>, vector<8x384xf32> -> vector<8x384xf32>
    %103 = vector.extract_strided_slice %99 {offsets = [0, 0], sizes = [8, 128], strides = [1, 1]} : vector<8x384xf32> to vector<8x128xf32>
    %104 = vector.extract_strided_slice %102 {offsets = [0, 0], sizes = [8, 128], strides = [1, 1]} : vector<8x384xf32> to vector<8x128xf32>
    %105 = arith.addf %103, %104 : vector<8x128xf32>
    %106 = arith.negf %105 : vector<8x128xf32>
    %107 = math.exp %106 : vector<8x128xf32>
    %cst_34 = arith.constant 1.000000e+00 : f32
    %108 = vector.broadcast %cst_34 : f32 to vector<8x128xf32>
    %109 = arith.addf %108, %107 : vector<8x128xf32>
    %110 = arith.divf %108, %109 : vector<8x128xf32>
    %111 = vector.extract_strided_slice %99 {offsets = [0, 128], sizes = [8, 128], strides = [1, 1]} : vector<8x384xf32> to vector<8x128xf32>
    %112 = vector.extract_strided_slice %102 {offsets = [0, 128], sizes = [8, 128], strides = [1, 1]} : vector<8x384xf32> to vector<8x128xf32>
    %113 = arith.addf %111, %112 : vector<8x128xf32>
    %114 = arith.negf %113 : vector<8x128xf32>
    %115 = math.exp %114 : vector<8x128xf32>
    %cst_35 = arith.constant 1.000000e+00 : f32
    %116 = vector.broadcast %cst_35 : f32 to vector<8x128xf32>
    %117 = arith.addf %116, %115 : vector<8x128xf32>
    %118 = arith.divf %116, %117 : vector<8x128xf32>
    %119 = vector.extract_strided_slice %99 {offsets = [0, 256], sizes = [8, 128], strides = [1, 1]} : vector<8x384xf32> to vector<8x128xf32>
    %120 = vector.extract_strided_slice %102 {offsets = [0, 256], sizes = [8, 128], strides = [1, 1]} : vector<8x384xf32> to vector<8x128xf32>
    %121 = arith.addf %120, %2 : vector<8x128xf32>
    %122 = arith.mulf %110, %121 : vector<8x128xf32>
    %123 = arith.addf %119, %122 : vector<8x128xf32>
    %124 = math.tanh %123 : vector<8x128xf32>
    %125 = arith.subf %98, %124 : vector<8x128xf32>
    %126 = arith.mulf %118, %125 : vector<8x128xf32>
    %127 = arith.addf %124, %126 : vector<8x128xf32>
    %c32 = arith.constant 32 : index
    %c0_36 = arith.constant 0 : index
    %128 = vector.load %arg15[%c32, %c0_36] : memref<64x384xf32, #tpu.memory_space<vmem>>, vector<8x384xf32>
    %129 = arith.truncf %127 : vector<8x128xf32> to vector<8x128xbf16>
    %c0_37 = arith.constant 0 : index
    %c0_38 = arith.constant 0 : index
    %130 = vector.load %arg3[%c0_37, %c0_38] : memref<128x384xbf16, #tpu.memory_space<vmem>>, vector<128x384xbf16>
    %cst_39 = arith.constant dense<0.000000e+00> : vector<8x384xf32>
    %131 = tpu.matmul %129, %130, %cst_39 {dimension_numbers = #tpu.dot_dimension_numbers<[1], [0], [0], [1], [0, 0, 1, 1], [], []>} : vector<8x128xbf16>, vector<128x384xbf16>, vector<8x384xf32> -> vector<8x384xf32>
    %132 = vector.extract_strided_slice %128 {offsets = [0, 0], sizes = [8, 128], strides = [1, 1]} : vector<8x384xf32> to vector<8x128xf32>
    %133 = vector.extract_strided_slice %131 {offsets = [0, 0], sizes = [8, 128], strides = [1, 1]} : vector<8x384xf32> to vector<8x128xf32>
    %134 = arith.addf %132, %133 : vector<8x128xf32>
    %135 = arith.negf %134 : vector<8x128xf32>
    %136 = math.exp %135 : vector<8x128xf32>
    %cst_40 = arith.constant 1.000000e+00 : f32
    %137 = vector.broadcast %cst_40 : f32 to vector<8x128xf32>
    %138 = arith.addf %137, %136 : vector<8x128xf32>
    %139 = arith.divf %137, %138 : vector<8x128xf32>
    %140 = vector.extract_strided_slice %128 {offsets = [0, 128], sizes = [8, 128], strides = [1, 1]} : vector<8x384xf32> to vector<8x128xf32>
    %141 = vector.extract_strided_slice %131 {offsets = [0, 128], sizes = [8, 128], strides = [1, 1]} : vector<8x384xf32> to vector<8x128xf32>
    %142 = arith.addf %140, %141 : vector<8x128xf32>
    %143 = arith.negf %142 : vector<8x128xf32>
    %144 = math.exp %143 : vector<8x128xf32>
    %cst_41 = arith.constant 1.000000e+00 : f32
    %145 = vector.broadcast %cst_41 : f32 to vector<8x128xf32>
    %146 = arith.addf %145, %144 : vector<8x128xf32>
    %147 = arith.divf %145, %146 : vector<8x128xf32>
    %148 = vector.extract_strided_slice %128 {offsets = [0, 256], sizes = [8, 128], strides = [1, 1]} : vector<8x384xf32> to vector<8x128xf32>
    %149 = vector.extract_strided_slice %131 {offsets = [0, 256], sizes = [8, 128], strides = [1, 1]} : vector<8x384xf32> to vector<8x128xf32>
    %150 = arith.addf %149, %2 : vector<8x128xf32>
    %151 = arith.mulf %139, %150 : vector<8x128xf32>
    %152 = arith.addf %148, %151 : vector<8x128xf32>
    %153 = math.tanh %152 : vector<8x128xf32>
    %154 = arith.subf %127, %153 : vector<8x128xf32>
    %155 = arith.mulf %147, %154 : vector<8x128xf32>
    %156 = arith.addf %153, %155 : vector<8x128xf32>
    %c40 = arith.constant 40 : index
    %c0_42 = arith.constant 0 : index
    %157 = vector.load %arg15[%c40, %c0_42] : memref<64x384xf32, #tpu.memory_space<vmem>>, vector<8x384xf32>
    %158 = arith.truncf %156 : vector<8x128xf32> to vector<8x128xbf16>
    %c0_43 = arith.constant 0 : index
    %c0_44 = arith.constant 0 : index
    %159 = vector.load %arg3[%c0_43, %c0_44] : memref<128x384xbf16, #tpu.memory_space<vmem>>, vector<128x384xbf16>
    %cst_45 = arith.constant dense<0.000000e+00> : vector<8x384xf32>
    %160 = tpu.matmul %158, %159, %cst_45 {dimension_numbers = #tpu.dot_dimension_numbers<[1], [0], [0], [1], [0, 0, 1, 1], [], []>} : vector<8x128xbf16>, vector<128x384xbf16>, vector<8x384xf32> -> vector<8x384xf32>
    %161 = vector.extract_strided_slice %157 {offsets = [0, 0], sizes = [8, 128], strides = [1, 1]} : vector<8x384xf32> to vector<8x128xf32>
    %162 = vector.extract_strided_slice %160 {offsets = [0, 0], sizes = [8, 128], strides = [1, 1]} : vector<8x384xf32> to vector<8x128xf32>
    %163 = arith.addf %161, %162 : vector<8x128xf32>
    %164 = arith.negf %163 : vector<8x128xf32>
    %165 = math.exp %164 : vector<8x128xf32>
    %cst_46 = arith.constant 1.000000e+00 : f32
    %166 = vector.broadcast %cst_46 : f32 to vector<8x128xf32>
    %167 = arith.addf %166, %165 : vector<8x128xf32>
    %168 = arith.divf %166, %167 : vector<8x128xf32>
    %169 = vector.extract_strided_slice %157 {offsets = [0, 128], sizes = [8, 128], strides = [1, 1]} : vector<8x384xf32> to vector<8x128xf32>
    %170 = vector.extract_strided_slice %160 {offsets = [0, 128], sizes = [8, 128], strides = [1, 1]} : vector<8x384xf32> to vector<8x128xf32>
    %171 = arith.addf %169, %170 : vector<8x128xf32>
    %172 = arith.negf %171 : vector<8x128xf32>
    %173 = math.exp %172 : vector<8x128xf32>
    %cst_47 = arith.constant 1.000000e+00 : f32
    %174 = vector.broadcast %cst_47 : f32 to vector<8x128xf32>
    %175 = arith.addf %174, %173 : vector<8x128xf32>
    %176 = arith.divf %174, %175 : vector<8x128xf32>
    %177 = vector.extract_strided_slice %157 {offsets = [0, 256], sizes = [8, 128], strides = [1, 1]} : vector<8x384xf32> to vector<8x128xf32>
    %178 = vector.extract_strided_slice %160 {offsets = [0, 256], sizes = [8, 128], strides = [1, 1]} : vector<8x384xf32> to vector<8x128xf32>
    %179 = arith.addf %178, %2 : vector<8x128xf32>
    %180 = arith.mulf %168, %179 : vector<8x128xf32>
    %181 = arith.addf %177, %180 : vector<8x128xf32>
    %182 = math.tanh %181 : vector<8x128xf32>
    %183 = arith.subf %156, %182 : vector<8x128xf32>
    %184 = arith.mulf %176, %183 : vector<8x128xf32>
    %185 = arith.addf %182, %184 : vector<8x128xf32>
    %c48 = arith.constant 48 : index
    %c0_48 = arith.constant 0 : index
    %186 = vector.load %arg15[%c48, %c0_48] : memref<64x384xf32, #tpu.memory_space<vmem>>, vector<8x384xf32>
    %187 = arith.truncf %185 : vector<8x128xf32> to vector<8x128xbf16>
    %c0_49 = arith.constant 0 : index
    %c0_50 = arith.constant 0 : index
    %188 = vector.load %arg3[%c0_49, %c0_50] : memref<128x384xbf16, #tpu.memory_space<vmem>>, vector<128x384xbf16>
    %cst_51 = arith.constant dense<0.000000e+00> : vector<8x384xf32>
    %189 = tpu.matmul %187, %188, %cst_51 {dimension_numbers = #tpu.dot_dimension_numbers<[1], [0], [0], [1], [0, 0, 1, 1], [], []>} : vector<8x128xbf16>, vector<128x384xbf16>, vector<8x384xf32> -> vector<8x384xf32>
    %190 = vector.extract_strided_slice %186 {offsets = [0, 0], sizes = [8, 128], strides = [1, 1]} : vector<8x384xf32> to vector<8x128xf32>
    %191 = vector.extract_strided_slice %189 {offsets = [0, 0], sizes = [8, 128], strides = [1, 1]} : vector<8x384xf32> to vector<8x128xf32>
    %192 = arith.addf %190, %191 : vector<8x128xf32>
    %193 = arith.negf %192 : vector<8x128xf32>
    %194 = math.exp %193 : vector<8x128xf32>
    %cst_52 = arith.constant 1.000000e+00 : f32
    %195 = vector.broadcast %cst_52 : f32 to vector<8x128xf32>
    %196 = arith.addf %195, %194 : vector<8x128xf32>
    %197 = arith.divf %195, %196 : vector<8x128xf32>
    %198 = vector.extract_strided_slice %186 {offsets = [0, 128], sizes = [8, 128], strides = [1, 1]} : vector<8x384xf32> to vector<8x128xf32>
    %199 = vector.extract_strided_slice %189 {offsets = [0, 128], sizes = [8, 128], strides = [1, 1]} : vector<8x384xf32> to vector<8x128xf32>
    %200 = arith.addf %198, %199 : vector<8x128xf32>
    %201 = arith.negf %200 : vector<8x128xf32>
    %202 = math.exp %201 : vector<8x128xf32>
    %cst_53 = arith.constant 1.000000e+00 : f32
    %203 = vector.broadcast %cst_53 : f32 to vector<8x128xf32>
    %204 = arith.addf %203, %202 : vector<8x128xf32>
    %205 = arith.divf %203, %204 : vector<8x128xf32>
    %206 = vector.extract_strided_slice %186 {offsets = [0, 256], sizes = [8, 128], strides = [1, 1]} : vector<8x384xf32> to vector<8x128xf32>
    %207 = vector.extract_strided_slice %189 {offsets = [0, 256], sizes = [8, 128], strides = [1, 1]} : vector<8x384xf32> to vector<8x128xf32>
    %208 = arith.addf %207, %2 : vector<8x128xf32>
    %209 = arith.mulf %197, %208 : vector<8x128xf32>
    %210 = arith.addf %206, %209 : vector<8x128xf32>
    %211 = math.tanh %210 : vector<8x128xf32>
    %212 = arith.subf %185, %211 : vector<8x128xf32>
    %213 = arith.mulf %205, %212 : vector<8x128xf32>
    %214 = arith.addf %211, %213 : vector<8x128xf32>
    %c56 = arith.constant 56 : index
    %c0_54 = arith.constant 0 : index
    %215 = vector.load %arg15[%c56, %c0_54] : memref<64x384xf32, #tpu.memory_space<vmem>>, vector<8x384xf32>
    %216 = arith.truncf %214 : vector<8x128xf32> to vector<8x128xbf16>
    %c0_55 = arith.constant 0 : index
    %c0_56 = arith.constant 0 : index
    %217 = vector.load %arg3[%c0_55, %c0_56] : memref<128x384xbf16, #tpu.memory_space<vmem>>, vector<128x384xbf16>
    %cst_57 = arith.constant dense<0.000000e+00> : vector<8x384xf32>
    %218 = tpu.matmul %216, %217, %cst_57 {dimension_numbers = #tpu.dot_dimension_numbers<[1], [0], [0], [1], [0, 0, 1, 1], [], []>} : vector<8x128xbf16>, vector<128x384xbf16>, vector<8x384xf32> -> vector<8x384xf32>
    %219 = vector.extract_strided_slice %215 {offsets = [0, 0], sizes = [8, 128], strides = [1, 1]} : vector<8x384xf32> to vector<8x128xf32>
    %220 = vector.extract_strided_slice %218 {offsets = [0, 0], sizes = [8, 128], strides = [1, 1]} : vector<8x384xf32> to vector<8x128xf32>
    %221 = arith.addf %219, %220 : vector<8x128xf32>
    %222 = arith.negf %221 : vector<8x128xf32>
    %223 = math.exp %222 : vector<8x128xf32>
    %cst_58 = arith.constant 1.000000e+00 : f32
    %224 = vector.broadcast %cst_58 : f32 to vector<8x128xf32>
    %225 = arith.addf %224, %223 : vector<8x128xf32>
    %226 = arith.divf %224, %225 : vector<8x128xf32>
    %227 = vector.extract_strided_slice %215 {offsets = [0, 128], sizes = [8, 128], strides = [1, 1]} : vector<8x384xf32> to vector<8x128xf32>
    %228 = vector.extract_strided_slice %218 {offsets = [0, 128], sizes = [8, 128], strides = [1, 1]} : vector<8x384xf32> to vector<8x128xf32>
    %229 = arith.addf %227, %228 : vector<8x128xf32>
    %230 = arith.negf %229 : vector<8x128xf32>
    %231 = math.exp %230 : vector<8x128xf32>
    %cst_59 = arith.constant 1.000000e+00 : f32
    %232 = vector.broadcast %cst_59 : f32 to vector<8x128xf32>
    %233 = arith.addf %232, %231 : vector<8x128xf32>
    %234 = arith.divf %232, %233 : vector<8x128xf32>
    %235 = vector.extract_strided_slice %215 {offsets = [0, 256], sizes = [8, 128], strides = [1, 1]} : vector<8x384xf32> to vector<8x128xf32>
    %236 = vector.extract_strided_slice %218 {offsets = [0, 256], sizes = [8, 128], strides = [1, 1]} : vector<8x384xf32> to vector<8x128xf32>
    %237 = arith.addf %236, %2 : vector<8x128xf32>
    %238 = arith.mulf %226, %237 : vector<8x128xf32>
    %239 = arith.addf %235, %238 : vector<8x128xf32>
    %240 = math.tanh %239 : vector<8x128xf32>
    %241 = arith.subf %214, %240 : vector<8x128xf32>
    %242 = arith.mulf %234, %241 : vector<8x128xf32>
    %243 = arith.addf %240, %242 : vector<8x128xf32>
    %c0_60 = arith.constant 0 : index
    %c0_61 = arith.constant 0 : index
    %244 = vector.load %arg14[%c0_60, %c0_61] : memref<16x128xf32, #tpu.memory_space<vmem>>, vector<8x128xf32>
    tpu.vector_store %arg14[%c0_60, %c0_61], %243 {strides = array<i32>} : memref<16x128xf32, #tpu.memory_space<vmem>>, vector<8x128xf32>,
    %c0_62 = arith.constant 0 : index
    %c0_63 = arith.constant 0 : index
    %245 = vector.load %arg9[%c0_62, %c0_63] : memref<1x128xf32, #tpu.memory_space<vmem>>, vector<1x128xf32>
    %246 = vector.shape_cast %245 : vector<1x128xf32> to vector<1x128xf32>
    %247 = vector.broadcast %246 : vector<1x128xf32> to vector<8x128xf32>
    %c0_64 = arith.constant 0 : index
    %c0_65 = arith.constant 0 : index
    %248 = vector.load %arg8[%c0_64, %c0_65] : memref<1x384xf32, #tpu.memory_space<vmem>>, vector<1x384xf32>
    %249 = vector.shape_cast %248 : vector<1x384xf32> to vector<1x384xf32>
    %250 = vector.broadcast %249 : vector<1x384xf32> to vector<8x384xf32>
    %c8_66 = arith.constant 8 : index
    %c0_67 = arith.constant 0 : index
    %251 = vector.load %arg1[%c8_66, %c0_67] : memref<16x128xf32, #tpu.memory_space<vmem>>, vector<8x128xf32>
    %252 = arith.truncf %40 : vector<8x128xf32> to vector<8x128xbf16>
    %c0_68 = arith.constant 0 : index
    %c0_69 = arith.constant 0 : index
    %253 = vector.load %arg6[%c0_68, %c0_69] : memref<128x384xbf16, #tpu.memory_space<vmem>>, vector<128x384xbf16>
    %cst_70 = arith.constant dense<0.000000e+00> : vector<8x384xf32>
    %254 = tpu.matmul %252, %253, %cst_70 {dimension_numbers = #tpu.dot_dimension_numbers<[1], [0], [0], [1], [0, 0, 1, 1], [], []>} : vector<8x128xbf16>, vector<128x384xbf16>, vector<8x384xf32> -> vector<8x384xf32>
    %255 = arith.addf %254, %250 : vector<8x384xf32>
    %256 = arith.truncf %251 : vector<8x128xf32> to vector<8x128xbf16>
    %c0_71 = arith.constant 0 : index
    %c0_72 = arith.constant 0 : index
    %257 = vector.load %arg7[%c0_71, %c0_72] : memref<128x384xbf16, #tpu.memory_space<vmem>>, vector<128x384xbf16>
    %cst_73 = arith.constant dense<0.000000e+00> : vector<8x384xf32>
    %258 = tpu.matmul %256, %257, %cst_73 {dimension_numbers = #tpu.dot_dimension_numbers<[1], [0], [0], [1], [0, 0, 1, 1], [], []>} : vector<8x128xbf16>, vector<128x384xbf16>, vector<8x384xf32> -> vector<8x384xf32>
    %259 = vector.extract_strided_slice %255 {offsets = [0, 0], sizes = [8, 128], strides = [1, 1]} : vector<8x384xf32> to vector<8x128xf32>
    %260 = vector.extract_strided_slice %258 {offsets = [0, 0], sizes = [8, 128], strides = [1, 1]} : vector<8x384xf32> to vector<8x128xf32>
    %261 = arith.addf %259, %260 : vector<8x128xf32>
    %262 = arith.negf %261 : vector<8x128xf32>
    %263 = math.exp %262 : vector<8x128xf32>
    %cst_74 = arith.constant 1.000000e+00 : f32
    %264 = vector.broadcast %cst_74 : f32 to vector<8x128xf32>
    %265 = arith.addf %264, %263 : vector<8x128xf32>
    %266 = arith.divf %264, %265 : vector<8x128xf32>
    %267 = vector.extract_strided_slice %255 {offsets = [0, 128], sizes = [8, 128], strides = [1, 1]} : vector<8x384xf32> to vector<8x128xf32>
    %268 = vector.extract_strided_slice %258 {offsets = [0, 128], sizes = [8, 128], strides = [1, 1]} : vector<8x384xf32> to vector<8x128xf32>
    %269 = arith.addf %267, %268 : vector<8x128xf32>
    %270 = arith.negf %269 : vector<8x128xf32>
    %271 = math.exp %270 : vector<8x128xf32>
    %cst_75 = arith.constant 1.000000e+00 : f32
    %272 = vector.broadcast %cst_75 : f32 to vector<8x128xf32>
    %273 = arith.addf %272, %271 : vector<8x128xf32>
    %274 = arith.divf %272, %273 : vector<8x128xf32>
    %275 = vector.extract_strided_slice %255 {offsets = [0, 256], sizes = [8, 128], strides = [1, 1]} : vector<8x384xf32> to vector<8x128xf32>
    %276 = vector.extract_strided_slice %258 {offsets = [0, 256], sizes = [8, 128], strides = [1, 1]} : vector<8x384xf32> to vector<8x128xf32>
    %277 = arith.addf %276, %247 : vector<8x128xf32>
    %278 = arith.mulf %266, %277 : vector<8x128xf32>
    %279 = arith.addf %275, %278 : vector<8x128xf32>
    %280 = math.tanh %279 : vector<8x128xf32>
    %281 = arith.subf %251, %280 : vector<8x128xf32>
    %282 = arith.mulf %274, %281 : vector<8x128xf32>
    %283 = arith.addf %280, %282 : vector<8x128xf32>
    %c0_76 = arith.constant 0 : index
    %c0_77 = arith.constant 0 : index
    %284 = vector.load %arg16[%c0_76, %c0_77] : memref<64x128xf32, #tpu.memory_space<vmem>>, vector<8x128xf32>
    tpu.vector_store %arg16[%c0_76, %c0_77], %283 {strides = array<i32>} : memref<64x128xf32, #tpu.memory_space<vmem>>, vector<8x128xf32>,
    %285 = arith.truncf %69 : vector<8x128xf32> to vector<8x128xbf16>
    %c0_78 = arith.constant 0 : index
    %c0_79 = arith.constant 0 : index
    %286 = vector.load %arg6[%c0_78, %c0_79] : memref<128x384xbf16, #tpu.memory_space<vmem>>, vector<128x384xbf16>
    %cst_80 = arith.constant dense<0.000000e+00> : vector<8x384xf32>
    %287 = tpu.matmul %285, %286, %cst_80 {dimension_numbers = #tpu.dot_dimension_numbers<[1], [0], [0], [1], [0, 0, 1, 1], [], []>} : vector<8x128xbf16>, vector<128x384xbf16>, vector<8x384xf32> -> vector<8x384xf32>
    %288 = arith.addf %287, %250 : vector<8x384xf32>
    %289 = arith.truncf %283 : vector<8x128xf32> to vector<8x128xbf16>
    %c0_81 = arith.constant 0 : index
    %c0_82 = arith.constant 0 : index
    %290 = vector.load %arg7[%c0_81, %c0_82] : memref<128x384xbf16, #tpu.memory_space<vmem>>, vector<128x384xbf16>
    %cst_83 = arith.constant dense<0.000000e+00> : vector<8x384xf32>
    %291 = tpu.matmul %289, %290, %cst_83 {dimension_numbers = #tpu.dot_dimension_numbers<[1], [0], [0], [1], [0, 0, 1, 1], [], []>} : vector<8x128xbf16>, vector<128x384xbf16>, vector<8x384xf32> -> vector<8x384xf32>
    %292 = vector.extract_strided_slice %288 {offsets = [0, 0], sizes = [8, 128], strides = [1, 1]} : vector<8x384xf32> to vector<8x128xf32>
    %293 = vector.extract_strided_slice %291 {offsets = [0, 0], sizes = [8, 128], strides = [1, 1]} : vector<8x384xf32> to vector<8x128xf32>
    %294 = arith.addf %292, %293 : vector<8x128xf32>
    %295 = arith.negf %294 : vector<8x128xf32>
    %296 = math.exp %295 : vector<8x128xf32>
    %cst_84 = arith.constant 1.000000e+00 : f32
    %297 = vector.broadcast %cst_84 : f32 to vector<8x128xf32>
    %298 = arith.addf %297, %296 : vector<8x128xf32>
    %299 = arith.divf %297, %298 : vector<8x128xf32>
    %300 = vector.extract_strided_slice %288 {offsets = [0, 128], sizes = [8, 128], strides = [1, 1]} : vector<8x384xf32> to vector<8x128xf32>
    %301 = vector.extract_strided_slice %291 {offsets = [0, 128], sizes = [8, 128], strides = [1, 1]} : vector<8x384xf32> to vector<8x128xf32>
    %302 = arith.addf %300, %301 : vector<8x128xf32>
    %303 = arith.negf %302 : vector<8x128xf32>
    %304 = math.exp %303 : vector<8x128xf32>
    %cst_85 = arith.constant 1.000000e+00 : f32
    %305 = vector.broadcast %cst_85 : f32 to vector<8x128xf32>
    %306 = arith.addf %305, %304 : vector<8x128xf32>
    %307 = arith.divf %305, %306 : vector<8x128xf32>
    %308 = vector.extract_strided_slice %288 {offsets = [0, 256], sizes = [8, 128], strides = [1, 1]} : vector<8x384xf32> to vector<8x128xf32>
    %309 = vector.extract_strided_slice %291 {offsets = [0, 256], sizes = [8, 128], strides = [1, 1]} : vector<8x384xf32> to vector<8x128xf32>
    %310 = arith.addf %309, %247 : vector<8x128xf32>
    %311 = arith.mulf %299, %310 : vector<8x128xf32>
    %312 = arith.addf %308, %311 : vector<8x128xf32>
    %313 = math.tanh %312 : vector<8x128xf32>
    %314 = arith.subf %283, %313 : vector<8x128xf32>
    %315 = arith.mulf %307, %314 : vector<8x128xf32>
    %316 = arith.addf %313, %315 : vector<8x128xf32>
    %c8_86 = arith.constant 8 : index
    %c0_87 = arith.constant 0 : index
    %317 = vector.load %arg16[%c8_86, %c0_87] : memref<64x128xf32, #tpu.memory_space<vmem>>, vector<8x128xf32>
    tpu.vector_store %arg16[%c8_86, %c0_87], %316 {strides = array<i32>} : memref<64x128xf32, #tpu.memory_space<vmem>>, vector<8x128xf32>,
    %318 = arith.truncf %98 : vector<8x128xf32> to vector<8x128xbf16>
    %c0_88 = arith.constant 0 : index
    %c0_89 = arith.constant 0 : index
    %319 = vector.load %arg6[%c0_88, %c0_89] : memref<128x384xbf16, #tpu.memory_space<vmem>>, vector<128x384xbf16>
    %cst_90 = arith.constant dense<0.000000e+00> : vector<8x384xf32>
    %320 = tpu.matmul %318, %319, %cst_90 {dimension_numbers = #tpu.dot_dimension_numbers<[1], [0], [0], [1], [0, 0, 1, 1], [], []>} : vector<8x128xbf16>, vector<128x384xbf16>, vector<8x384xf32> -> vector<8x384xf32>
    %321 = arith.addf %320, %250 : vector<8x384xf32>
    %322 = arith.truncf %316 : vector<8x128xf32> to vector<8x128xbf16>
    %c0_91 = arith.constant 0 : index
    %c0_92 = arith.constant 0 : index
    %323 = vector.load %arg7[%c0_91, %c0_92] : memref<128x384xbf16, #tpu.memory_space<vmem>>, vector<128x384xbf16>
    %cst_93 = arith.constant dense<0.000000e+00> : vector<8x384xf32>
    %324 = tpu.matmul %322, %323, %cst_93 {dimension_numbers = #tpu.dot_dimension_numbers<[1], [0], [0], [1], [0, 0, 1, 1], [], []>} : vector<8x128xbf16>, vector<128x384xbf16>, vector<8x384xf32> -> vector<8x384xf32>
    %325 = vector.extract_strided_slice %321 {offsets = [0, 0], sizes = [8, 128], strides = [1, 1]} : vector<8x384xf32> to vector<8x128xf32>
    %326 = vector.extract_strided_slice %324 {offsets = [0, 0], sizes = [8, 128], strides = [1, 1]} : vector<8x384xf32> to vector<8x128xf32>
    %327 = arith.addf %325, %326 : vector<8x128xf32>
    %328 = arith.negf %327 : vector<8x128xf32>
    %329 = math.exp %328 : vector<8x128xf32>
    %cst_94 = arith.constant 1.000000e+00 : f32
    %330 = vector.broadcast %cst_94 : f32 to vector<8x128xf32>
    %331 = arith.addf %330, %329 : vector<8x128xf32>
    %332 = arith.divf %330, %331 : vector<8x128xf32>
    %333 = vector.extract_strided_slice %321 {offsets = [0, 128], sizes = [8, 128], strides = [1, 1]} : vector<8x384xf32> to vector<8x128xf32>
    %334 = vector.extract_strided_slice %324 {offsets = [0, 128], sizes = [8, 128], strides = [1, 1]} : vector<8x384xf32> to vector<8x128xf32>
    %335 = arith.addf %333, %334 : vector<8x128xf32>
    %336 = arith.negf %335 : vector<8x128xf32>
    %337 = math.exp %336 : vector<8x128xf32>
    %cst_95 = arith.constant 1.000000e+00 : f32
    %338 = vector.broadcast %cst_95 : f32 to vector<8x128xf32>
    %339 = arith.addf %338, %337 : vector<8x128xf32>
    %340 = arith.divf %338, %339 : vector<8x128xf32>
    %341 = vector.extract_strided_slice %321 {offsets = [0, 256], sizes = [8, 128], strides = [1, 1]} : vector<8x384xf32> to vector<8x128xf32>
    %342 = vector.extract_strided_slice %324 {offsets = [0, 256], sizes = [8, 128], strides = [1, 1]} : vector<8x384xf32> to vector<8x128xf32>
    %343 = arith.addf %342, %247 : vector<8x128xf32>
    %344 = arith.mulf %332, %343 : vector<8x128xf32>
    %345 = arith.addf %341, %344 : vector<8x128xf32>
    %346 = math.tanh %345 : vector<8x128xf32>
    %347 = arith.subf %316, %346 : vector<8x128xf32>
    %348 = arith.mulf %340, %347 : vector<8x128xf32>
    %349 = arith.addf %346, %348 : vector<8x128xf32>
    %c16_96 = arith.constant 16 : index
    %c0_97 = arith.constant 0 : index
    %350 = vector.load %arg16[%c16_96, %c0_97] : memref<64x128xf32, #tpu.memory_space<vmem>>, vector<8x128xf32>
    tpu.vector_store %arg16[%c16_96, %c0_97], %349 {strides = array<i32>} : memref<64x128xf32, #tpu.memory_space<vmem>>, vector<8x128xf32>,
    %351 = arith.truncf %127 : vector<8x128xf32> to vector<8x128xbf16>
    %c0_98 = arith.constant 0 : index
    %c0_99 = arith.constant 0 : index
    %352 = vector.load %arg6[%c0_98, %c0_99] : memref<128x384xbf16, #tpu.memory_space<vmem>>, vector<128x384xbf16>
    %cst_100 = arith.constant dense<0.000000e+00> : vector<8x384xf32>
    %353 = tpu.matmul %351, %352, %cst_100 {dimension_numbers = #tpu.dot_dimension_numbers<[1], [0], [0], [1], [0, 0, 1, 1], [], []>} : vector<8x128xbf16>, vector<128x384xbf16>, vector<8x384xf32> -> vector<8x384xf32>
    %354 = arith.addf %353, %250 : vector<8x384xf32>
    %355 = arith.truncf %349 : vector<8x128xf32> to vector<8x128xbf16>
    %c0_101 = arith.constant 0 : index
    %c0_102 = arith.constant 0 : index
    %356 = vector.load %arg7[%c0_101, %c0_102] : memref<128x384xbf16, #tpu.memory_space<vmem>>, vector<128x384xbf16>
    %cst_103 = arith.constant dense<0.000000e+00> : vector<8x384xf32>
    %357 = tpu.matmul %355, %356, %cst_103 {dimension_numbers = #tpu.dot_dimension_numbers<[1], [0], [0], [1], [0, 0, 1, 1], [], []>} : vector<8x128xbf16>, vector<128x384xbf16>, vector<8x384xf32> -> vector<8x384xf32>
    %358 = vector.extract_strided_slice %354 {offsets = [0, 0], sizes = [8, 128], strides = [1, 1]} : vector<8x384xf32> to vector<8x128xf32>
    %359 = vector.extract_strided_slice %357 {offsets = [0, 0], sizes = [8, 128], strides = [1, 1]} : vector<8x384xf32> to vector<8x128xf32>
    %360 = arith.addf %358, %359 : vector<8x128xf32>
    %361 = arith.negf %360 : vector<8x128xf32>
    %362 = math.exp %361 : vector<8x128xf32>
    %cst_104 = arith.constant 1.000000e+00 : f32
    %363 = vector.broadcast %cst_104 : f32 to vector<8x128xf32>
    %364 = arith.addf %363, %362 : vector<8x128xf32>
    %365 = arith.divf %363, %364 : vector<8x128xf32>
    %366 = vector.extract_strided_slice %354 {offsets = [0, 128], sizes = [8, 128], strides = [1, 1]} : vector<8x384xf32> to vector<8x128xf32>
    %367 = vector.extract_strided_slice %357 {offsets = [0, 128], sizes = [8, 128], strides = [1, 1]} : vector<8x384xf32> to vector<8x128xf32>
    %368 = arith.addf %366, %367 : vector<8x128xf32>
    %369 = arith.negf %368 : vector<8x128xf32>
    %370 = math.exp %369 : vector<8x128xf32>
    %cst_105 = arith.constant 1.000000e+00 : f32
    %371 = vector.broadcast %cst_105 : f32 to vector<8x128xf32>
    %372 = arith.addf %371, %370 : vector<8x128xf32>
    %373 = arith.divf %371, %372 : vector<8x128xf32>
    %374 = vector.extract_strided_slice %354 {offsets = [0, 256], sizes = [8, 128], strides = [1, 1]} : vector<8x384xf32> to vector<8x128xf32>
    %375 = vector.extract_strided_slice %357 {offsets = [0, 256], sizes = [8, 128], strides = [1, 1]} : vector<8x384xf32> to vector<8x128xf32>
    %376 = arith.addf %375, %247 : vector<8x128xf32>
    %377 = arith.mulf %365, %376 : vector<8x128xf32>
    %378 = arith.addf %374, %377 : vector<8x128xf32>
    %379 = math.tanh %378 : vector<8x128xf32>
    %380 = arith.subf %349, %379 : vector<8x128xf32>
    %381 = arith.mulf %373, %380 : vector<8x128xf32>
    %382 = arith.addf %379, %381 : vector<8x128xf32>
    %c24_106 = arith.constant 24 : index
    %c0_107 = arith.constant 0 : index
    %383 = vector.load %arg16[%c24_106, %c0_107] : memref<64x128xf32, #tpu.memory_space<vmem>>, vector<8x128xf32>
    tpu.vector_store %arg16[%c24_106, %c0_107], %382 {strides = array<i32>} : memref<64x128xf32, #tpu.memory_space<vmem>>, vector<8x128xf32>,
    %384 = arith.truncf %156 : vector<8x128xf32> to vector<8x128xbf16>
    %c0_108 = arith.constant 0 : index
    %c0_109 = arith.constant 0 : index
    %385 = vector.load %arg6[%c0_108, %c0_109] : memref<128x384xbf16, #tpu.memory_space<vmem>>, vector<128x384xbf16>
    %cst_110 = arith.constant dense<0.000000e+00> : vector<8x384xf32>
    %386 = tpu.matmul %384, %385, %cst_110 {dimension_numbers = #tpu.dot_dimension_numbers<[1], [0], [0], [1], [0, 0, 1, 1], [], []>} : vector<8x128xbf16>, vector<128x384xbf16>, vector<8x384xf32> -> vector<8x384xf32>
    %387 = arith.addf %386, %250 : vector<8x384xf32>
    %388 = arith.truncf %382 : vector<8x128xf32> to vector<8x128xbf16>
    %c0_111 = arith.constant 0 : index
    %c0_112 = arith.constant 0 : index
    %389 = vector.load %arg7[%c0_111, %c0_112] : memref<128x384xbf16, #tpu.memory_space<vmem>>, vector<128x384xbf16>
    %cst_113 = arith.constant dense<0.000000e+00> : vector<8x384xf32>
    %390 = tpu.matmul %388, %389, %cst_113 {dimension_numbers = #tpu.dot_dimension_numbers<[1], [0], [0], [1], [0, 0, 1, 1], [], []>} : vector<8x128xbf16>, vector<128x384xbf16>, vector<8x384xf32> -> vector<8x384xf32>
    %391 = vector.extract_strided_slice %387 {offsets = [0, 0], sizes = [8, 128], strides = [1, 1]} : vector<8x384xf32> to vector<8x128xf32>
    %392 = vector.extract_strided_slice %390 {offsets = [0, 0], sizes = [8, 128], strides = [1, 1]} : vector<8x384xf32> to vector<8x128xf32>
    %393 = arith.addf %391, %392 : vector<8x128xf32>
    %394 = arith.negf %393 : vector<8x128xf32>
    %395 = math.exp %394 : vector<8x128xf32>
    %cst_114 = arith.constant 1.000000e+00 : f32
    %396 = vector.broadcast %cst_114 : f32 to vector<8x128xf32>
    %397 = arith.addf %396, %395 : vector<8x128xf32>
    %398 = arith.divf %396, %397 : vector<8x128xf32>
    %399 = vector.extract_strided_slice %387 {offsets = [0, 128], sizes = [8, 128], strides = [1, 1]} : vector<8x384xf32> to vector<8x128xf32>
    %400 = vector.extract_strided_slice %390 {offsets = [0, 128], sizes = [8, 128], strides = [1, 1]} : vector<8x384xf32> to vector<8x128xf32>
    %401 = arith.addf %399, %400 : vector<8x128xf32>
    %402 = arith.negf %401 : vector<8x128xf32>
    %403 = math.exp %402 : vector<8x128xf32>
    %cst_115 = arith.constant 1.000000e+00 : f32
    %404 = vector.broadcast %cst_115 : f32 to vector<8x128xf32>
    %405 = arith.addf %404, %403 : vector<8x128xf32>
    %406 = arith.divf %404, %405 : vector<8x128xf32>
    %407 = vector.extract_strided_slice %387 {offsets = [0, 256], sizes = [8, 128], strides = [1, 1]} : vector<8x384xf32> to vector<8x128xf32>
    %408 = vector.extract_strided_slice %390 {offsets = [0, 256], sizes = [8, 128], strides = [1, 1]} : vector<8x384xf32> to vector<8x128xf32>
    %409 = arith.addf %408, %247 : vector<8x128xf32>
    %410 = arith.mulf %398, %409 : vector<8x128xf32>
    %411 = arith.addf %407, %410 : vector<8x128xf32>
    %412 = math.tanh %411 : vector<8x128xf32>
    %413 = arith.subf %382, %412 : vector<8x128xf32>
    %414 = arith.mulf %406, %413 : vector<8x128xf32>
    %415 = arith.addf %412, %414 : vector<8x128xf32>
    %c32_116 = arith.constant 32 : index
    %c0_117 = arith.constant 0 : index
    %416 = vector.load %arg16[%c32_116, %c0_117] : memref<64x128xf32, #tpu.memory_space<vmem>>, vector<8x128xf32>
    tpu.vector_store %arg16[%c32_116, %c0_117], %415 {strides = array<i32>} : memref<64x128xf32, #tpu.memory_space<vmem>>, vector<8x128xf32>,
    %417 = arith.truncf %185 : vector<8x128xf32> to vector<8x128xbf16>
    %c0_118 = arith.constant 0 : index
    %c0_119 = arith.constant 0 : index
    %418 = vector.load %arg6[%c0_118, %c0_119] : memref<128x384xbf16, #tpu.memory_space<vmem>>, vector<128x384xbf16>
    %cst_120 = arith.constant dense<0.000000e+00> : vector<8x384xf32>
    %419 = tpu.matmul %417, %418, %cst_120 {dimension_numbers = #tpu.dot_dimension_numbers<[1], [0], [0], [1], [0, 0, 1, 1], [], []>} : vector<8x128xbf16>, vector<128x384xbf16>, vector<8x384xf32> -> vector<8x384xf32>
    %420 = arith.addf %419, %250 : vector<8x384xf32>
    %421 = arith.truncf %415 : vector<8x128xf32> to vector<8x128xbf16>
    %c0_121 = arith.constant 0 : index
    %c0_122 = arith.constant 0 : index
    %422 = vector.load %arg7[%c0_121, %c0_122] : memref<128x384xbf16, #tpu.memory_space<vmem>>, vector<128x384xbf16>
    %cst_123 = arith.constant dense<0.000000e+00> : vector<8x384xf32>
    %423 = tpu.matmul %421, %422, %cst_123 {dimension_numbers = #tpu.dot_dimension_numbers<[1], [0], [0], [1], [0, 0, 1, 1], [], []>} : vector<8x128xbf16>, vector<128x384xbf16>, vector<8x384xf32> -> vector<8x384xf32>
    %424 = vector.extract_strided_slice %420 {offsets = [0, 0], sizes = [8, 128], strides = [1, 1]} : vector<8x384xf32> to vector<8x128xf32>
    %425 = vector.extract_strided_slice %423 {offsets = [0, 0], sizes = [8, 128], strides = [1, 1]} : vector<8x384xf32> to vector<8x128xf32>
    %426 = arith.addf %424, %425 : vector<8x128xf32>
    %427 = arith.negf %426 : vector<8x128xf32>
    %428 = math.exp %427 : vector<8x128xf32>
    %cst_124 = arith.constant 1.000000e+00 : f32
    %429 = vector.broadcast %cst_124 : f32 to vector<8x128xf32>
    %430 = arith.addf %429, %428 : vector<8x128xf32>
    %431 = arith.divf %429, %430 : vector<8x128xf32>
    %432 = vector.extract_strided_slice %420 {offsets = [0, 128], sizes = [8, 128], strides = [1, 1]} : vector<8x384xf32> to vector<8x128xf32>
    %433 = vector.extract_strided_slice %423 {offsets = [0, 128], sizes = [8, 128], strides = [1, 1]} : vector<8x384xf32> to vector<8x128xf32>
    %434 = arith.addf %432, %433 : vector<8x128xf32>
    %435 = arith.negf %434 : vector<8x128xf32>
    %436 = math.exp %435 : vector<8x128xf32>
    %cst_125 = arith.constant 1.000000e+00 : f32
    %437 = vector.broadcast %cst_125 : f32 to vector<8x128xf32>
    %438 = arith.addf %437, %436 : vector<8x128xf32>
    %439 = arith.divf %437, %438 : vector<8x128xf32>
    %440 = vector.extract_strided_slice %420 {offsets = [0, 256], sizes = [8, 128], strides = [1, 1]} : vector<8x384xf32> to vector<8x128xf32>
    %441 = vector.extract_strided_slice %423 {offsets = [0, 256], sizes = [8, 128], strides = [1, 1]} : vector<8x384xf32> to vector<8x128xf32>
    %442 = arith.addf %441, %247 : vector<8x128xf32>
    %443 = arith.mulf %431, %442 : vector<8x128xf32>
    %444 = arith.addf %440, %443 : vector<8x128xf32>
    %445 = math.tanh %444 : vector<8x128xf32>
    %446 = arith.subf %415, %445 : vector<8x128xf32>
    %447 = arith.mulf %439, %446 : vector<8x128xf32>
    %448 = arith.addf %445, %447 : vector<8x128xf32>
    %c40_126 = arith.constant 40 : index
    %c0_127 = arith.constant 0 : index
    %449 = vector.load %arg16[%c40_126, %c0_127] : memref<64x128xf32, #tpu.memory_space<vmem>>, vector<8x128xf32>
    tpu.vector_store %arg16[%c40_126, %c0_127], %448 {strides = array<i32>} : memref<64x128xf32, #tpu.memory_space<vmem>>, vector<8x128xf32>,
    %450 = arith.truncf %214 : vector<8x128xf32> to vector<8x128xbf16>
    %c0_128 = arith.constant 0 : index
    %c0_129 = arith.constant 0 : index
    %451 = vector.load %arg6[%c0_128, %c0_129] : memref<128x384xbf16, #tpu.memory_space<vmem>>, vector<128x384xbf16>
    %cst_130 = arith.constant dense<0.000000e+00> : vector<8x384xf32>
    %452 = tpu.matmul %450, %451, %cst_130 {dimension_numbers = #tpu.dot_dimension_numbers<[1], [0], [0], [1], [0, 0, 1, 1], [], []>} : vector<8x128xbf16>, vector<128x384xbf16>, vector<8x384xf32> -> vector<8x384xf32>
    %453 = arith.addf %452, %250 : vector<8x384xf32>
    %454 = arith.truncf %448 : vector<8x128xf32> to vector<8x128xbf16>
    %c0_131 = arith.constant 0 : index
    %c0_132 = arith.constant 0 : index
    %455 = vector.load %arg7[%c0_131, %c0_132] : memref<128x384xbf16, #tpu.memory_space<vmem>>, vector<128x384xbf16>
    %cst_133 = arith.constant dense<0.000000e+00> : vector<8x384xf32>
    %456 = tpu.matmul %454, %455, %cst_133 {dimension_numbers = #tpu.dot_dimension_numbers<[1], [0], [0], [1], [0, 0, 1, 1], [], []>} : vector<8x128xbf16>, vector<128x384xbf16>, vector<8x384xf32> -> vector<8x384xf32>
    %457 = vector.extract_strided_slice %453 {offsets = [0, 0], sizes = [8, 128], strides = [1, 1]} : vector<8x384xf32> to vector<8x128xf32>
    %458 = vector.extract_strided_slice %456 {offsets = [0, 0], sizes = [8, 128], strides = [1, 1]} : vector<8x384xf32> to vector<8x128xf32>
    %459 = arith.addf %457, %458 : vector<8x128xf32>
    %460 = arith.negf %459 : vector<8x128xf32>
    %461 = math.exp %460 : vector<8x128xf32>
    %cst_134 = arith.constant 1.000000e+00 : f32
    %462 = vector.broadcast %cst_134 : f32 to vector<8x128xf32>
    %463 = arith.addf %462, %461 : vector<8x128xf32>
    %464 = arith.divf %462, %463 : vector<8x128xf32>
    %465 = vector.extract_strided_slice %453 {offsets = [0, 128], sizes = [8, 128], strides = [1, 1]} : vector<8x384xf32> to vector<8x128xf32>
    %466 = vector.extract_strided_slice %456 {offsets = [0, 128], sizes = [8, 128], strides = [1, 1]} : vector<8x384xf32> to vector<8x128xf32>
    %467 = arith.addf %465, %466 : vector<8x128xf32>
    %468 = arith.negf %467 : vector<8x128xf32>
    %469 = math.exp %468 : vector<8x128xf32>
    %cst_135 = arith.constant 1.000000e+00 : f32
    %470 = vector.broadcast %cst_135 : f32 to vector<8x128xf32>
    %471 = arith.addf %470, %469 : vector<8x128xf32>
    %472 = arith.divf %470, %471 : vector<8x128xf32>
    %473 = vector.extract_strided_slice %453 {offsets = [0, 256], sizes = [8, 128], strides = [1, 1]} : vector<8x384xf32> to vector<8x128xf32>
    %474 = vector.extract_strided_slice %456 {offsets = [0, 256], sizes = [8, 128], strides = [1, 1]} : vector<8x384xf32> to vector<8x128xf32>
    %475 = arith.addf %474, %247 : vector<8x128xf32>
    %476 = arith.mulf %464, %475 : vector<8x128xf32>
    %477 = arith.addf %473, %476 : vector<8x128xf32>
    %478 = math.tanh %477 : vector<8x128xf32>
    %479 = arith.subf %448, %478 : vector<8x128xf32>
    %480 = arith.mulf %472, %479 : vector<8x128xf32>
    %481 = arith.addf %478, %480 : vector<8x128xf32>
    %c48_136 = arith.constant 48 : index
    %c0_137 = arith.constant 0 : index
    %482 = vector.load %arg16[%c48_136, %c0_137] : memref<64x128xf32, #tpu.memory_space<vmem>>, vector<8x128xf32>
    tpu.vector_store %arg16[%c48_136, %c0_137], %481 {strides = array<i32>} : memref<64x128xf32, #tpu.memory_space<vmem>>, vector<8x128xf32>,
    %483 = arith.truncf %243 : vector<8x128xf32> to vector<8x128xbf16>
    %c0_138 = arith.constant 0 : index
    %c0_139 = arith.constant 0 : index
    %484 = vector.load %arg6[%c0_138, %c0_139] : memref<128x384xbf16, #tpu.memory_space<vmem>>, vector<128x384xbf16>
    %cst_140 = arith.constant dense<0.000000e+00> : vector<8x384xf32>
    %485 = tpu.matmul %483, %484, %cst_140 {dimension_numbers = #tpu.dot_dimension_numbers<[1], [0], [0], [1], [0, 0, 1, 1], [], []>} : vector<8x128xbf16>, vector<128x384xbf16>, vector<8x384xf32> -> vector<8x384xf32>
    %486 = arith.addf %485, %250 : vector<8x384xf32>
    %487 = arith.truncf %481 : vector<8x128xf32> to vector<8x128xbf16>
    %c0_141 = arith.constant 0 : index
    %c0_142 = arith.constant 0 : index
    %488 = vector.load %arg7[%c0_141, %c0_142] : memref<128x384xbf16, #tpu.memory_space<vmem>>, vector<128x384xbf16>
    %cst_143 = arith.constant dense<0.000000e+00> : vector<8x384xf32>
    %489 = tpu.matmul %487, %488, %cst_143 {dimension_numbers = #tpu.dot_dimension_numbers<[1], [0], [0], [1], [0, 0, 1, 1], [], []>} : vector<8x128xbf16>, vector<128x384xbf16>, vector<8x384xf32> -> vector<8x384xf32>
    %490 = vector.extract_strided_slice %486 {offsets = [0, 0], sizes = [8, 128], strides = [1, 1]} : vector<8x384xf32> to vector<8x128xf32>
    %491 = vector.extract_strided_slice %489 {offsets = [0, 0], sizes = [8, 128], strides = [1, 1]} : vector<8x384xf32> to vector<8x128xf32>
    %492 = arith.addf %490, %491 : vector<8x128xf32>
    %493 = arith.negf %492 : vector<8x128xf32>
    %494 = math.exp %493 : vector<8x128xf32>
    %cst_144 = arith.constant 1.000000e+00 : f32
    %495 = vector.broadcast %cst_144 : f32 to vector<8x128xf32>
    %496 = arith.addf %495, %494 : vector<8x128xf32>
    %497 = arith.divf %495, %496 : vector<8x128xf32>
    %498 = vector.extract_strided_slice %486 {offsets = [0, 128], sizes = [8, 128], strides = [1, 1]} : vector<8x384xf32> to vector<8x128xf32>
    %499 = vector.extract_strided_slice %489 {offsets = [0, 128], sizes = [8, 128], strides = [1, 1]} : vector<8x384xf32> to vector<8x128xf32>
    %500 = arith.addf %498, %499 : vector<8x128xf32>
    %501 = arith.negf %500 : vector<8x128xf32>
    %502 = math.exp %501 : vector<8x128xf32>
    %cst_145 = arith.constant 1.000000e+00 : f32
    %503 = vector.broadcast %cst_145 : f32 to vector<8x128xf32>
    %504 = arith.addf %503, %502 : vector<8x128xf32>
    %505 = arith.divf %503, %504 : vector<8x128xf32>
    %506 = vector.extract_strided_slice %486 {offsets = [0, 256], sizes = [8, 128], strides = [1, 1]} : vector<8x384xf32> to vector<8x128xf32>
    %507 = vector.extract_strided_slice %489 {offsets = [0, 256], sizes = [8, 128], strides = [1, 1]} : vector<8x384xf32> to vector<8x128xf32>
    %508 = arith.addf %507, %247 : vector<8x128xf32>
    %509 = arith.mulf %497, %508 : vector<8x128xf32>
    %510 = arith.addf %506, %509 : vector<8x128xf32>
    %511 = math.tanh %510 : vector<8x128xf32>
    %512 = arith.subf %481, %511 : vector<8x128xf32>
    %513 = arith.mulf %505, %512 : vector<8x128xf32>
    %514 = arith.addf %511, %513 : vector<8x128xf32>
    %c56_146 = arith.constant 56 : index
    %c0_147 = arith.constant 0 : index
    %515 = vector.load %arg16[%c56_146, %c0_147] : memref<64x128xf32, #tpu.memory_space<vmem>>, vector<8x128xf32>
    tpu.vector_store %arg16[%c56_146, %c0_147], %514 {strides = array<i32>} : memref<64x128xf32, #tpu.memory_space<vmem>>, vector<8x128xf32>,
    %c8_148 = arith.constant 8 : index
    %c0_149 = arith.constant 0 : index
    %516 = vector.load %arg14[%c8_148, %c0_149] : memref<16x128xf32, #tpu.memory_space<vmem>>, vector<8x128xf32>
    tpu.vector_store %arg14[%c8_148, %c0_149], %514 {strides = array<i32>} : memref<16x128xf32, #tpu.memory_space<vmem>>, vector<8x128xf32>,
    %c0_150 = arith.constant 0 : index
    %c0_151 = arith.constant 0 : index
    %517 = vector.load %arg16[%c0_150, %c0_151] : memref<64x128xf32, #tpu.memory_space<vmem>>, vector<64x128xf32>
    %518 = arith.truncf %517 : vector<64x128xf32> to vector<64x128xbf16>
    %c0_152 = arith.constant 0 : index
    %c0_153 = arith.constant 0 : index
    %519 = vector.load %arg10[%c0_152, %c0_153] : memref<128x128xbf16, #tpu.memory_space<vmem>>, vector<128x128xbf16>
    %cst_154 = arith.constant dense<0.000000e+00> : vector<64x128xf32>
    %520 = tpu.matmul %518, %519, %cst_154 {dimension_numbers = #tpu.dot_dimension_numbers<[1], [0], [0], [1], [0, 0, 1, 1], [], []>} : vector<64x128xbf16>, vector<128x128xbf16>, vector<64x128xf32> -> vector<64x128xf32>
    %c0_155 = arith.constant 0 : index
    %c0_156 = arith.constant 0 : index
    %521 = vector.load %arg11[%c0_155, %c0_156] : memref<1x128xf32, #tpu.memory_space<vmem>>, vector<1x128xf32>
    %522 = vector.shape_cast %521 : vector<1x128xf32> to vector<1x128xf32>
    %523 = vector.broadcast %522 : vector<1x128xf32> to vector<64x128xf32>
    %524 = arith.addf %520, %523 : vector<64x128xf32>
    %c0_157 = arith.constant 0 : index
    %c0_158 = arith.constant 0 : index
    %525 = vector.load %arg12[%c0_157, %c0_158] : memref<64x128xf32, #tpu.memory_space<vmem>>, vector<64x128xf32>
    tpu.vector_store %arg12[%c0_157, %c0_158], %524 {strides = array<i32>} : memref<64x128xf32, #tpu.memory_space<vmem>>, vector<64x128xf32>,
    %cst_159 = arith.constant dense<0xFF800000> : vector<64xf32>
    %526 = vector.multi_reduction <maximumf>, %524, %cst_159 [1] : vector<64x128xf32> to vector<64xf32>
    %527 = vector.shape_cast %526 : vector<64xf32> to vector<64x1xf32>
    %528 = vector.broadcast %527 : vector<64x1xf32> to vector<64x128xf32>
    %529 = arith.subf %524, %528 : vector<64x128xf32>
    %530 = math.exp %529 : vector<64x128xf32>
    %cst_160 = arith.constant dense<0.000000e+00> : vector<64xf32>
    %531 = vector.multi_reduction <add>, %530, %cst_160 [1] : vector<64x128xf32> to vector<64xf32>
    %532 = vector.shape_cast %531 : vector<64xf32> to vector<64x1xf32>
    %533 = tpu.reciprocal %532 : vector<64x1xf32> -> vector<64x1xf32>
    %534 = vector.broadcast %533 : vector<64x1xf32> to vector<64x128xf32>
    %535 = arith.mulf %530, %534 : vector<64x128xf32>
    %c0_161 = arith.constant 0 : index
    %c0_162 = arith.constant 0 : index
    %536 = vector.load %arg13[%c0_161, %c0_162] : memref<64x128xf32, #tpu.memory_space<vmem>>, vector<64x128xf32>
    tpu.vector_store %arg13[%c0_161, %c0_162], %535 {strides = array<i32>} : memref<64x128xf32, #tpu.memory_space<vmem>>, vector<64x128xf32>,
    return
  }
}

</mosaic_0001>

<bundles_post_ra>
// kernel: rnn_softmax_forward.1
= control target key start
LH: loop header
LB: loop body
LE: loop exit
PB: predicated region body
PF: predicated region fallthrough
CT: control target
= control target key end

     0   :  { %v9962_v1 = vmov 0   ;;  %v9964_v48 = vmov 0.0   ;;  %vm7560_vm0 = vmmov 0   ;;  %v95_v56 = vlaneseq  ;;  %s9944_s2 = inlined_call_operand.vmem [shape: bf16[128,384], index: 2, kind: input, shape index: {}]   ;;  %s9945_s3 = inlined_call_operand.vmem [shape: bf16[128,384], index: 3, kind: input, shape index: {}]   ;;  %s9946_s0 = inlined_call_operand.vmem [shape: bf16[64,128], index: 0, kind: input, shape index: {}]   ;;  %s9947_s1 = inlined_call_operand.vmem [shape: f32[16,128], index: 1, kind: input, shape index: {}]   ;;  %s9948_s4 = inlined_call_operand.vmem [shape: f32[1,384], index: 4, kind: input, shape index: {}]   ;;  %s9949_s5 = inlined_call_operand.vmem [shape: f32[1,128], index: 5, kind: input, shape index: {}]   ;;  %s9950_s6 = inlined_call_operand.vmem [shape: bf16[128,384], index: 6, kind: input, shape index: {}]   ;;  %s9951_s7 = inlined_call_operand.vmem [shape: bf16[128,384], index: 7, kind: input, shape index: {}]   ;;  %s9952_s8 = inlined_call_operand.vmem [shape: f32[1,384], index: 8, kind: input, shape index: {}]   ;;  %s9953_s14 = inlined_call_operand.vmem [shape: f32[16,128], index: 14, kind: output, shape index: {2}]   ;;  %s9954_s9 = inlined_call_operand.vmem [shape: f32[1,128], index: 9, kind: input, shape index: {}]   ;;  %s9955_s10 = inlined_call_operand.vmem [shape: bf16[128,128], index: 10, kind: input, shape index: {}]   ;;  %s9956_s11 = inlined_call_operand.vmem [shape: f32[1,128], index: 11, kind: input, shape index: {}]   ;;  %s9957_s12 = inlined_call_operand.vmem [shape: f32[64,128], index: 12, kind: output, shape index: {0}]   ;;  %s9958_s13 = inlined_call_operand.vmem [shape: f32[64,128], index: 13, kind: output, shape index: {1}]  }
   0x1   :  { %v6998_v0 = vld [vmem:[%s9944_s2 + $0xac] ss:$12 sps:$4 sm:$0xff]   ;;  %294 = vmatprep.mubr.bf16.mxu1 %v9962_v1  ;;  %620 = vmatprep.mubr.bf16.mxu0 %v9962_v1  ;;  %v7000_v2 = vld [vmem:[%s9944_s2 + $0xa8] ss:$12 sps:$4 sm:$0xff]   ;;  %v7006_v6 = vld [vmem:[%s9944_s2 + $0x90] ss:$12 sps:$4 sm:$0xff]  }
   0x2   :  { %262 = vmatprep.subr.bf16.mxu1 %v6998_v0  ;;  %v7647_v3 = vld [vmem:[%s9945_s3 + $0xac] ss:$12 sps:$4 sm:$0xff]   ;;  %v7652_v4 = vld [vmem:[%s9945_s3 + $0xa8] ss:$12 sps:$4 sm:$0xff]   ;;  %v7670_v8 = vld [vmem:[%s9945_s3 + $0x90] ss:$12 sps:$4 sm:$0xff]  }
   0x3   :  { %263 = vmatpush1.bf16.msra.mxu1 %v7000_v2  ;;  %v7004_v5 = vld [vmem:[%s9944_s2 + $0x94] ss:$12 sps:$4 sm:$0xff]   ;;  %588 = vmatprep.subr.bf16.mxu0 %v7647_v3  ;;  %v7010_v9 = vld [vmem:[%s9944_s2 + $0x7c] ss:$12 sps:$4 sm:$0xff]   ;;  %v7012_v10 = vld [vmem:[%s9944_s2 + $0x78] ss:$12 sps:$4 sm:$0xff]  }
   0x4   :  { %v7664_v7 = vld [vmem:[%s9945_s3 + $0x94] ss:$12 sps:$4 sm:$0xff]   ;;  %589 = vmatpush1.bf16.msra.mxu0 %v7652_v4  ;;  %264 = vmatprep.subr.bf16.mxu1 %v7004_v5  ;;  %v7682_v11 = vld [vmem:[%s9945_s3 + $0x7c] ss:$12 sps:$4 sm:$0xff]   ;;  %v7016_v12 = vld [vmem:[%s9944_s2 + $0x64] ss:$12 sps:$4 sm:$0xff]  }
   0x5   :  { %590 = vmatprep.subr.bf16.mxu0 %v7664_v7  ;;  %v7691_v13 = vld [vmem:[%s9945_s3 + $0x78] ss:$12 sps:$4 sm:$0xff]   ;;  %v7018_v15 = vld [vmem:[%s9944_s2 + $0x60] ss:$12 sps:$4 sm:$0xff]   ;;  %v7024_v19 = vld [vmem:[%s9944_s2 + $0x48] ss:$12 sps:$4 sm:$0xff]  }
   0x6   :  { %v7697_v14 = vld [vmem:[%s9945_s3 + $0x64] ss:$12 sps:$4 sm:$0xff]   ;;  %v7022_v16 = vld [vmem:[%s9944_s2 + $0x4c] ss:$12 sps:$4 sm:$0xff]   ;;  %v7028_v20 = vld [vmem:[%s9944_s2 + $0x34] ss:$12 sps:$4 sm:$0xff]  }
   0x7   :  { %265 = vmatpush1.bf16.msra.mxu1 %v7006_v6  ;;  %v7709_v17 = vld [vmem:[%s9945_s3 + $0x60] ss:$12 sps:$4 sm:$0xff]   ;;  %v7727_v21 = vld [vmem:[%s9945_s3 + $0x48] ss:$12 sps:$4 sm:$0xff]   ;;  %v7030_v23 = vld [vmem:[%s9944_s2 + $0x30] ss:$12 sps:$4 sm:$0xff]  }
   0x8   :  { %266 = vmatprep.subr.bf16.mxu1 %v7010_v9  ;;  %591 = vmatpush1.bf16.msra.mxu0 %v7670_v8  ;;  %v7715_v18 = vld [vmem:[%s9945_s3 + $0x4c] ss:$12 sps:$4 sm:$0xff]   ;;  %v7733_v22 = vld [vmem:[%s9945_s3 + $0x34] ss:$12 sps:$4 sm:$0xff]   ;;  %v7034_v24 = vld [vmem:[%s9944_s2 + $0x1c] ss:$12 sps:$4 sm:$0xff]  }
   0x9   :  { %592 = vmatprep.subr.bf16.mxu0 %v7682_v11  ;;  %v7745_v25 = vld [vmem:[%s9945_s3 + $0x30] ss:$12 sps:$4 sm:$0xff]   ;;  %v7036_v27 = vld [vmem:[%s9944_s2 + $0x18] ss:$12 sps:$4 sm:$0xff]   ;;  %v7042_v30 = vld [vmem:[%s9944_s2] ss:$12 sps:$4 sm:$0xff]  }
   0xa   :  { %v7751_v26 = vld [vmem:[%s9945_s3 + $0x1c] ss:$12 sps:$4 sm:$0xff]   ;;  %v7759_v28 = vld [vmem:[%s9945_s3 + $0x18] ss:$12 sps:$4 sm:$0xff]   ;;  %v7777_v32 = vld [vmem:[%s9945_s3] ss:$12 sps:$4 sm:$0xff]  }
   0xb   :  { %267 = vmatpush1.bf16.msra.mxu1 %v7012_v10  ;;  %v7040_v29 = vld [vmem:[%s9944_s2 + $0x4] ss:$12 sps:$4 sm:$0xff]   ;;  %v7050_v38 = vld [vmem:[%s9944_s2 + $0x80] ss:$12 sps:$4 sm:$0xff]   ;;  %v7051_v40 = vld [vmem:[%s9944_s2 + $0x68] ss:$12 sps:$4 sm:$0xff]  }
   0xc   :  { %268 = vmatprep.subr.bf16.mxu1 %v7016_v12  ;;  %593 = vmatpush1.bf16.msra.mxu0 %v7691_v13  ;;  %v7772_v31 = vld [vmem:[%s9945_s3 + $0x4] ss:$12 sps:$4 sm:$0xff]   ;;  %v7049_v39 = vld [vmem:[%s9946_s0 + $0x8] sm:$0xff]   ;;  %v7055_v45 = vld [vmem:[%s9946_s0 + $0x18] sm:$0xff]   ;;  %v7927_v57 = vshrl.u32 %v95_v56, 7 }
   0xd   :  { %594 = vmatprep.subr.bf16.mxu0 %v7697_v14  ;;  %v7047_v33 = vld [vmem:[%s9944_s2 + $0xb0] ss:$12 sps:$4 sm:$0xff]   ;;  %v7786_v34 = vld [vmem:[%s9947_s1] sm:$0xff]  ;;  %v7057_v46 = vld [vmem:[%s9944_s2 + $0x8] ss:$12 sps:$4 sm:$0xff]  }
   0xe   :  { %v7046_v35 = vld [vmem:[%s9946_s0] sm:$0xff]   ;;  %v7794_v36 = vpack.c.bf16 %v7786_v34, %v7786_v34  ;;  %v7053_v41 = vld [vmem:[%s9944_s2 + $0x50] ss:$12 sps:$4 sm:$0xff]   ;;  %v7873_v51 = vld [vmem:[%s9945_s3 + $0x68] ss:$12 sps:$4 sm:$0xff]   ;;  %9968 = vst [vmem:[#allocation4_spill] sm:$0xff] %v7927_v57 }
   0xf   :  { %269 = vmatpush1.bf16.msra.mxu1 %v7018_v15  ;;  %v7048_v37 = vld [vmem:[%s9944_s2 + $0x98] ss:$12 sps:$4 sm:$0xff]   ;;  %v7052_v42 = vld [vmem:[%s9946_s0 + $0x10] sm:$0xff]   ;;  %v7056_v44 = vld [vmem:[%s9944_s2 + $0x20] ss:$12 sps:$4 sm:$0xff]   ;;  %v9961_v58 = vsub.s32 0, %v7927_v57 }
  0x10   :  { %270 = vmatprep.subr.bf16.mxu1 %v7022_v16  ;;  %595 = vmatpush1.bf16.msra.mxu0 %v7709_v17  ;;  %v7054_v43 = vld [vmem:[%s9944_s2 + $0x38] ss:$12 sps:$4 sm:$0xff]   ;;  %v7850_v47 = vld [vmem:[%s9945_s3 + $0xb0] ss:$12 sps:$4 sm:$0xff]   ;;  %v7866_v50 = vld [vmem:[%s9945_s3 + $0x80] ss:$12 sps:$4 sm:$0xff]  }
  0x11   :  { %596 = vmatprep.subr.bf16.mxu0 %v7715_v18  ;;  %v7859_v49 = vld [vmem:[%s9945_s3 + $0x98] ss:$12 sps:$4 sm:$0xff]   ;;  %v7882_v52 = vld [vmem:[%s9945_s3 + $0x50] ss:$12 sps:$4 sm:$0xff]   ;;  %v7896_v54 = vld [vmem:[%s9945_s3 + $0x20] ss:$12 sps:$4 sm:$0xff]  }
  0x12   :  { %v7889_v53 = vld [vmem:[%s9945_s3 + $0x38] ss:$12 sps:$4 sm:$0xff]   ;;  %v7903_v55 = vld [vmem:[%s9945_s3 + $0x8] ss:$12 sps:$4 sm:$0xff]   ;;  %v93_v59 = vld [vmem:[%s9948_s4] sm:$0x7] }
  0x13   :  { %271 = vmatpush1.bf16.msra.mxu1 %v7024_v19  ;;  %v98_v63 = vrot.slane %v93_v59, %v9961_v58  ;;  %v9960_v5 = vsub.s32 1, %v7927_v57 }
  0x14   :  { %272 = vmatprep.subr.bf16.mxu1 %v7028_v20  ;;  %597 = vmatpush1.bf16.msra.mxu0 %v7727_v21 }
  0x15   :  { %598 = vmatprep.subr.bf16.mxu0 %v7733_v22  ;;  %v7942_v16 = vrot.slane %v93_v59, %v9960_v5 }
  0x17   :  { %273 = vmatpush1.bf16.msra.mxu1 %v7030_v23 }
  0x18   :  { %274 = vmatprep.subr.bf16.mxu1 %v7034_v24  ;;  %599 = vmatpush1.bf16.msra.mxu0 %v7745_v25 }
  0x19   :  { %600 = vmatprep.subr.bf16.mxu0 %v7751_v26 }
  0x1b   :  { %275 = vmatpush1.bf16.msra.mxu1 %v7036_v27 }
  0x1c   :  { %276 = vmatprep.subr.bf16.mxu1 %v7040_v29  ;;  %601 = vmatpush1.bf16.msra.mxu0 %v7759_v28 }
  0x1d   :  { %602 = vmatprep.subr.bf16.mxu0 %v7772_v31 }
  0x1f   :  { %277 = vmatpush1.bf16.msra.mxu1 %v7042_v30 }
  0x20   :  { %6467 = vmatprep.subr.bf16.mxu1 %v7047_v33  ;;  %603 = vmatpush1.bf16.msra.mxu0 %v7777_v32 }
  0x21   :  { %694 = vmatprep.subr.bf16.mxu0 %v7647_v3 }
  0x22   :  { %295 = vmatmul.mubr.bf16.vlgmr.msra.gmra.mxu1 %v7046_v35 }
  0x23   :  { %6468 = vmatpush3.bf16.msra.mxu1 %v7047_v33  ;;  %304 = vmatprep.mubr.bf16.mxu1 %v9962_v1 }
  0x24   :  { %621 = vmatmul.mubr.bf16.vlgmr.msra.gmra.mxu0 %v7794_v36  ;;  %6469 = vmatprep.subr.bf16.mxu1 %v7048_v37 }
  0x25   :  { %695 = vmatpush1.bf16.msra.mxu0 %v7652_v4  ;;  %726 = vmatprep.mubr.bf16.mxu0 %v9962_v1 }
  0x26   :  { %696 = vmatprep.subr.bf16.mxu0 %v7664_v7 }
  0x27   :  { %6470 = vmatpush3.bf16.msra.mxu1 %v7048_v37 }
  0x28   :  { %6471 = vmatprep.subr.bf16.mxu1 %v7050_v38 }
  0x29   :  { %697 = vmatpush1.bf16.msra.mxu0 %v7670_v8 }
  0x2a   :  { %305 = vmatmul.mubr.bf16.gmra.mxu1 %v7049_v39  ;;  %698 = vmatprep.subr.bf16.mxu0 %v7682_v11 }
  0x2b   :  { %6472 = vmatpush3.bf16.msra.mxu1 %v7050_v38  ;;  %314 = vmatprep.mubr.bf16.mxu1 %v9962_v1 }
  0x2c   :  { %6473 = vmatprep.subr.bf16.mxu1 %v7051_v40 }
  0x2d   :  { %699 = vmatpush1.bf16.msra.mxu0 %v7691_v13 }
  0x2e   :  { %700 = vmatprep.subr.bf16.mxu0 %v7697_v14 }
  0x2f   :  { %6474 = vmatpush3.bf16.msra.mxu1 %v7051_v40 }
  0x30   :  { %6475 = vmatprep.subr.bf16.mxu1 %v7053_v41 }
  0x31   :  { %701 = vmatpush1.bf16.msra.mxu0 %v7709_v17 }
  0x32   :  { %315 = vmatmul.mubr.bf16.gmra.mxu1 %v7052_v42  ;;  %702 = vmatprep.subr.bf16.mxu0 %v7715_v18 }
  0x33   :  { %6476 = vmatpush3.bf16.msra.mxu1 %v7053_v41  ;;  %324 = vmatprep.mubr.bf16.mxu1 %v9962_v1 }
  0x34   :  { %6477 = vmatprep.subr.bf16.mxu1 %v7054_v43 }
  0x35   :  { %703 = vmatpush1.bf16.msra.mxu0 %v7727_v21 }
  0x36   :  { %704 = vmatprep.subr.bf16.mxu0 %v7733_v22 }
  0x37   :  { %6478 = vmatpush3.bf16.msra.mxu1 %v7054_v43 }
  0x38   :  { %6479 = vmatprep.subr.bf16.mxu1 %v7056_v44 }
  0x39   :  { %705 = vmatpush1.bf16.msra.mxu0 %v7745_v25 }
  0x3a   :  { %325 = vmatmul.mubr.bf16.gmra.mxu1 %v7055_v45  ;;  %706 = vmatprep.subr.bf16.mxu0 %v7751_v26 }
  0x3b   :  { %6480 = vmatpush3.bf16.msra.mxu1 %v7056_v44  ;;  %6483 = vmatprep.mubr.bf16.mxu1 %v7046_v35 }
  0x3c   :  { %6481 = vmatprep.subr.bf16.mxu1 %v7057_v46 }
  0x3d   :  { %707 = vmatpush1.bf16.msra.mxu0 %v7759_v28 }
  0x3e   :  { %708 = vmatprep.subr.bf16.mxu0 %v7772_v31 }
  0x3f   :  { %6482 = vmatpush3.bf16.msra.mxu1 %v7057_v46 }
  0x40   :  { %6491 = vmatprep.subr.bf16.mxu1 %v9964_v48 }
  0x41   :  { %709 = vmatpush1.bf16.msra.mxu0 %v7777_v32 }
  0x42   :  { %6484 = vmatmul.mubr.bf16.vlgmr.msra.gmra.mxu1 %v7049_v39  ;;  %800 = vmatprep.subr.bf16.mxu0 %v7647_v3 }
  0x43   :  { %6492 = vmatpush3.bf16.msra.mxu1 %v7850_v47  ;;  %6487 = vmatprep.mubr.bf16.mxu1 %v7052_v42 }
  0x44   :  { %6493 = vmatprep.subr.bf16.mxu1 %v9964_v48 }
  0x47   :  { %6494 = vmatpush3.bf16.msra.mxu1 %v7859_v49 }
  0x48   :  { %6495 = vmatprep.subr.bf16.mxu1 %v9964_v48 }
  0x4a   :  { %6488 = vmatmul.mubr.bf16.gmra.mxu1 %v7055_v45  ;;  %v9959_v45 = vsub.s32 2, %v7927_v57 }
  0x4b   :  { %6496 = vmatpush3.bf16.msra.mxu1 %v7866_v50  ;;  %6507 = vmatprep.mubr.msk.bf16.mxu1 %vm7560_vm0, %v9964_v48 }
  0x4c   :  { %6497 = vmatprep.subr.bf16.mxu1 %v9964_v48 }
  0x4f   :  { %6498 = vmatpush3.bf16.msra.mxu1 %v7873_v51 }
  0x50   :  { %6499 = vmatprep.subr.bf16.mxu1 %v9964_v48 }
  0x53   :  { %6500 = vmatpush3.bf16.msra.mxu1 %v7882_v52 }
  0x54   :  { %6501 = vmatprep.subr.bf16.mxu1 %v9964_v48 }
  0x57   :  { %6502 = vmatpush3.bf16.msra.mxu1 %v7889_v53 }
  0x58   :  { %6503 = vmatprep.subr.bf16.mxu1 %v9964_v48 }
  0x5b   :  { %6504 = vmatpush3.bf16.msra.mxu1 %v7896_v54 }
  0x5c   :  { %6505 = vmatprep.subr.bf16.mxu1 %v9964_v48 }
  0x5f   :  { %6506 = vmatpush3.bf16.msra.mxu1 %v7903_v55 }
  0x60   :  { %6511 = vmatprep.subr.bf16.mxu1 %v9964_v48 }
  0x62   :  { %6508 = vmatmul.mubr.bf16.vlgmr.msra.gmra.mxu1 %v7794_v36 }
  0x63   :  { %6512 = vmatpush3.bf16.msra.mxu1 %v7850_v47  ;;  %6527 = vmatprep.mubr.msk.bf16.mxu1 %vm7560_vm0, %v9964_v48 }
  0x64   :  { %6513 = vmatprep.subr.bf16.mxu1 %v9964_v48 }
  0x67   :  { %6514 = vmatpush3.bf16.msra.mxu1 %v7859_v49 }
  0x68   :  { %6515 = vmatprep.subr.bf16.mxu1 %v9964_v48 }
  0x6b   :  { %6516 = vmatpush3.bf16.msra.mxu1 %v7866_v50 }
  0x6c   :  { %6517 = vmatprep.subr.bf16.mxu1 %v9964_v48 }
  0x6f   :  { %6518 = vmatpush3.bf16.msra.mxu1 %v7873_v51 }
  0x70   :  { %6519 = vmatprep.subr.bf16.mxu1 %v9964_v48 }
  0x73   :  { %6520 = vmatpush3.bf16.msra.mxu1 %v7882_v52 }
  0x74   :  { %6521 = vmatprep.subr.bf16.mxu1 %v9964_v48 }
  0x77   :  { %6522 = vmatpush3.bf16.msra.mxu1 %v7889_v53 }
  0x78   :  { %6523 = vmatprep.subr.bf16.mxu1 %v9964_v48 }
  0x7b   :  { %6524 = vmatpush3.bf16.msra.mxu1 %v7896_v54 }
  0x7c   :  { %6525 = vmatprep.subr.bf16.mxu1 %v9964_v48 }
  0x7f   :  { %6526 = vmatpush3.bf16.msra.mxu1 %v7903_v55 }
  0x80   :  { %6531 = vmatprep.subr.bf16.mxu1 %v9964_v48 }
  0xe2   :  { %v296_v60 = vpop.f32.mrf.mxu1 }
  0xe3   :  { %v297_v38 = vadd.f32 %v296_v60, %v98_v63  ;;  %v106_v60 = vrot.slane %v93_v59, %v9959_v45 }
  0xe4   :  { %v298_v61 = vpop.f32.mrf.mxu1  ;;  %v622_v62 = vpop.f32.mrf.mxu0 }
  0xe5   :  { %v669_v43 = vadd.f32 %v622_v62, %v297_v38 }
  0xe6   :  { %v300_v0 = vpop.f32.mrf.mxu1  ;;  %v624_v2 = vpop.f32.mrf.mxu0 }
  0xe7   :  { %v7936_v6 = vadd.f32 %v300_v0, %v98_v63 }
  0xe8   :  { %v7938_v9 = vpop.f32.mrf.mxu1  ;;  %v626_v10 = vpop.f32.mrf.mxu0 }
  0xe9   :  { %v5801_v10 = vmul.f32 -1.442695, %v669_v43 }
  0xea   :  { %v306_v12 = vpop.f32.mrf.mxu1  ;;  %v627_v15 = vpop.f32.mrf.mxu0 }
  0xeb   :  { %v7944_v19 = vadd.f32 %v306_v12, %v98_v63  ;;  %7346 = vpow2.f32 %v5801_v10 }
  0xec   :  { %v308_v20 = vpop.f32.mrf.mxu1 }
  0xed   :  { %v7947_v23 = vadd.f32 %v308_v20, %v7942_v16 }
  0xee   :  { %v310_v24 = vpop.f32.mrf.mxu1 }
  0xef   :  { %v7949_v27 = vadd.f32 %v310_v24, %v98_v63 }
  0xf0   :  { %v7951_v29 = vpop.f32.mrf.mxu1 }
  0xf2   :  { %v316_v30 = vpop.f32.mrf.mxu1 }
  0xf3   :  { %v7953_v33 = vadd.f32 %v316_v30, %v98_v63 }
  0xf4   :  { %v318_v35 = vpop.f32.mrf.mxu1 }
  0xf5   :  { %v7956_v36 = vadd.f32 %v318_v35, %v7942_v16 }
  0xf6   :  { %v320_v37 = vpop.f32.mrf.mxu1 }
  0xf7   :  { %v7958_v39 = vadd.f32 %v320_v37, %v98_v63 }
  0xf8   :  { %v322_v40 = vpop.f32.mrf.mxu1 }
  0xf9   :  { %v7961_v41 = vadd.f32 %v322_v40, %v7942_v16 }
  0xfa   :  { %v326_v42 = vpop.f32.mrf.mxu1 }
  0xfb   :  { %v7963_v44 = vadd.f32 %v326_v42, %v98_v63 }
  0xfc   :  { %v328_v46 = vpop.f32.mrf.mxu1 }
  0xfd   :  { %v7967_v56 = vadd.f32 %v328_v46, %v7942_v16 }
  0xfe   :  { %v330_v0 = vpop.f32.mrf.mxu1 }
  0xff   :  { %v7969_v12 = vadd.f32 %v330_v0, %v98_v63  ;;  %v299_v63 = vadd.f32 %v298_v61, %v7942_v16  ;;  %v7994_v61 = vld [vmem:[%s9949_s5] ss:$0 sm:$0xff] }
 0x100   :  { %v332_v15 = vpop.f32.mrf.mxu1 }
 0x101   :  { %9969 = vst [vmem:[#allocation5_spill] sm:$0xff] %v7969_v12  ;;  %v7974_v20 = vadd.f32 %v332_v15, %v7942_v16  ;;  %v676_v0 = vadd.f32 %v624_v2, %v299_v63 }
 0x102   :  { %v6485_v62 = vpop.f32.mrf.mxu1 }
 0x103   :  { %9970 = vst [vmem:[#allocation6_spill] sm:$0xff] %v7974_v20  ;;  %v7976_v24 = vadd.f32 %v6485_v62, %v106_v60  ;;  %v7347_v62 = vpop.eup %7346 }
 0x104   :  { %v369_v30 = vpop.f32.mrf.mxu1  ;;  %v673_v58 = vadd.f32 1.0, %v7347_v62 }
 0x106   :  { %v6486_v35 = vpop.f32.mrf.mxu1 }
 0x107   :  { %v7978_v37 = vadd.f32 %v6486_v35, %v106_v60  ;;  %v5802_v35 = vmul.f32 -1.442695, %v676_v0 }
 0x108   :  { %v372_v38 = vpop.f32.mrf.mxu1 }
 0x109   :  { %v7980_v40 = vadd.f32 %v372_v38, %v106_v60  ;;  %7348 = vpow2.f32 %v5802_v35 }
 0x10a   :  { %v6489_v42 = vpop.f32.mrf.mxu1  ;;  %7350 = vrcp.f32 %v673_v58 }
 0x10b   :  { %v7983_v43 = vadd.f32 %v6489_v42, %v106_v60 }
 0x10c   :  { %v385_v59 = vpop.f32.mrf.mxu1 }
 0x10d   :  { %v7985_v46 = vadd.f32 %v385_v59, %v106_v60 }
 0x10e   :  { %v6490_v15 = vpop.f32.mrf.mxu1 }
 0x10f   :  { %v7987_v10 = vadd.f32 %v6490_v15, %v106_v60  ;;  %v370_v15 = vadd.f32 %v369_v30, %v106_v60 }
 0x110   :  { %v388_v45 = vpop.f32.mrf.mxu1 }
 0x111   :  { %9971 = vst [vmem:[#allocation7_spill] sm:$0xff] %v7987_v10  ;;  %v7989_v5 = vadd.f32 %v388_v45, %v106_v60 }
 0x116   :  { %v7349_v42 = vpop.eup %7348 }
 0x117   :  { %v7351_v63 = vpop.eup %7350  ;;  %v680_v45 = vadd.f32 1.0, %v7349_v42 }
 0x122   :  { %v663_v38 = vpop.f32.mrf.mxu1 }
 0x123   :  { %v683_v2 = vadd.f32 %v7994_v61, %v663_v38 }
 0x124   :  { %v6509_v59 = vpop.f32.mrf.mxu1 }
 0x125   :  { %v684_v1 = vmul.f32 %v7351_v63, %v683_v2 }
 0x126   :  { %v666_v48 = vpop.f32.mrf.mxu1 }
 0x127   :  { %v685_v57 = vadd.f32 %v684_v1, %v370_v15  ;;  %v9972_v1 = vmov 0.0  }
 0x128   :  { %v6510_v0 = vpop.f32.mrf.mxu1 }
 0x129   :  { %7352 = vtanh.f32 %v685_v57 }
 0x12a   :  { %7354 = vrcp.f32 %v680_v45  ;;  %v303_v45 = vadd.f32 %v7938_v9, %v7942_v16 }
 0x136   :  { %v7353_v58 = vpop.eup %7352 }
 0x137   :  { %v687_v62 = vsub.f32 %v7786_v34, %v7353_v58  ;;  %v7355_v35 = vpop.eup %7354  ;;  %v9973_v34 = vmov 0  }
 0x139   :  { %v688_v10 = vmul.f32 %v7355_v35, %v687_v62 }
 0x13b   :  { %v7998_v20 = vadd.f32 %v7353_v58, %v688_v10 }
 0x13d   :  { %v8002_v38 = vpack.c.bf16 %v7998_v20, %v7998_v20 }
 0x13f   :  { %727 = vmatmul.mubr.bf16.vlgmr.msra.gmra.mxu0 %v8002_v38  ;;  %6528 = vmatmul.mubr.bf16.vlgmr.msra.gmra.mxu1 %v8002_v38 }
 0x140   :  { %801 = vmatpush1.bf16.msra.mxu0 %v7652_v4  ;;  %6532 = vmatpush3.bf16.msra.mxu1 %v7850_v47 }
 0x141   :  { %802 = vmatprep.subr.bf16.mxu0 %v7664_v7  ;;  %6533 = vmatprep.subr.bf16.mxu1 %v9972_v1 }
 0x142   :  { %832 = vmatprep.mubr.bf16.mxu0 %v9973_v34  ;;  %6547 = vmatprep.mubr.msk.bf16.mxu1 %vm7560_vm0, %v9972_v1 }
 0x144   :  { %803 = vmatpush1.bf16.msra.mxu0 %v7670_v8  ;;  %6534 = vmatpush3.bf16.msra.mxu1 %v7859_v49 }
 0x145   :  { %804 = vmatprep.subr.bf16.mxu0 %v7682_v11  ;;  %6535 = vmatprep.subr.bf16.mxu1 %v9972_v1 }
 0x148   :  { %805 = vmatpush1.bf16.msra.mxu0 %v7691_v13  ;;  %6536 = vmatpush3.bf16.msra.mxu1 %v7866_v50 }
 0x149   :  { %806 = vmatprep.subr.bf16.mxu0 %v7697_v14  ;;  %6537 = vmatprep.subr.bf16.mxu1 %v9972_v1 }
 0x14c   :  { %807 = vmatpush1.bf16.msra.mxu0 %v7709_v17  ;;  %6538 = vmatpush3.bf16.msra.mxu1 %v7873_v51 }
 0x14d   :  { %808 = vmatprep.subr.bf16.mxu0 %v7715_v18  ;;  %6539 = vmatprep.subr.bf16.mxu1 %v9972_v1 }
 0x150   :  { %809 = vmatpush1.bf16.msra.mxu0 %v7727_v21  ;;  %6540 = vmatpush3.bf16.msra.mxu1 %v7882_v52 }
 0x151   :  { %810 = vmatprep.subr.bf16.mxu0 %v7733_v22  ;;  %6541 = vmatprep.subr.bf16.mxu1 %v9972_v1 }
 0x154   :  { %811 = vmatpush1.bf16.msra.mxu0 %v7745_v25  ;;  %6542 = vmatpush3.bf16.msra.mxu1 %v7889_v53 }
 0x155   :  { %812 = vmatprep.subr.bf16.mxu0 %v7751_v26  ;;  %6543 = vmatprep.subr.bf16.mxu1 %v9972_v1 }
 0x158   :  { %813 = vmatpush1.bf16.msra.mxu0 %v7759_v28  ;;  %6544 = vmatpush3.bf16.msra.mxu1 %v7896_v54 }
 0x159   :  { %814 = vmatprep.subr.bf16.mxu0 %v7772_v31  ;;  %6545 = vmatprep.subr.bf16.mxu1 %v9972_v1 }
 0x15c   :  { %815 = vmatpush1.bf16.msra.mxu0 %v7777_v32  ;;  %6546 = vmatpush3.bf16.msra.mxu1 %v7903_v55 }
 0x15d   :  { %906 = vmatprep.subr.bf16.mxu0 %v7647_v3  ;;  %6551 = vmatprep.subr.bf16.mxu1 %v9972_v1 }
 0x1ff   :  { %v728_v48 = vpop.f32.mrf.mxu0  ;;  %v769_v57 = vpop.f32.mrf.mxu1 }
 0x200   :  { %v775_v60 = vadd.f32 %v728_v48, %v7936_v6  ;;  %v789_v6 = vadd.f32 %v7994_v61, %v769_v57 }
 0x201   :  { %v730_v30 = vpop.f32.mrf.mxu0  ;;  %v6529_v10 = vpop.f32.mrf.mxu1 }
 0x202   :  { %v5803_v42 = vmul.f32 -1.442695, %v775_v60  ;;  %v782_v0 = vadd.f32 %v730_v30, %v303_v45 }
 0x203   :  { %v732_v2 = vpop.f32.mrf.mxu0  ;;  %v772_v63 = vpop.f32.mrf.mxu1 }
 0x204   :  { %7356 = vpow2.f32 %v5803_v42  ;;  %v5804_v58 = vmul.f32 -1.442695, %v782_v0 }
 0x205   :  { %v733_v59 = vpop.f32.mrf.mxu0  ;;  %v6530_v15 = vpop.f32.mrf.mxu1 }
 0x206   :  { %7358 = vpow2.f32 %v5804_v58 }
 0x211   :  { %v7357_v62 = vpop.eup %7356 }
 0x212   :  { %v779_v35 = vadd.f32 1.0, %v7357_v62 }
 0x213   :  { %v7359_v12 = vpop.eup %7358 }
 0x214   :  { %7360 = vrcp.f32 %v779_v35  ;;  %v786_v2 = vadd.f32 1.0, %v7359_v12 }
 0x221   :  { %v7361_v48 = vpop.eup %7360 }
 0x222   :  { %v790_v10 = vmul.f32 %v7361_v48, %v789_v6 }
 0x224   :  { %v791_v60 = vadd.f32 %v790_v10, %v7980_v40 }
 0x226   :  { %7362 = vtanh.f32 %v791_v60 }
 0x227   :  { %7364 = vrcp.f32 %v786_v2 }
 0x233   :  { %v7363_v42 = vpop.eup %7362 }
 0x234   :  { %v793_v63 = vsub.f32 %v7998_v20, %v7363_v42  ;;  %v7365_v9 = vpop.eup %7364 }
 0x236   :  { %v794_v30 = vmul.f32 %v7365_v9, %v793_v63 }
 0x238   :  { %v8047_v59 = vadd.f32 %v7363_v42, %v794_v30 }
 0x23a   :  { %v8051_v15 = vpack.c.bf16 %v8047_v59, %v8047_v59 }
 0x23c   :  { %833 = vmatmul.mubr.bf16.vlgmr.msra.gmra.mxu0 %v8051_v15  ;;  %6548 = vmatmul.mubr.bf16.vlgmr.msra.gmra.mxu1 %v8051_v15 }
 0x23d   :  { %907 = vmatpush1.bf16.msra.mxu0 %v7652_v4  ;;  %6552 = vmatpush3.bf16.msra.mxu1 %v7850_v47 }
 0x23e   :  { %908 = vmatprep.subr.bf16.mxu0 %v7664_v7  ;;  %6553 = vmatprep.subr.bf16.mxu1 %v9972_v1 }
 0x23f   :  { %938 = vmatprep.mubr.bf16.mxu0 %v9973_v34  ;;  %6567 = vmatprep.mubr.msk.bf16.mxu1 %vm7560_vm0, %v9972_v1 }
 0x241   :  { %909 = vmatpush1.bf16.msra.mxu0 %v7670_v8  ;;  %6554 = vmatpush3.bf16.msra.mxu1 %v7859_v49 }
 0x242   :  { %910 = vmatprep.subr.bf16.mxu0 %v7682_v11  ;;  %6555 = vmatprep.subr.bf16.mxu1 %v9972_v1 }
 0x245   :  { %911 = vmatpush1.bf16.msra.mxu0 %v7691_v13  ;;  %6556 = vmatpush3.bf16.msra.mxu1 %v7866_v50 }
 0x246   :  { %912 = vmatprep.subr.bf16.mxu0 %v7697_v14  ;;  %6557 = vmatprep.subr.bf16.mxu1 %v9972_v1 }
 0x249   :  { %913 = vmatpush1.bf16.msra.mxu0 %v7709_v17  ;;  %6558 = vmatpush3.bf16.msra.mxu1 %v7873_v51 }
 0x24a   :  { %914 = vmatprep.subr.bf16.mxu0 %v7715_v18  ;;  %6559 = vmatprep.subr.bf16.mxu1 %v9972_v1 }
 0x24d   :  { %915 = vmatpush1.bf16.msra.mxu0 %v7727_v21  ;;  %6560 = vmatpush3.bf16.msra.mxu1 %v7882_v52 }
 0x24e   :  { %916 = vmatprep.subr.bf16.mxu0 %v7733_v22  ;;  %6561 = vmatprep.subr.bf16.mxu1 %v9972_v1 }
 0x251   :  { %917 = vmatpush1.bf16.msra.mxu0 %v7745_v25  ;;  %6562 = vmatpush3.bf16.msra.mxu1 %v7889_v53 }
 0x252   :  { %918 = vmatprep.subr.bf16.mxu0 %v7751_v26  ;;  %6563 = vmatprep.subr.bf16.mxu1 %v9972_v1 }
 0x255   :  { %919 = vmatpush1.bf16.msra.mxu0 %v7759_v28  ;;  %6564 = vmatpush3.bf16.msra.mxu1 %v7896_v54 }
 0x256   :  { %920 = vmatprep.subr.bf16.mxu0 %v7772_v31  ;;  %6565 = vmatprep.subr.bf16.mxu1 %v9972_v1 }
 0x259   :  { %921 = vmatpush1.bf16.msra.mxu0 %v7777_v32  ;;  %6566 = vmatpush3.bf16.msra.mxu1 %v7903_v55 }
 0x25a   :  { %1012 = vmatprep.subr.bf16.mxu0 %v7647_v3  ;;  %6571 = vmatprep.subr.bf16.mxu1 %v9972_v1 }
 0x2fc   :  { %v834_v12 = vpop.f32.mrf.mxu0  ;;  %v875_v20 = vpop.f32.mrf.mxu1 }
 0x2fd   :  { %v881_v40 = vadd.f32 %v834_v12, %v7944_v19  ;;  %v895_v63 = vadd.f32 %v7994_v61, %v875_v20 }
 0x2fe   :  { %v836_v57 = vpop.f32.mrf.mxu0  ;;  %v6549_v45 = vpop.f32.mrf.mxu1 }
 0x2ff   :  { %v5805_v0 = vmul.f32 -1.442695, %v881_v40  ;;  %v888_v48 = vadd.f32 %v836_v57, %v7947_v23 }
 0x300   :  { %v838_v58 = vpop.f32.mrf.mxu0  ;;  %v878_v62 = vpop.f32.mrf.mxu1 }
 0x301   :  { %7366 = vpow2.f32 %v5805_v0  ;;  %v5806_v10 = vmul.f32 -1.442695, %v888_v48 }
 0x302   :  { %v839_v35 = vpop.f32.mrf.mxu0  ;;  %v6550_v6 = vpop.f32.mrf.mxu1 }
 0x303   :  { %7368 = vpow2.f32 %v5806_v10  ;;  %v313_v6 = vadd.f32 %v7951_v29, %v7942_v16 }
 0x30e   :  { %v7367_v60 = vpop.eup %7366 }
 0x30f   :  { %v885_v2 = vadd.f32 1.0, %v7367_v60 }
 0x310   :  { %v7369_v42 = vpop.eup %7368 }
 0x311   :  { %7370 = vrcp.f32 %v885_v2  ;;  %v892_v12 = vadd.f32 1.0, %v7369_v42 }
 0x31e   :  { %v7371_v9 = vpop.eup %7370 }
 0x31f   :  { %v896_v19 = vmul.f32 %v7371_v9, %v895_v63 }
 0x321   :  { %v897_v30 = vadd.f32 %v896_v19, %v7976_v24 }
 0x323   :  { %7372 = vtanh.f32 %v897_v30 }
 0x324   :  { %7374 = vrcp.f32 %v892_v12 }
 0x330   :  { %v7373_v40 = vpop.eup %7372 }
 0x331   :  { %v899_v45 = vsub.f32 %v8047_v59, %v7373_v40  ;;  %v7375_v0 = vpop.eup %7374 }
 0x333   :  { %v900_v23 = vmul.f32 %v7375_v0, %v899_v45  ;;  %v8162_v0 = vld [vmem:[%s9945_s3 + $0x94] ss:$12 sps:$4 sm:$0xff]  }
 0x335   :  { %v8095_v57 = vadd.f32 %v7373_v40, %v900_v23  ;;  %v8172_v23 = vld [vmem:[%s9945_s3 + $0x90] ss:$12 sps:$4 sm:$0xff]  }
 0x337   :  { %v8099_v58 = vpack.c.bf16 %v8095_v57, %v8095_v57 }
 0x339   :  { %939 = vmatmul.mubr.bf16.vlgmr.msra.gmra.mxu0 %v8099_v58  ;;  %6568 = vmatmul.mubr.bf16.vlgmr.msra.gmra.mxu1 %v8099_v58 }
 0x33a   :  { %1013 = vmatpush1.bf16.msra.mxu0 %v7652_v4  ;;  %6572 = vmatpush3.bf16.msra.mxu1 %v7850_v47 }
 0x33b   :  { %1014 = vmatprep.subr.bf16.mxu0 %v7664_v7  ;;  %6573 = vmatprep.subr.bf16.mxu1 %v9972_v1 }
 0x33c   :  { %1044 = vmatprep.mubr.bf16.mxu0 %v9973_v34  ;;  %6587 = vmatprep.mubr.msk.bf16.mxu1 %vm7560_vm0, %v9972_v1 }
 0x33e   :  { %1015 = vmatpush1.bf16.msra.mxu0 %v7670_v8  ;;  %6574 = vmatpush3.bf16.msra.mxu1 %v7859_v49 }
 0x33f   :  { %1016 = vmatprep.subr.bf16.mxu0 %v7682_v11  ;;  %6575 = vmatprep.subr.bf16.mxu1 %v9972_v1 }
 0x342   :  { %1017 = vmatpush1.bf16.msra.mxu0 %v7691_v13  ;;  %6576 = vmatpush3.bf16.msra.mxu1 %v7866_v50 }
 0x343   :  { %1018 = vmatprep.subr.bf16.mxu0 %v7697_v14  ;;  %6577 = vmatprep.subr.bf16.mxu1 %v9972_v1 }
 0x346   :  { %1019 = vmatpush1.bf16.msra.mxu0 %v7709_v17  ;;  %6578 = vmatpush3.bf16.msra.mxu1 %v7873_v51 }
 0x347   :  { %1020 = vmatprep.subr.bf16.mxu0 %v7715_v18  ;;  %6579 = vmatprep.subr.bf16.mxu1 %v9972_v1 }
 0x34a   :  { %1021 = vmatpush1.bf16.msra.mxu0 %v7727_v21  ;;  %6580 = vmatpush3.bf16.msra.mxu1 %v7882_v52 }
 0x34b   :  { %1022 = vmatprep.subr.bf16.mxu0 %v7733_v22  ;;  %6581 = vmatprep.subr.bf16.mxu1 %v9972_v1 }
 0x34e   :  { %1023 = vmatpush1.bf16.msra.mxu0 %v7745_v25  ;;  %6582 = vmatpush3.bf16.msra.mxu1 %v7889_v53 }
 0x34f   :  { %1024 = vmatprep.subr.bf16.mxu0 %v7751_v26  ;;  %6583 = vmatprep.subr.bf16.mxu1 %v9972_v1 }
 0x352   :  { %1025 = vmatpush1.bf16.msra.mxu0 %v7759_v28  ;;  %6584 = vmatpush3.bf16.msra.mxu1 %v7896_v54 }
 0x353   :  { %1026 = vmatprep.subr.bf16.mxu0 %v7772_v31  ;;  %6585 = vmatprep.subr.bf16.mxu1 %v9972_v1 }
 0x356   :  { %1027 = vmatpush1.bf16.msra.mxu0 %v7777_v32  ;;  %6586 = vmatpush3.bf16.msra.mxu1 %v7903_v55 }
 0x357   :  { %1118 = vmatprep.subr.bf16.mxu0 %v7647_v3  ;;  %6591 = vmatprep.subr.bf16.mxu1 %v9972_v1 }
 0x3f9   :  { %v940_v4 = vpop.f32.mrf.mxu0  ;;  %v981_v7 = vpop.f32.mrf.mxu1 }
 0x3fa   :  { %v987_v8 = vadd.f32 %v940_v4, %v7949_v27  ;;  %v1001_v27 = vadd.f32 %v7994_v61, %v981_v7  ;;  %v8186_v4 = vld [vmem:[%s9945_s3 + $0x78] ss:$12 sps:$4 sm:$0xff]  }
 0x3fb   :  { %v942_v11 = vpop.f32.mrf.mxu0  ;;  %v6569_v13 = vpop.f32.mrf.mxu1 }
 0x3fc   :  { %v5807_v24 = vmul.f32 -1.442695, %v987_v8  ;;  %v994_v48 = vadd.f32 %v942_v11, %v313_v6 }
 0x3fd   :  { %v944_v59 = vpop.f32.mrf.mxu0  ;;  %v984_v20 = vpop.f32.mrf.mxu1 }
 0x3fe   :  { %7376 = vpow2.f32 %v5807_v24  ;;  %v5808_v10 = vmul.f32 -1.442695, %v994_v48 }
 0x3ff   :  { %v945_v62 = vpop.f32.mrf.mxu0  ;;  %v6570_v35 = vpop.f32.mrf.mxu1 }
 0x400   :  { %7378 = vpow2.f32 %v5808_v10 }
 0x40b   :  { %v7377_v3 = vpop.eup %7376 }
 0x40c   :  { %v991_v60 = vadd.f32 1.0, %v7377_v3 }
 0x40d   :  { %v7379_v2 = vpop.eup %7378 }
 0x40e   :  { %7380 = vrcp.f32 %v991_v60  ;;  %v998_v19 = vadd.f32 1.0, %v7379_v2 }
 0x41b   :  { %v7381_v42 = vpop.eup %7380 }
 0x41c   :  { %v1002_v63 = vmul.f32 %v7381_v42, %v1001_v27  ;;  %v8253_v27 = vld [vmem:[%s9945_s3 + $0x60] ss:$12 sps:$4 sm:$0xff]  }
 0x41d   :  { %v8260_v42 = vld [vmem:[%s9945_s3 + $0x4c] ss:$12 sps:$4 sm:$0xff]  }
 0x41e   :  { %v1003_v9 = vadd.f32 %v1002_v63, %v7978_v37  ;;  %v8155_v37 = vld [vmem:[%s9945_s3 + $0xa8] ss:$12 sps:$4 sm:$0xff]  }
 0x41f   :  { %v8267_v63 = vld [vmem:[%s9945_s3 + $0x48] ss:$12 sps:$4 sm:$0xff]  }
 0x420   :  { %7382 = vtanh.f32 %v1003_v9  ;;  %v8274_v9 = vld [vmem:[%s9945_s3 + $0x34] ss:$12 sps:$4 sm:$0xff]  }
 0x421   :  { %7384 = vrcp.f32 %v998_v19  ;;  %v8281_v19 = vld [vmem:[%s9945_s3 + $0x30] ss:$12 sps:$4 sm:$0xff]  }
 0x42d   :  { %v7383_v30 = vpop.eup %7382 }
 0x42e   :  { %v1005_v12 = vsub.f32 %v8095_v57, %v7383_v30  ;;  %v7385_v16 = vpop.eup %7384  ;;  %v8179_v57 = vld [vmem:[%s9945_s3 + $0x7c] ss:$12 sps:$4 sm:$0xff]  }
 0x430   :  { %v1006_v29 = vmul.f32 %v7385_v16, %v1005_v12  ;;  %v8295_v12 = vld [vmem:[%s9945_s3 + $0x18] ss:$12 sps:$4 sm:$0xff]  }
 0x431   :  { %v8302_v16 = vld [vmem:[%s9945_s3 + $0x4] ss:$12 sps:$4 sm:$0xff]  }
 0x432   :  { %v8144_v40 = vadd.f32 %v7383_v30, %v1006_v29  ;;  %v8288_v30 = vld [vmem:[%s9945_s3 + $0x1c] ss:$12 sps:$4 sm:$0xff]   ;;  %v8309_v29 = vld [vmem:[%s9945_s3] ss:$12 sps:$4 sm:$0xff]  }
 0x434   :  { %v8148_v45 = vpack.c.bf16 %v8144_v40, %v8144_v40 }
 0x436   :  { %1045 = vmatmul.mubr.bf16.vlgmr.msra.gmra.mxu0 %v8148_v45  ;;  %6588 = vmatmul.mubr.bf16.vlgmr.msra.gmra.mxu1 %v8148_v45 }
 0x437   :  { %1119 = vmatpush1.bf16.msra.mxu0 %v8155_v37  ;;  %6592 = vmatpush3.bf16.msra.mxu1 %v7850_v47 }
 0x438   :  { %1120 = vmatprep.subr.bf16.mxu0 %v8162_v0  ;;  %6593 = vmatprep.subr.bf16.mxu1 %v9972_v1 }
 0x439   :  { %1150 = vmatprep.mubr.bf16.mxu0 %v9973_v34  ;;  %6607 = vmatprep.mubr.msk.bf16.mxu1 %vm7560_vm0, %v9972_v1 }
 0x43b   :  { %1121 = vmatpush1.bf16.msra.mxu0 %v8172_v23  ;;  %6594 = vmatpush3.bf16.msra.mxu1 %v7859_v49 }
 0x43c   :  { %1122 = vmatprep.subr.bf16.mxu0 %v8179_v57  ;;  %6595 = vmatprep.subr.bf16.mxu1 %v9972_v1 }
 0x43f   :  { %1123 = vmatpush1.bf16.msra.mxu0 %v8186_v4  ;;  %6596 = vmatpush3.bf16.msra.mxu1 %v7866_v50 }
 0x440   :  { %1124 = vmatprep.subr.bf16.mxu0 %v7697_v14  ;;  %6597 = vmatprep.subr.bf16.mxu1 %v9972_v1  ;;  %v8213_v14 = vld [vmem:[%s9945_s3 + $0xac] ss:$12 sps:$4 sm:$0xff]  }
 0x443   :  { %1125 = vmatpush1.bf16.msra.mxu0 %v7709_v17  ;;  %6598 = vmatpush3.bf16.msra.mxu1 %v7873_v51 }
 0x444   :  { %1126 = vmatprep.subr.bf16.mxu0 %v7715_v18  ;;  %6599 = vmatprep.subr.bf16.mxu1 %v9972_v1 }
 0x447   :  { %1127 = vmatpush1.bf16.msra.mxu0 %v7727_v21  ;;  %6600 = vmatpush3.bf16.msra.mxu1 %v7882_v52 }
 0x448   :  { %1128 = vmatprep.subr.bf16.mxu0 %v7733_v22  ;;  %6601 = vmatprep.subr.bf16.mxu1 %v9972_v1 }
 0x44b   :  { %1129 = vmatpush1.bf16.msra.mxu0 %v7745_v25  ;;  %6602 = vmatpush3.bf16.msra.mxu1 %v7889_v53 }
 0x44c   :  { %1130 = vmatprep.subr.bf16.mxu0 %v7751_v26  ;;  %6603 = vmatprep.subr.bf16.mxu1 %v9972_v1 }
 0x44f   :  { %1131 = vmatpush1.bf16.msra.mxu0 %v7759_v28  ;;  %6604 = vmatpush3.bf16.msra.mxu1 %v7896_v54 }
 0x450   :  { %1132 = vmatprep.subr.bf16.mxu0 %v7772_v31  ;;  %6605 = vmatprep.subr.bf16.mxu1 %v9972_v1 }
 0x453   :  { %1133 = vmatpush1.bf16.msra.mxu0 %v7777_v32  ;;  %6606 = vmatpush3.bf16.msra.mxu1 %v7903_v55 }
 0x454   :  { %1224 = vmatprep.subr.bf16.mxu0 %v8213_v14  ;;  %6611 = vmatprep.subr.bf16.mxu1 %v9972_v1 }
 0x4f6   :  { %v1046_v17 = vpop.f32.mrf.mxu0  ;;  %v1087_v18 = vpop.f32.mrf.mxu1 }
 0x4f7   :  { %v1093_v21 = vadd.f32 %v1046_v17, %v7953_v33  ;;  %v1107_v20 = vadd.f32 %v7994_v61, %v1087_v18 }
 0x4f8   :  { %v1048_v22 = vpop.f32.mrf.mxu0  ;;  %v6589_v25 = vpop.f32.mrf.mxu1 }
 0x4f9   :  { %v5809_v26 = vmul.f32 -1.442695, %v1093_v21  ;;  %v1100_v8 = vadd.f32 %v1048_v22, %v7956_v36 }
 0x4fa   :  { %v1050_v28 = vpop.f32.mrf.mxu0  ;;  %v1090_v31 = vpop.f32.mrf.mxu1 }
 0x4fb   :  { %7386 = vpow2.f32 %v5809_v26  ;;  %v5810_v11 = vmul.f32 -1.442695, %v1100_v8 }
 0x4fc   :  { %v1051_v32 = vpop.f32.mrf.mxu0  ;;  %v6590_v7 = vpop.f32.mrf.mxu1 }
 0x4fd   :  { %7388 = vpow2.f32 %v5810_v11 }
 0x508   :  { %v7387_v13 = vpop.eup %7386 }
 0x509   :  { %v1097_v24 = vadd.f32 1.0, %v7387_v13 }
 0x50a   :  { %v7389_v59 = vpop.eup %7388 }
 0x50b   :  { %7390 = vrcp.f32 %v1097_v24  ;;  %v1104_v6 = vadd.f32 1.0, %v7389_v59 }
 0x518   :  { %v7391_v62 = vpop.eup %7390 }
 0x519   :  { %v1108_v33 = vmul.f32 %v7391_v62, %v1107_v20 }
 0x51b   :  { %v1109_v35 = vadd.f32 %v1108_v33, %v7985_v46  ;;  %v8246_v46 = vld [vmem:[%s9945_s3 + $0x64] ss:$12 sps:$4 sm:$0xff]  }
 0x51d   :  { %7392 = vtanh.f32 %v1109_v35 }
 0x51e   :  { %7394 = vrcp.f32 %v1104_v6 }
 0x52a   :  { %v7393_v48 = vpop.eup %7392 }
 0x52b   :  { %v1111_v10 = vsub.f32 %v8144_v40, %v7393_v48  ;;  %v7395_v3 = vpop.eup %7394 }
 0x52d   :  { %v1112_v36 = vmul.f32 %v7395_v3, %v1111_v10 }
 0x52f   :  { %v8222_v60 = vadd.f32 %v7393_v48, %v1112_v36 }
 0x531   :  { %v8226_v2 = vpack.c.bf16 %v8222_v60, %v8222_v60 }
 0x533   :  { %1151 = vmatmul.mubr.bf16.vlgmr.msra.gmra.mxu0 %v8226_v2  ;;  %6608 = vmatmul.mubr.bf16.vlgmr.msra.gmra.mxu1 %v8226_v2 }
 0x534   :  { %1225 = vmatpush1.bf16.msra.mxu0 %v8155_v37  ;;  %6612 = vmatpush3.bf16.msra.mxu1 %v7850_v47 }
 0x535   :  { %1226 = vmatprep.subr.bf16.mxu0 %v8162_v0  ;;  %6613 = vmatprep.subr.bf16.mxu1 %v9972_v1 }
 0x536   :  { %1256 = vmatprep.mubr.bf16.mxu0 %v9973_v34  ;;  %6627 = vmatprep.mubr.msk.bf16.mxu1 %vm7560_vm0, %v9972_v1 }
 0x538   :  { %1227 = vmatpush1.bf16.msra.mxu0 %v8172_v23  ;;  %6614 = vmatpush3.bf16.msra.mxu1 %v7859_v49 }
 0x539   :  { %1228 = vmatprep.subr.bf16.mxu0 %v8179_v57  ;;  %6615 = vmatprep.subr.bf16.mxu1 %v9972_v1 }
 0x53c   :  { %1229 = vmatpush1.bf16.msra.mxu0 %v8186_v4  ;;  %6616 = vmatpush3.bf16.msra.mxu1 %v7866_v50 }
 0x53d   :  { %1230 = vmatprep.subr.bf16.mxu0 %v8246_v46  ;;  %6617 = vmatprep.subr.bf16.mxu1 %v9972_v1 }
 0x540   :  { %1231 = vmatpush1.bf16.msra.mxu0 %v8253_v27  ;;  %6618 = vmatpush3.bf16.msra.mxu1 %v7873_v51 }
 0x541   :  { %1232 = vmatprep.subr.bf16.mxu0 %v8260_v42  ;;  %6619 = vmatprep.subr.bf16.mxu1 %v9972_v1 }
 0x544   :  { %1233 = vmatpush1.bf16.msra.mxu0 %v8267_v63  ;;  %6620 = vmatpush3.bf16.msra.mxu1 %v7882_v52 }
 0x545   :  { %1234 = vmatprep.subr.bf16.mxu0 %v8274_v9  ;;  %6621 = vmatprep.subr.bf16.mxu1 %v9972_v1 }
 0x548   :  { %1235 = vmatpush1.bf16.msra.mxu0 %v8281_v19  ;;  %6622 = vmatpush3.bf16.msra.mxu1 %v7889_v53 }
 0x549   :  { %1236 = vmatprep.subr.bf16.mxu0 %v8288_v30  ;;  %6623 = vmatprep.subr.bf16.mxu1 %v9972_v1 }
 0x54c   :  { %1237 = vmatpush1.bf16.msra.mxu0 %v8295_v12  ;;  %6624 = vmatpush3.bf16.msra.mxu1 %v7896_v54 }
 0x54d   :  { %1238 = vmatprep.subr.bf16.mxu0 %v8302_v16  ;;  %6625 = vmatprep.subr.bf16.mxu1 %v9972_v1 }
 0x550   :  { %1239 = vmatpush1.bf16.msra.mxu0 %v8309_v29  ;;  %6626 = vmatpush3.bf16.msra.mxu1 %v7903_v55 }
 0x551   :  { %1330 = vmatprep.subr.bf16.mxu0 %v8213_v14  ;;  %6631 = vmatprep.subr.bf16.mxu1 %v9972_v1 }
 0x5f3   :  { %v1152_v40 = vpop.f32.mrf.mxu0  ;;  %v1193_v17 = vpop.f32.mrf.mxu1 }
 0x5f4   :  { %v1199_v18 = vadd.f32 %v1152_v40, %v7958_v39  ;;  %v1213_v24 = vadd.f32 %v7994_v61, %v1193_v17  ;;  %v8403_v40 = vld [vmem:[%s9950_s6 + $0x90] ss:$12 sps:$4 sm:$0xff]   ;;  %v7073_v17 = vld [vmem:[%s9950_s6 + $0x98] ss:$12 sps:$4 sm:$0xff]  }
 0x5f5   :  { %v1154_v21 = vpop.f32.mrf.mxu0  ;;  %v6609_v22 = vpop.f32.mrf.mxu1 }
 0x5f6   :  { %v5811_v25 = vmul.f32 -1.442695, %v1199_v18  ;;  %v1206_v7 = vadd.f32 %v1154_v21, %v7961_v41  ;;  %v8413_v18 = vld [vmem:[%s9950_s6 + $0x7c] ss:$12 sps:$4 sm:$0xff]   ;;  %v8422_v21 = vld [vmem:[%s9950_s6 + $0x78] ss:$12 sps:$4 sm:$0xff]  }
 0x5f7   :  { %v1156_v26 = vpop.f32.mrf.mxu0  ;;  %v1196_v28 = vpop.f32.mrf.mxu1  ;;  %v7077_v22 = vld [vmem:[%s9950_s6 + $0x80] ss:$12 sps:$4 sm:$0xff]  }
 0x5f8   :  { %7396 = vpow2.f32 %v5811_v25  ;;  %v5812_v8 = vmul.f32 -1.442695, %v1206_v7  ;;  %v8432_v25 = vld [vmem:[%s9950_s6 + $0x64] ss:$12 sps:$4 sm:$0xff]   ;;  %v8438_v26 = vld [vmem:[%s9950_s6 + $0x60] ss:$12 sps:$4 sm:$0xff]  }
 0x5f9   :  { %v1157_v31 = vpop.f32.mrf.mxu0  ;;  %v6610_v32 = vpop.f32.mrf.mxu1  ;;  %v7081_v28 = vld [vmem:[%s9950_s6 + $0x68] ss:$12 sps:$4 sm:$0xff]   ;;  %v7085_v7 = vld [vmem:[%s9950_s6 + $0x50] ss:$12 sps:$4 sm:$0xff]  }
 0x5fa   :  { %7398 = vpow2.f32 %v5812_v8  ;;  %v8448_v31 = vld [vmem:[%s9950_s6 + $0x4c] ss:$12 sps:$4 sm:$0xff]   ;;  %v8454_v32 = vld [vmem:[%s9950_s6 + $0x48] ss:$12 sps:$4 sm:$0xff]  }
 0x5fb   :  { %v8464_v8 = vld [vmem:[%s9950_s6 + $0x34] ss:$12 sps:$4 sm:$0xff]  }
 0x605   :  { %v7397_v11 = vpop.eup %7396 }
 0x606   :  { %v1203_v13 = vadd.f32 1.0, %v7397_v11  ;;  %v8470_v11 = vld [vmem:[%s9950_s6 + $0x30] ss:$12 sps:$4 sm:$0xff]  }
 0x607   :  { %v7399_v14 = vpop.eup %7398 }
 0x608   :  { %7400 = vrcp.f32 %v1203_v13  ;;  %v1210_v62 = vadd.f32 1.0, %v7399_v14  ;;  %v7089_v13 = vld [vmem:[%s9950_s6 + $0x38] ss:$12 sps:$4 sm:$0xff]   ;;  %v8480_v14 = vld [vmem:[%s9950_s6 + $0x1c] ss:$12 sps:$4 sm:$0xff]  }
 0x615   :  { %v7401_v59 = vpop.eup %7400 }
 0x616   :  { %v1214_v39 = vmul.f32 %v7401_v59, %v1213_v24  ;;  %v8486_v24 = vld [vmem:[%s9950_s6 + $0x18] ss:$12 sps:$4 sm:$0xff]   ;;  %v7093_v59 = vld [vmem:[%s9950_s6 + $0x20] ss:$12 sps:$4 sm:$0xff]  }
 0x618   :  { %v1215_v20 = vadd.f32 %v1214_v39, %v7989_v5  ;;  %v8496_v39 = vld [vmem:[%s9950_s6 + $0x4] ss:$12 sps:$4 sm:$0xff]  }
 0x61a   :  { %7402 = vtanh.f32 %v1215_v20  ;;  %v8502_v20 = vld [vmem:[%s9950_s6] ss:$12 sps:$4 sm:$0xff]  }
 0x61b   :  { %7404 = vrcp.f32 %v1210_v62  ;;  %v7097_v62 = vld [vmem:[%s9950_s6 + $0x8] ss:$12 sps:$4 sm:$0xff]  }
 0x627   :  { %v7403_v33 = vpop.eup %7402 }
 0x628   :  { %v1217_v35 = vsub.f32 %v8222_v60, %v7403_v33  ;;  %v7405_v6 = vpop.eup %7404 }
 0x62a   :  { %v1218_v41 = vmul.f32 %v7405_v6, %v1217_v35  ;;  %v8518_v35 = vld [vmem:[%s9951_s7 + $0xa8] ss:$12 sps:$4 sm:$0xff]   ;;  %v7101_v6 = vld [vmem:[%s9951_s7 + $0xb0] ss:$12 sps:$4 sm:$0xff]  }
 0x62c   :  { %v8320_v48 = vadd.f32 %v7403_v33, %v1218_v41  ;;  %v8512_v33 = vld [vmem:[%s9951_s7 + $0xac] ss:$12 sps:$4 sm:$0xff]   ;;  %v8528_v41 = vld [vmem:[%s9951_s7 + $0x94] ss:$12 sps:$4 sm:$0xff]  }
 0x62e   :  { %v8324_v10 = vpack.c.bf16 %v8320_v48, %v8320_v48 }
 0x630   :  { %1257 = vmatmul.mubr.bf16.vlgmr.msra.gmra.mxu0 %v8324_v10  ;;  %6628 = vmatmul.mubr.bf16.vlgmr.msra.gmra.mxu1 %v8324_v10 }
 0x631   :  { %1331 = vmatpush1.bf16.msra.mxu0 %v8155_v37  ;;  %6632 = vmatpush3.bf16.msra.mxu1 %v7850_v47  ;;  %v8365_v47 = vld [vmem:[%s9950_s6 + $0xac] ss:$12 sps:$4 sm:$0xff]  }
 0x632   :  { %1332 = vmatprep.subr.bf16.mxu0 %v8162_v0  ;;  %6633 = vmatprep.subr.bf16.mxu1 %v9972_v1 }
 0x633   :  { %1362 = vmatprep.mubr.bf16.mxu0 %v9973_v34  ;;  %6647 = vmatprep.mubr.msk.bf16.mxu1 %vm7560_vm0, %v9972_v1 }
 0x635   :  { %1333 = vmatpush1.bf16.msra.mxu0 %v8172_v23  ;;  %6634 = vmatpush3.bf16.msra.mxu1 %v7859_v49 }
 0x636   :  { %1334 = vmatprep.subr.bf16.mxu0 %v8179_v57  ;;  %6635 = vmatprep.subr.bf16.mxu1 %v9972_v1 }
 0x639   :  { %1335 = vmatpush1.bf16.msra.mxu0 %v8186_v4  ;;  %6636 = vmatpush3.bf16.msra.mxu1 %v7866_v50 }
 0x63a   :  { %1336 = vmatprep.subr.bf16.mxu0 %v8246_v46  ;;  %6637 = vmatprep.subr.bf16.mxu1 %v9972_v1 }
 0x63d   :  { %1337 = vmatpush1.bf16.msra.mxu0 %v8253_v27  ;;  %6638 = vmatpush3.bf16.msra.mxu1 %v7873_v51 }
 0x63e   :  { %1338 = vmatprep.subr.bf16.mxu0 %v8260_v42  ;;  %6639 = vmatprep.subr.bf16.mxu1 %v9972_v1 }
 0x641   :  { %1339 = vmatpush1.bf16.msra.mxu0 %v8267_v63  ;;  %6640 = vmatpush3.bf16.msra.mxu1 %v7882_v52 }
 0x642   :  { %1340 = vmatprep.subr.bf16.mxu0 %v8274_v9  ;;  %6641 = vmatprep.subr.bf16.mxu1 %v9972_v1 }
 0x645   :  { %1341 = vmatpush1.bf16.msra.mxu0 %v8281_v19  ;;  %6642 = vmatpush3.bf16.msra.mxu1 %v7889_v53 }
 0x646   :  { %1342 = vmatprep.subr.bf16.mxu0 %v8288_v30  ;;  %6643 = vmatprep.subr.bf16.mxu1 %v9972_v1 }
 0x649   :  { %1343 = vmatpush1.bf16.msra.mxu0 %v8295_v12  ;;  %6644 = vmatpush3.bf16.msra.mxu1 %v7896_v54  ;;  %v8383_v12 = vld [vmem:[%s9950_s6 + $0xa8] ss:$12 sps:$4 sm:$0xff]  }
 0x64a   :  { %1344 = vmatprep.subr.bf16.mxu0 %v8302_v16  ;;  %6645 = vmatprep.subr.bf16.mxu1 %v9972_v1  ;;  %v7069_v16 = vld [vmem:[%s9950_s6 + $0xb0] ss:$12 sps:$4 sm:$0xff]  }
 0x64d   :  { %1345 = vmatpush1.bf16.msra.mxu0 %v8309_v29  ;;  %6646 = vmatpush3.bf16.msra.mxu1 %v7903_v55  ;;  %v8395_v29 = vld [vmem:[%s9950_s6 + $0x94] ss:$12 sps:$4 sm:$0xff]  }
 0x64e   :  { %6651 = vmatprep.subr.bf16.mxu1 %v9972_v1  ;;  %1618 = vmatprep.subr.bf16.mxu0 %v8365_v47 }
 0x6f0   :  { %v1258_v49 = vpop.f32.mrf.mxu0  ;;  %v1299_v50 = vpop.f32.mrf.mxu1 }
 0x6f1   :  { %v1305_v51 = vadd.f32 %v1258_v49, %v7963_v44  ;;  %v8373_v44 = vld [vmem:[%s9949_s5] ss:$0 sm:$0xff]  ;;  %v7105_v49 = vld [vmem:[%s9951_s7 + $0x98] ss:$12 sps:$4 sm:$0xff]  }
 0x6f2   :  { %v1260_v52 = vpop.f32.mrf.mxu0  ;;  %v6629_v53 = vpop.f32.mrf.mxu1  ;;  %v1319_v36 = vadd.f32 %v8373_v44, %v1299_v50  ;;  %v8555_v50 = vld [vmem:[%s9951_s7 + $0x78] ss:$12 sps:$4 sm:$0xff]  }
 0x6f3   :  { %v5813_v54 = vmul.f32 -1.442695, %v1305_v51  ;;  %v1312_v0 = vadd.f32 %v1260_v52, %v7967_v56  ;;  %v7109_v51 = vld [vmem:[%s9951_s7 + $0x80] ss:$12 sps:$4 sm:$0xff]   ;;  %v8565_v52 = vld [vmem:[%s9951_s7 + $0x64] ss:$12 sps:$4 sm:$0xff]  }
 0x6f4   :  { %v1262_v5 = vpop.f32.mrf.mxu0  ;;  %v1302_v61 = vpop.f32.mrf.mxu1  ;;  %v8571_v53 = vld [vmem:[%s9951_s7 + $0x60] ss:$12 sps:$4 sm:$0xff]  }
 0x6f5   :  { %7406 = vpow2.f32 %v5813_v54  ;;  %v5814_v23 = vmul.f32 -1.442695, %v1312_v0  ;;  %v7113_v54 = vld [vmem:[%s9951_s7 + $0x68] ss:$12 sps:$4 sm:$0xff]   ;;  %v8581_v5 = vld [vmem:[%s9951_s7 + $0x4c] ss:$12 sps:$4 sm:$0xff]  }
 0x6f6   :  { %v1263_v55 = vpop.f32.mrf.mxu0  ;;  %v6630_v37 = vpop.f32.mrf.mxu1  ;;  %v8587_v61 = vld [vmem:[%s9951_s7 + $0x48] ss:$12 sps:$4 sm:$0xff]   ;;  %v8603_v0 = vld [vmem:[%s9951_s7 + $0x30] ss:$12 sps:$4 sm:$0xff]  }
 0x6f7   :  { %7408 = vpow2.f32 %v5814_v23  ;;  %v7117_v55 = vld [vmem:[%s9951_s7 + $0x50] ss:$12 sps:$4 sm:$0xff]   ;;  %v8597_v37 = vld [vmem:[%s9951_s7 + $0x34] ss:$12 sps:$4 sm:$0xff]   ;;  %v7121_v23 = vld [vmem:[%s9951_s7 + $0x38] ss:$12 sps:$4 sm:$0xff]  }
 0x702   :  { %v7407_v57 = vpop.eup %7406 }
 0x703   :  { %v1309_v4 = vadd.f32 1.0, %v7407_v57  ;;  %v8613_v57 = vld [vmem:[%s9951_s7 + $0x1c] ss:$12 sps:$4 sm:$0xff]  }
 0x704   :  { %v7409_v3 = vpop.eup %7408 }
 0x705   :  { %7410 = vrcp.f32 %v1309_v4  ;;  %v1316_v42 = vadd.f32 1.0, %v7409_v3  ;;  %v8619_v4 = vld [vmem:[%s9951_s7 + $0x18] ss:$12 sps:$4 sm:$0xff]   ;;  %v7125_v3 = vld [vmem:[%s9951_s7 + $0x20] ss:$12 sps:$4 sm:$0xff]  }
 0x712   :  { %v7411_v60 = vpop.eup %7410 }
 0x713   :  { %v1320_v46 = vmul.f32 %v7411_v60, %v1319_v36  ;;  %v8629_v36 = vld [vmem:[%s9951_s7 + $0x4] ss:$12 sps:$4 sm:$0xff]   ;;  %v8634_v60 = vld [vmem:[%s9947_s1 + $0x8] sm:$0xff] }
 0x715   :  { %v1321_v27 = vadd.f32 %v1320_v46, %v7983_v43  ;;  %v8640_v46 = vld [vmem:[%s9951_s7] ss:$12 sps:$4 sm:$0xff]  }
 0x717   :  { %7412 = vtanh.f32 %v1321_v27  ;;  %v7129_v27 = vld [vmem:[%s9951_s7 + $0x8] ss:$12 sps:$4 sm:$0xff]  }
 0x718   :  { %7414 = vrcp.f32 %v1316_v42  ;;  %v1699_v42 = vpack.c.bf16 %v8634_v60, %v8634_v60 }
 0x724   :  { %v7413_v56 = vpop.eup %7412 }
 0x725   :  { %v1323_v63 = vsub.f32 %v8320_v48, %v7413_v56  ;;  %v7415_v9 = vpop.eup %7414  ;;  %v8536_v48 = vld [vmem:[%s9951_s7 + $0x90] ss:$12 sps:$4 sm:$0xff]  }
 0x727   :  { %v1324_v19 = vmul.f32 %v7415_v9, %v1323_v63  ;;  %v7131_v63 = vld [vmem:[%s9950_s6 + $0x98] ss:$12 sps:$4 sm:$0xff]   ;;  %v7133_v9 = vld [vmem:[%s9950_s6 + $0x68] ss:$12 sps:$4 sm:$0xff]  }
 0x729   :  { %v8378_v30 = vadd.f32 %v7413_v56, %v1324_v19  ;;  %v7130_v56 = vld [vmem:[%s9950_s6 + $0xb0] ss:$12 sps:$4 sm:$0xff]  }
 0x72a   :  { %v7134_v19 = vld [vmem:[%s9950_s6 + $0x50] ss:$12 sps:$4 sm:$0xff]  }
 0x72b   :  { %v8390_v43 = vpack.c.bf16 %v8378_v30, %v8378_v30 }
 0x72d   :  { %1363 = vmatmul.mubr.bf16.vlgmr.msra.gmra.mxu0 %v8390_v43  ;;  %6648 = vmatmul.mubr.bf16.vlgmr.msra.gmra.mxu1 %v8390_v43 }
 0x72e   :  { %1619 = vmatpush1.bf16.msra.mxu0 %v8383_v12  ;;  %6652 = vmatpush3.bf16.msra.mxu1 %v7069_v16  ;;  %v7135_v16 = vld [vmem:[%s9950_s6 + $0x38] ss:$12 sps:$4 sm:$0xff]  }
 0x72f   :  { %1620 = vmatprep.subr.bf16.mxu0 %v8395_v29  ;;  %6653 = vmatprep.subr.bf16.mxu1 %v9972_v1 }
 0x730   :  { %1650 = vmatprep.mubr.bf16.mxu0 %v9973_v34  ;;  %6667 = vmatprep.mubr.msk.bf16.mxu1 %vm7560_vm0, %v9972_v1 }
 0x732   :  { %1621 = vmatpush1.bf16.msra.mxu0 %v8403_v40  ;;  %6654 = vmatpush3.bf16.msra.mxu1 %v7073_v17  ;;  %v7136_v17 = vld [vmem:[%s9950_s6 + $0x20] ss:$12 sps:$4 sm:$0xff]  }
 0x733   :  { %1622 = vmatprep.subr.bf16.mxu0 %v8413_v18  ;;  %6655 = vmatprep.subr.bf16.mxu1 %v9972_v1 }
 0x736   :  { %1623 = vmatpush1.bf16.msra.mxu0 %v8422_v21  ;;  %6656 = vmatpush3.bf16.msra.mxu1 %v7077_v22  ;;  %v7137_v22 = vld [vmem:[%s9950_s6 + $0x8] ss:$12 sps:$4 sm:$0xff]  }
 0x737   :  { %1624 = vmatprep.subr.bf16.mxu0 %v8432_v25  ;;  %6657 = vmatprep.subr.bf16.mxu1 %v9972_v1 }
 0x73a   :  { %1625 = vmatpush1.bf16.msra.mxu0 %v8438_v26  ;;  %6658 = vmatpush3.bf16.msra.mxu1 %v7081_v28  ;;  %v7138_v28 = vld [vmem:[%s9951_s7 + $0xb0] ss:$12 sps:$4 sm:$0xff]  }
 0x73b   :  { %1626 = vmatprep.subr.bf16.mxu0 %v8448_v31  ;;  %6659 = vmatprep.subr.bf16.mxu1 %v9972_v1 }
 0x73e   :  { %1627 = vmatpush1.bf16.msra.mxu0 %v8454_v32  ;;  %6660 = vmatpush3.bf16.msra.mxu1 %v7085_v7  ;;  %v7139_v7 = vld [vmem:[%s9951_s7 + $0x98] ss:$12 sps:$4 sm:$0xff]  }
 0x73f   :  { %1628 = vmatprep.subr.bf16.mxu0 %v8464_v8  ;;  %6661 = vmatprep.subr.bf16.mxu1 %v9972_v1 }
 0x742   :  { %1629 = vmatpush1.bf16.msra.mxu0 %v8470_v11  ;;  %6662 = vmatpush3.bf16.msra.mxu1 %v7089_v13  ;;  %v7140_v13 = vld [vmem:[%s9951_s7 + $0x80] ss:$12 sps:$4 sm:$0xff]  }
 0x743   :  { %1630 = vmatprep.subr.bf16.mxu0 %v8480_v14  ;;  %6663 = vmatprep.subr.bf16.mxu1 %v9972_v1 }
 0x746   :  { %1631 = vmatpush1.bf16.msra.mxu0 %v8486_v24  ;;  %6664 = vmatpush3.bf16.msra.mxu1 %v7093_v59  ;;  %v7141_v59 = vld [vmem:[%s9951_s7 + $0x68] ss:$12 sps:$4 sm:$0xff]  }
 0x747   :  { %1632 = vmatprep.subr.bf16.mxu0 %v8496_v39  ;;  %6665 = vmatprep.subr.bf16.mxu1 %v9972_v1 }
 0x74a   :  { %1633 = vmatpush1.bf16.msra.mxu0 %v8502_v20  ;;  %6666 = vmatpush3.bf16.msra.mxu1 %v7097_v62  ;;  %v7142_v62 = vld [vmem:[%s9951_s7 + $0x50] ss:$12 sps:$4 sm:$0xff]  }
 0x74b   :  { %1860 = vmatprep.subr.bf16.mxu0 %v8512_v33  ;;  %6671 = vmatprep.subr.bf16.mxu1 %v9972_v1 }
 0x74d   :  { %1651 = vmatmul.mubr.bf16.vlgmr.msra.gmra.mxu0 %v8002_v38  ;;  %6668 = vmatmul.mubr.bf16.vlgmr.msra.gmra.mxu1 %v8002_v38  ;;  %v8546_v38 = vld [vmem:[%s9951_s7 + $0x7c] ss:$12 sps:$4 sm:$0xff]  }
 0x74e   :  { %1861 = vmatpush1.bf16.msra.mxu0 %v8518_v35  ;;  %6672 = vmatpush3.bf16.msra.mxu1 %v7101_v6  ;;  %v7143_v6 = vld [vmem:[%s9951_s7 + $0x38] ss:$12 sps:$4 sm:$0xff]  }
 0x74f   :  { %1862 = vmatprep.subr.bf16.mxu0 %v8528_v41  ;;  %6673 = vmatprep.subr.bf16.mxu1 %v9972_v1 }
 0x750   :  { %1892 = vmatprep.mubr.bf16.mxu0 %v9973_v34  ;;  %6687 = vmatprep.mubr.msk.bf16.mxu1 %vm7560_vm0, %v9972_v1 }
 0x752   :  { %1863 = vmatpush1.bf16.msra.mxu0 %v8536_v48  ;;  %6674 = vmatpush3.bf16.msra.mxu1 %v7105_v49  ;;  %v7144_v49 = vld [vmem:[%s9951_s7 + $0x20] ss:$12 sps:$4 sm:$0xff]  }
 0x753   :  { %1864 = vmatprep.subr.bf16.mxu0 %v8546_v38  ;;  %6675 = vmatprep.subr.bf16.mxu1 %v9972_v1 }
 0x756   :  { %1865 = vmatpush1.bf16.msra.mxu0 %v8555_v50  ;;  %6676 = vmatpush3.bf16.msra.mxu1 %v7109_v51  ;;  %v7145_v51 = vld [vmem:[%s9951_s7 + $0x8] ss:$12 sps:$4 sm:$0xff]  }
 0x757   :  { %1866 = vmatprep.subr.bf16.mxu0 %v8565_v52  ;;  %6677 = vmatprep.subr.bf16.mxu1 %v9972_v1 }
 0x75a   :  { %1867 = vmatpush1.bf16.msra.mxu0 %v8571_v53  ;;  %6678 = vmatpush3.bf16.msra.mxu1 %v7113_v54 }
 0x75b   :  { %1868 = vmatprep.subr.bf16.mxu0 %v8581_v5  ;;  %6679 = vmatprep.subr.bf16.mxu1 %v9972_v1 }
 0x75e   :  { %1869 = vmatpush1.bf16.msra.mxu0 %v8587_v61  ;;  %6680 = vmatpush3.bf16.msra.mxu1 %v7117_v55 }
 0x75f   :  { %1870 = vmatprep.subr.bf16.mxu0 %v8597_v37  ;;  %6681 = vmatprep.subr.bf16.mxu1 %v9972_v1 }
 0x762   :  { %1871 = vmatpush1.bf16.msra.mxu0 %v8603_v0  ;;  %6682 = vmatpush3.bf16.msra.mxu1 %v7121_v23  ;;  %v9974_v23 = vld [vmem:[#allocation5_spill] sm:$0xff] }
 0x763   :  { %1872 = vmatprep.subr.bf16.mxu0 %v8613_v57  ;;  %6683 = vmatprep.subr.bf16.mxu1 %v9972_v1 }
 0x766   :  { %1873 = vmatpush1.bf16.msra.mxu0 %v8619_v4  ;;  %6684 = vmatpush3.bf16.msra.mxu1 %v7125_v3 }
 0x767   :  { %1874 = vmatprep.subr.bf16.mxu0 %v8629_v36  ;;  %6685 = vmatprep.subr.bf16.mxu1 %v9972_v1 }
 0x76a   :  { %1875 = vmatpush1.bf16.msra.mxu0 %v8640_v46  ;;  %6686 = vmatpush3.bf16.msra.mxu1 %v7129_v27 }
 0x76b   :  { %2123 = vmatprep.subr.bf16.mxu0 %v8365_v47  ;;  %6691 = vmatprep.subr.bf16.mxu1 %v9972_v1  ;;  %v7132_v47 = vld [vmem:[%s9950_s6 + $0x80] ss:$12 sps:$4 sm:$0xff]  }
 0x76d   :  { %1893 = vmatmul.mubr.bf16.vlgmr.msra.gmra.mxu0 %v1699_v42  ;;  %6688 = vmatmul.mubr.bf16.vlgmr.msra.gmra.mxu1 %v1699_v42 }
 0x76e   :  { %2124 = vmatpush1.bf16.msra.mxu0 %v8383_v12  ;;  %6692 = vmatpush3.bf16.msra.mxu1 %v7130_v56 }
 0x76f   :  { %2125 = vmatprep.subr.bf16.mxu0 %v8395_v29  ;;  %6693 = vmatprep.subr.bf16.mxu1 %v9972_v1 }
 0x770   :  { %2155 = vmatprep.mubr.bf16.mxu0 %v9973_v34  ;;  %6707 = vmatprep.mubr.msk.bf16.mxu1 %vm7560_vm0, %v9972_v1 }
 0x772   :  { %2126 = vmatpush1.bf16.msra.mxu0 %v8403_v40  ;;  %6694 = vmatpush3.bf16.msra.mxu1 %v7131_v63 }
 0x773   :  { %2127 = vmatprep.subr.bf16.mxu0 %v8413_v18  ;;  %6695 = vmatprep.subr.bf16.mxu1 %v9972_v1 }
 0x776   :  { %2128 = vmatpush1.bf16.msra.mxu0 %v8422_v21  ;;  %6696 = vmatpush3.bf16.msra.mxu1 %v7132_v47 }
 0x777   :  { %2129 = vmatprep.subr.bf16.mxu0 %v8432_v25  ;;  %6697 = vmatprep.subr.bf16.mxu1 %v9972_v1 }
 0x77a   :  { %2130 = vmatpush1.bf16.msra.mxu0 %v8438_v26  ;;  %6698 = vmatpush3.bf16.msra.mxu1 %v7133_v9 }
 0x77b   :  { %2131 = vmatprep.subr.bf16.mxu0 %v8448_v31  ;;  %6699 = vmatprep.subr.bf16.mxu1 %v9972_v1 }
 0x77e   :  { %2132 = vmatpush1.bf16.msra.mxu0 %v8454_v32  ;;  %6700 = vmatpush3.bf16.msra.mxu1 %v7134_v19 }
 0x77f   :  { %2133 = vmatprep.subr.bf16.mxu0 %v8464_v8  ;;  %6701 = vmatprep.subr.bf16.mxu1 %v9972_v1 }
 0x782   :  { %2134 = vmatpush1.bf16.msra.mxu0 %v8470_v11  ;;  %6702 = vmatpush3.bf16.msra.mxu1 %v7135_v16  ;;  %v9975_v16 = vld [vmem:[#allocation6_spill] sm:$0xff] }
 0x783   :  { %2135 = vmatprep.subr.bf16.mxu0 %v8480_v14  ;;  %6703 = vmatprep.subr.bf16.mxu1 %v9972_v1 }
 0x786   :  { %2136 = vmatpush1.bf16.msra.mxu0 %v8486_v24  ;;  %6704 = vmatpush3.bf16.msra.mxu1 %v7136_v17 }
 0x787   :  { %2137 = vmatprep.subr.bf16.mxu0 %v8496_v39  ;;  %6705 = vmatprep.subr.bf16.mxu1 %v9972_v1 }
 0x78a   :  { %2138 = vmatpush1.bf16.msra.mxu0 %v8502_v20  ;;  %6706 = vmatpush3.bf16.msra.mxu1 %v7137_v22 }
 0x78b   :  { %2365 = vmatprep.subr.bf16.mxu0 %v8512_v33  ;;  %6711 = vmatprep.subr.bf16.mxu1 %v9972_v1 }
 0x78d   :  { %2156 = vmatmul.mubr.bf16.vlgmr.msra.gmra.mxu0 %v8051_v15  ;;  %6708 = vmatmul.mubr.bf16.vlgmr.msra.gmra.mxu1 %v8051_v15  ;;  %v7555_v15 = vld [vmem:[%s9950_s6 + $0xac] ss:$12 sps:$4 sm:$0xff]  }
 0x78e   :  { %2366 = vmatpush1.bf16.msra.mxu0 %v8518_v35  ;;  %2397 = vmatprep.mubr.bf16.mxu0 %v9973_v34 }
 0x78f   :  { %2367 = vmatprep.subr.bf16.mxu0 %v8528_v41  ;;  %6727 = vmatprep.mubr.msk.bf16.mxu1 %vm7560_vm0, %v9972_v1 }
 0x790   :  { %6712 = vmatpush3.bf16.msra.mxu1 %v7138_v28 }
 0x791   :  { %6713 = vmatprep.subr.bf16.mxu1 %v9972_v1 }
 0x792   :  { %2368 = vmatpush1.bf16.msra.mxu0 %v8536_v48 }
 0x793   :  { %2369 = vmatprep.subr.bf16.mxu0 %v8546_v38 }
 0x794   :  { %6714 = vmatpush3.bf16.msra.mxu1 %v7139_v7 }
 0x795   :  { %6715 = vmatprep.subr.bf16.mxu1 %v9972_v1 }
 0x796   :  { %2370 = vmatpush1.bf16.msra.mxu0 %v8555_v50 }
 0x797   :  { %2371 = vmatprep.subr.bf16.mxu0 %v8565_v52 }
 0x798   :  { %6716 = vmatpush3.bf16.msra.mxu1 %v7140_v13 }
 0x799   :  { %6717 = vmatprep.subr.bf16.mxu1 %v9972_v1 }
 0x79a   :  { %2372 = vmatpush1.bf16.msra.mxu0 %v8571_v53 }
 0x79b   :  { %2373 = vmatprep.subr.bf16.mxu0 %v8581_v5 }
 0x79c   :  { %6718 = vmatpush3.bf16.msra.mxu1 %v7141_v59 }
 0x79d   :  { %6719 = vmatprep.subr.bf16.mxu1 %v9972_v1 }
 0x79e   :  { %2374 = vmatpush1.bf16.msra.mxu0 %v8587_v61 }
 0x79f   :  { %2375 = vmatprep.subr.bf16.mxu0 %v8597_v37 }
 0x7a0   :  { %6720 = vmatpush3.bf16.msra.mxu1 %v7142_v62 }
 0x7a1   :  { %6721 = vmatprep.subr.bf16.mxu1 %v9972_v1 }
 0x7a2   :  { %2376 = vmatpush1.bf16.msra.mxu0 %v8603_v0 }
 0x7a3   :  { %2377 = vmatprep.subr.bf16.mxu0 %v8613_v57 }
 0x7a4   :  { %6722 = vmatpush3.bf16.msra.mxu1 %v7143_v6 }
 0x7a5   :  { %6723 = vmatprep.subr.bf16.mxu1 %v9972_v1 }
 0x7a6   :  { %2378 = vmatpush1.bf16.msra.mxu0 %v8619_v4 }
 0x7a7   :  { %2379 = vmatprep.subr.bf16.mxu0 %v8629_v36 }
 0x7a8   :  { %6724 = vmatpush3.bf16.msra.mxu1 %v7144_v49 }
 0x7a9   :  { %6725 = vmatprep.subr.bf16.mxu1 %v9972_v1 }
 0x7aa   :  { %2380 = vmatpush1.bf16.msra.mxu0 %v8640_v46 }
 0x7ab   :  { %2628 = vmatprep.subr.bf16.mxu0 %v7555_v15 }
 0x7ac   :  { %6726 = vmatpush3.bf16.msra.mxu1 %v7145_v51 }
 0x7ad   :  { %6731 = vmatprep.subr.bf16.mxu1 %v9972_v1 }
 0x7ed   :  { %v1364_v54 = vpop.f32.mrf.mxu0  ;;  %v1405_v55 = vpop.f32.mrf.mxu1 }
 0x7ee   :  { %v1411_v3 = vadd.f32 %v1364_v54, %v9974_v23  ;;  %v1425_v62 = vadd.f32 %v8373_v44, %v1405_v55  ;;  %v1440_v44 = vld [vmem:[%s9952_s8] sm:$0x7] }
 0x7ef   :  { %v1366_v27 = vpop.f32.mrf.mxu0  ;;  %v6649_v42 = vpop.f32.mrf.mxu1 }
 0x7f0   :  { %v5815_v56 = vmul.f32 -1.442695, %v1411_v3  ;;  %v1418_v17 = vadd.f32 %v1366_v27, %v9975_v16  ;;  %v9976_v42 = vld [vmem:[#allocation7_spill] sm:$0xff] }
 0x7f1   :  { %v1368_v63 = vpop.f32.mrf.mxu0  ;;  %v1408_v47 = vpop.f32.mrf.mxu1 }
 0x7f2   :  { %7416 = vpow2.f32 %v5815_v56  ;;  %v5816_v22 = vmul.f32 -1.442695, %v1418_v17 }
 0x7f3   :  { %v1369_v9 = vpop.f32.mrf.mxu0  ;;  %v6650_v19 = vpop.f32.mrf.mxu1 }
 0x7f4   :  { %7418 = vpow2.f32 %v5816_v22  ;;  %v9977_v22 = vld [vmem:[#allocation4_spill] sm:$0xff] }
 0x7ff   :  { %v7417_v15 = vpop.eup %7416 }
 0x800   :  { %v1415_v28 = vadd.f32 1.0, %v7417_v15  ;;  %v9978_v15 = vsub.s32 0, %v9977_v22 }
 0x801   :  { %v7419_v59 = vpop.eup %7418 }
 0x802   :  { %7420 = vrcp.f32 %v1415_v28  ;;  %v1422_v63 = vadd.f32 1.0, %v7419_v59  ;;  %v8768_v28 = vrot.slane %v1440_v44, %v9978_v15  ;;  %v9980_v15 = vsub.s32 2, %v9977_v22 }
 0x80d   :  { %v1652_v7 = vpop.f32.mrf.mxu0  ;;  %v1693_v13 = vpop.f32.mrf.mxu1 }
 0x80e   :  { %v1653_v59 = vadd.f32 %v1652_v7, %v8768_v28 }
 0x80f   :  { %v7421_v6 = vpop.eup %7420  ;;  %v1654_v49 = vpop.f32.mrf.mxu0 }
 0x810   :  { %v6669_v51 = vpop.f32.mrf.mxu1  ;;  %v1426_v54 = vmul.f32 %v7421_v6, %v1425_v62 }
 0x811   :  { %v1656_v23 = vpop.f32.mrf.mxu0 }
 0x812   :  { %v1696_v3 = vpop.f32.mrf.mxu1  ;;  %v1427_v56 = vadd.f32 %v1426_v54, %v9976_v42 }
 0x813   :  { %v1657_v27 = vpop.f32.mrf.mxu0 }
 0x814   :  { %v6670_v47 = vpop.f32.mrf.mxu1  ;;  %7422 = vtanh.f32 %v1427_v56  ;;  %v9979_v56 = vsub.s32 1, %v9977_v22 }
 0x815   :  { %7424 = vrcp.f32 %v1422_v63 }
 0x816   :  { %v8776_v63 = vrot.slane %v1440_v44, %v9979_v56 }
 0x821   :  { %v7423_v9 = vpop.eup %7422 }
 0x822   :  { %v1429_v19 = vsub.f32 %v8378_v30, %v7423_v9  ;;  %v7425_v16 = vpop.eup %7424 }
 0x824   :  { %v1430_v17 = vmul.f32 %v7425_v16, %v1429_v19 }
 0x826   :  { %v1431_v55 = vadd.f32 %v7423_v9, %v1430_v17  ;;  %v1655_v9 = vadd.f32 %v1654_v49, %v8776_v63 }
 0x828   :  { %1432 = vst [vmem:[%s9953_s14] sm:$0xff] %v1431_v55  ;;  %v8782_v55 = vld [vmem:[%s9954_s9] ss:$0 sm:$0xff] }
 0x82d   :  { %v1894_v62 = vpop.f32.mrf.mxu0  ;;  %v1935_v6 = vpop.f32.mrf.mxu1 }
 0x82e   :  { %v1941_v30 = vadd.f32 %v1894_v62, %v1653_v59  ;;  %v8786_v59 = vrot.slane %v1440_v44, %v9980_v15  ;;  %v1955_v62 = vadd.f32 %v8782_v55, %v1935_v6 }
 0x82f   :  { %v1896_v51 = vpop.f32.mrf.mxu0  ;;  %v6689_v54 = vpop.f32.mrf.mxu1 }
 0x830   :  { %v5866_v23 = vmul.f32 -1.442695, %v1941_v30  ;;  %v1948_v19 = vadd.f32 %v1896_v51, %v1655_v9 }
 0x831   :  { %v1898_v3 = vpop.f32.mrf.mxu0  ;;  %v1938_v42 = vpop.f32.mrf.mxu1 }
 0x832   :  { %7426 = vpow2.f32 %v5866_v23  ;;  %v5867_v16 = vmul.f32 -1.442695, %v1948_v19  ;;  %v1694_v42 = vadd.f32 %v1693_v13, %v8786_v59  ;;  %v7146_v13 = vld [vmem:[%s9950_s6 + $0xb0] ss:$12 sps:$4 sm:$0xff]  }
 0x833   :  { %v1899_v27 = vpop.f32.mrf.mxu0  ;;  %v6690_v47 = vpop.f32.mrf.mxu1 }
 0x834   :  { %7428 = vpow2.f32 %v5867_v16 }
 0x83f   :  { %v7427_v7 = vpop.eup %7426 }
 0x840   :  { %v1945_v17 = vadd.f32 1.0, %v7427_v7 }
 0x841   :  { %v7429_v51 = vpop.eup %7428 }
 0x842   :  { %7430 = vrcp.f32 %v1945_v17  ;;  %v1952_v9 = vadd.f32 1.0, %v7429_v51 }
 0x84d   :  { %v8789_v30 = vpop.f32.mrf.mxu0  ;;  %v8791_v49 = vpop.f32.mrf.mxu1 }
 0x84f   :  { %v7431_v54 = vpop.eup %7430  ;;  %v8793_v23 = vpop.f32.mrf.mxu0 }
 0x850   :  { %v6709_v3 = vpop.f32.mrf.mxu1  ;;  %v1956_v56 = vmul.f32 %v7431_v54, %v1955_v62 }
 0x851   :  { %v2161_v27 = vpop.f32.mrf.mxu0 }
 0x852   :  { %v2201_v47 = vpop.f32.mrf.mxu1  ;;  %v1957_v22 = vadd.f32 %v1956_v56, %v1694_v42 }
 0x853   :  { %v2162_v44 = vpop.f32.mrf.mxu0 }
 0x854   :  { %v6710_v19 = vpop.f32.mrf.mxu1  ;;  %7432 = vtanh.f32 %v1957_v22 }
 0x855   :  { %7434 = vrcp.f32 %v1952_v9 }
 0x861   :  { %v7433_v6 = vpop.eup %7432 }
 0x862   :  { %v1959_v16 = vsub.f32 %v8634_v60, %v7433_v6  ;;  %v7435_v7 = vpop.eup %7434  ;;  %v7147_v60 = vld [vmem:[%s9950_s6 + $0x98] ss:$12 sps:$4 sm:$0xff]  }
 0x864   :  { %v1960_v17 = vmul.f32 %v7435_v7, %v1959_v16 }
 0x866   :  { %v8797_v15 = vadd.f32 %v7433_v6, %v1960_v17 }
 0x868   :  { %v2204_v62 = vpack.c.bf16 %v8797_v15, %v8797_v15 }
 0x86a   :  { %2398 = vmatmul.mubr.bf16.vlgmr.msra.gmra.mxu0 %v2204_v62  ;;  %6728 = vmatmul.mubr.bf16.vlgmr.msra.gmra.mxu1 %v2204_v62 }
 0x86b   :  { %2629 = vmatpush1.bf16.msra.mxu0 %v8383_v12  ;;  %6732 = vmatpush3.bf16.msra.mxu1 %v7146_v13  ;;  %v7148_v12 = vld [vmem:[%s9950_s6 + $0x80] ss:$12 sps:$4 sm:$0xff]  }
 0x86c   :  { %2630 = vmatprep.subr.bf16.mxu0 %v8395_v29  ;;  %6733 = vmatprep.subr.bf16.mxu1 %v9972_v1  ;;  %v7149_v29 = vld [vmem:[%s9950_s6 + $0x68] ss:$12 sps:$4 sm:$0xff]  }
 0x86d   :  { %2660 = vmatprep.mubr.bf16.mxu0 %v9973_v34  ;;  %6747 = vmatprep.mubr.msk.bf16.mxu1 %vm7560_vm0, %v9972_v1 }
 0x86f   :  { %2631 = vmatpush1.bf16.msra.mxu0 %v8403_v40  ;;  %6734 = vmatpush3.bf16.msra.mxu1 %v7147_v60  ;;  %v7150_v40 = vld [vmem:[%s9950_s6 + $0x50] ss:$12 sps:$4 sm:$0xff]  }
 0x870   :  { %2632 = vmatprep.subr.bf16.mxu0 %v8413_v18  ;;  %6735 = vmatprep.subr.bf16.mxu1 %v9972_v1  ;;  %v7151_v18 = vld [vmem:[%s9950_s6 + $0x38] ss:$12 sps:$4 sm:$0xff]   ;;  %v7165_v60 = vld [vmem:[%s9950_s6 + $0xb0] ss:$12 sps:$4 sm:$0xff]  }
 0x873   :  { %2633 = vmatpush1.bf16.msra.mxu0 %v8422_v21  ;;  %6736 = vmatpush3.bf16.msra.mxu1 %v7148_v12  ;;  %v7152_v21 = vld [vmem:[%s9950_s6 + $0x20] ss:$12 sps:$4 sm:$0xff]  }
 0x874   :  { %2634 = vmatprep.subr.bf16.mxu0 %v8432_v25  ;;  %6737 = vmatprep.subr.bf16.mxu1 %v9972_v1  ;;  %v7153_v25 = vld [vmem:[%s9950_s6 + $0x8] ss:$12 sps:$4 sm:$0xff]  }
 0x877   :  { %2635 = vmatpush1.bf16.msra.mxu0 %v8438_v26  ;;  %6738 = vmatpush3.bf16.msra.mxu1 %v7149_v29  ;;  %v7155_v26 = vld [vmem:[%s9951_s7 + $0x98] ss:$12 sps:$4 sm:$0xff]   ;;  %v8939_v29 = vld [vmem:[%s9950_s6 + $0x94] ss:$12 sps:$4 sm:$0xff]  }
 0x878   :  { %2636 = vmatprep.subr.bf16.mxu0 %v8448_v31  ;;  %6739 = vmatprep.subr.bf16.mxu1 %v9972_v1  ;;  %v7156_v31 = vld [vmem:[%s9951_s7 + $0x80] ss:$12 sps:$4 sm:$0xff]  }
 0x87b   :  { %2637 = vmatpush1.bf16.msra.mxu0 %v8454_v32  ;;  %6740 = vmatpush3.bf16.msra.mxu1 %v7150_v40  ;;  %v7157_v32 = vld [vmem:[%s9951_s7 + $0x68] ss:$12 sps:$4 sm:$0xff]   ;;  %v8945_v40 = vld [vmem:[%s9950_s6 + $0x90] ss:$12 sps:$4 sm:$0xff]  }
 0x87c   :  { %2638 = vmatprep.subr.bf16.mxu0 %v8464_v8  ;;  %6741 = vmatprep.subr.bf16.mxu1 %v9972_v1  ;;  %v8890_v8 = vld [vmem:[%s9950_s6 + $0xac] ss:$12 sps:$4 sm:$0xff]  }
 0x87f   :  { %2639 = vmatpush1.bf16.msra.mxu0 %v8470_v11  ;;  %6742 = vmatpush3.bf16.msra.mxu1 %v7151_v18  ;;  %v7158_v11 = vld [vmem:[%s9951_s7 + $0x50] ss:$12 sps:$4 sm:$0xff]   ;;  %v7169_v18 = vld [vmem:[%s9950_s6 + $0x98] ss:$12 sps:$4 sm:$0xff]  }
 0x880   :  { %2640 = vmatprep.subr.bf16.mxu0 %v8480_v14  ;;  %6743 = vmatprep.subr.bf16.mxu1 %v9972_v1  ;;  %v7159_v14 = vld [vmem:[%s9951_s7 + $0x38] ss:$12 sps:$4 sm:$0xff]  }
 0x883   :  { %2641 = vmatpush1.bf16.msra.mxu0 %v8486_v24  ;;  %6744 = vmatpush3.bf16.msra.mxu1 %v7152_v21  ;;  %v7160_v24 = vld [vmem:[%s9951_s7 + $0x20] ss:$12 sps:$4 sm:$0xff]   ;;  %v8955_v21 = vld [vmem:[%s9950_s6 + $0x7c] ss:$12 sps:$4 sm:$0xff]  }
 0x884   :  { %2642 = vmatprep.subr.bf16.mxu0 %v8496_v39  ;;  %6745 = vmatprep.subr.bf16.mxu1 %v9972_v1  ;;  %v7161_v39 = vld [vmem:[%s9951_s7 + $0x8] ss:$12 sps:$4 sm:$0xff]  }
 0x887   :  { %2643 = vmatpush1.bf16.msra.mxu0 %v8502_v20  ;;  %6746 = vmatpush3.bf16.msra.mxu1 %v7153_v25  ;;  %v2158_v20 = vadd.f32 %v8789_v30, %v8768_v28  ;;  %v8964_v25 = vld [vmem:[%s9950_s6 + $0x78] ss:$12 sps:$4 sm:$0xff]  }
 0x888   :  { %2870 = vmatprep.subr.bf16.mxu0 %v8512_v33  ;;  %6751 = vmatprep.subr.bf16.mxu1 %v9972_v1 }
 0x88a   :  { %2661 = vmatmul.mubr.bf16.vlgmr.msra.gmra.mxu0 %v8099_v58  ;;  %6748 = vmatmul.mubr.bf16.vlgmr.msra.gmra.mxu1 %v8099_v58  ;;  %v7154_v58 = vld [vmem:[%s9951_s7 + $0xb0] ss:$12 sps:$4 sm:$0xff]  }
 0x88b   :  { %2871 = vmatpush1.bf16.msra.mxu0 %v8518_v35  ;;  %2902 = vmatprep.mubr.bf16.mxu0 %v9973_v34 }
 0x88c   :  { %2872 = vmatprep.subr.bf16.mxu0 %v8528_v41  ;;  %6767 = vmatprep.mubr.msk.bf16.mxu1 %vm7560_vm0, %v9972_v1 }
 0x88d   :  { %6752 = vmatpush3.bf16.msra.mxu1 %v7154_v58  ;;  %v7173_v58 = vld [vmem:[%s9950_s6 + $0x80] ss:$12 sps:$4 sm:$0xff]  }
 0x88e   :  { %6753 = vmatprep.subr.bf16.mxu1 %v9972_v1 }
 0x88f   :  { %2873 = vmatpush1.bf16.msra.mxu0 %v8536_v48 }
 0x890   :  { %2874 = vmatprep.subr.bf16.mxu0 %v8546_v38 }
 0x891   :  { %6754 = vmatpush3.bf16.msra.mxu1 %v7155_v26  ;;  %v8974_v26 = vld [vmem:[%s9950_s6 + $0x64] ss:$12 sps:$4 sm:$0xff]  }
 0x892   :  { %6755 = vmatprep.subr.bf16.mxu1 %v9972_v1 }
 0x893   :  { %2875 = vmatpush1.bf16.msra.mxu0 %v8555_v50 }
 0x894   :  { %2876 = vmatprep.subr.bf16.mxu0 %v8565_v52 }
 0x895   :  { %6756 = vmatpush3.bf16.msra.mxu1 %v7156_v31  ;;  %v8980_v31 = vld [vmem:[%s9950_s6 + $0x60] ss:$12 sps:$4 sm:$0xff]  }
 0x896   :  { %6757 = vmatprep.subr.bf16.mxu1 %v9972_v1 }
 0x897   :  { %2877 = vmatpush1.bf16.msra.mxu0 %v8571_v53 }
 0x898   :  { %2878 = vmatprep.subr.bf16.mxu0 %v8581_v5 }
 0x899   :  { %6758 = vmatpush3.bf16.msra.mxu1 %v7157_v32  ;;  %v7177_v32 = vld [vmem:[%s9950_s6 + $0x68] ss:$12 sps:$4 sm:$0xff]  }
 0x89a   :  { %6759 = vmatprep.subr.bf16.mxu1 %v9972_v1 }
 0x89b   :  { %2879 = vmatpush1.bf16.msra.mxu0 %v8587_v61 }
 0x89c   :  { %2880 = vmatprep.subr.bf16.mxu0 %v8597_v37  ;;  %v2160_v37 = vadd.f32 %v8793_v23, %v8776_v63  ;;  %v2199_v23 = vadd.f32 %v8791_v49, %v8786_v59  ;;  %v8929_v49 = vld [vmem:[%s9950_s6 + $0xa8] ss:$12 sps:$4 sm:$0xff]  }
 0x89d   :  { %6760 = vmatpush3.bf16.msra.mxu1 %v7158_v11  ;;  %v8990_v11 = vld [vmem:[%s9950_s6 + $0x4c] ss:$12 sps:$4 sm:$0xff]  }
 0x89e   :  { %6761 = vmatprep.subr.bf16.mxu1 %v9972_v1 }
 0x89f   :  { %2881 = vmatpush1.bf16.msra.mxu0 %v8603_v0 }
 0x8a0   :  { %2882 = vmatprep.subr.bf16.mxu0 %v8613_v57 }
 0x8a1   :  { %6762 = vmatpush3.bf16.msra.mxu1 %v7159_v14  ;;  %v8996_v14 = vld [vmem:[%s9950_s6 + $0x48] ss:$12 sps:$4 sm:$0xff]  }
 0x8a2   :  { %6763 = vmatprep.subr.bf16.mxu1 %v9972_v1 }
 0x8a3   :  { %2883 = vmatpush1.bf16.msra.mxu0 %v8619_v4 }
 0x8a4   :  { %2884 = vmatprep.subr.bf16.mxu0 %v8629_v36 }
 0x8a5   :  { %6764 = vmatpush3.bf16.msra.mxu1 %v7160_v24  ;;  %v7181_v24 = vld [vmem:[%s9950_s6 + $0x50] ss:$12 sps:$4 sm:$0xff]  }
 0x8a6   :  { %6765 = vmatprep.subr.bf16.mxu1 %v9972_v1 }
 0x8a7   :  { %2885 = vmatpush1.bf16.msra.mxu0 %v8640_v46 }
 0x8a8   :  { %3133 = vmatprep.subr.bf16.mxu0 %v8890_v8 }
 0x8a9   :  { %6766 = vmatpush3.bf16.msra.mxu1 %v7161_v39  ;;  %v9006_v39 = vld [vmem:[%s9950_s6 + $0x34] ss:$12 sps:$4 sm:$0xff]  }
 0x8aa   :  { %6771 = vmatprep.subr.bf16.mxu1 %v9972_v1 }
 0x92a   :  { %v2399_v33 = vpop.f32.mrf.mxu0  ;;  %v2440_v35 = vpop.f32.mrf.mxu1 }
 0x92b   :  { %v2446_v41 = vadd.f32 %v2399_v33, %v2158_v20  ;;  %v2460_v54 = vadd.f32 %v8782_v55, %v2440_v35  ;;  %v9012_v20 = vld [vmem:[%s9950_s6 + $0x30] ss:$12 sps:$4 sm:$0xff]   ;;  %v7185_v33 = vld [vmem:[%s9950_s6 + $0x38] ss:$12 sps:$4 sm:$0xff]  }
 0x92c   :  { %v2401_v48 = vpop.f32.mrf.mxu0  ;;  %v6729_v38 = vpop.f32.mrf.mxu1  ;;  %v9022_v35 = vld [vmem:[%s9950_s6 + $0x1c] ss:$12 sps:$4 sm:$0xff]  }
 0x92d   :  { %v5916_v50 = vmul.f32 -1.442695, %v2446_v41  ;;  %v2453_v0 = vadd.f32 %v2401_v48, %v2160_v37  ;;  %v9028_v41 = vld [vmem:[%s9950_s6 + $0x18] ss:$12 sps:$4 sm:$0xff]   ;;  %v7189_v48 = vld [vmem:[%s9950_s6 + $0x20] ss:$12 sps:$4 sm:$0xff]  }
 0x92e   :  { %v2403_v52 = vpop.f32.mrf.mxu0  ;;  %v2443_v53 = vpop.f32.mrf.mxu1  ;;  %v9038_v38 = vld [vmem:[%s9950_s6 + $0x4] ss:$12 sps:$4 sm:$0xff]  }
 0x92f   :  { %7436 = vpow2.f32 %v5916_v50  ;;  %v5917_v57 = vmul.f32 -1.442695, %v2453_v0  ;;  %v9044_v50 = vld [vmem:[%s9950_s6] ss:$12 sps:$4 sm:$0xff]   ;;  %v7193_v52 = vld [vmem:[%s9950_s6 + $0x8] ss:$12 sps:$4 sm:$0xff]  }
 0x930   :  { %v2404_v5 = vpop.f32.mrf.mxu0  ;;  %v6730_v61 = vpop.f32.mrf.mxu1  ;;  %v9061_v53 = vld [vmem:[%s9951_s7 + $0xac] ss:$12 sps:$4 sm:$0xff]   ;;  %v9082_v37 = vld [vmem:[%s9951_s7 + $0x90] ss:$12 sps:$4 sm:$0xff]  }
 0x931   :  { %7438 = vpow2.f32 %v5917_v57  ;;  %v9066_v5 = vld [vmem:[%s9951_s7 + $0xa8] ss:$12 sps:$4 sm:$0xff]   ;;  %v7197_v61 = vld [vmem:[%s9951_s7 + $0xb0] ss:$12 sps:$4 sm:$0xff]   ;;  %v7201_v0 = vld [vmem:[%s9951_s7 + $0x98] ss:$12 sps:$4 sm:$0xff]  }
 0x932   :  { %v9092_v57 = vld [vmem:[%s9951_s7 + $0x7c] ss:$12 sps:$4 sm:$0xff]  }
 0x93c   :  { %v7437_v4 = vpop.eup %7436 }
 0x93d   :  { %v2450_v36 = vadd.f32 1.0, %v7437_v4  ;;  %v9098_v4 = vld [vmem:[%s9951_s7 + $0x78] ss:$12 sps:$4 sm:$0xff]  }
 0x93e   :  { %v7439_v51 = vpop.eup %7438 }
 0x93f   :  { %7440 = vrcp.f32 %v2450_v36  ;;  %v2457_v44 = vadd.f32 1.0, %v7439_v51  ;;  %v7205_v36 = vld [vmem:[%s9951_s7 + $0x80] ss:$12 sps:$4 sm:$0xff]  }
 0x940   :  { %v9108_v51 = vld [vmem:[%s9951_s7 + $0x60] ss:$12 sps:$4 sm:$0xff]  }
 0x94a   :  { %v8914_v46 = vpop.f32.mrf.mxu0  ;;  %v8916_v30 = vpop.f32.mrf.mxu1 }
 0x94c   :  { %v7441_v3 = vpop.eup %7440  ;;  %v8919_v42 = vpop.f32.mrf.mxu0 }
 0x94d   :  { %v6749_v56 = vpop.f32.mrf.mxu1  ;;  %v2461_v27 = vmul.f32 %v7441_v3, %v2460_v54  ;;  %v9113_v54 = vld [vmem:[%s9951_s7 + $0x64] ss:$12 sps:$4 sm:$0xff]   ;;  %v7209_v3 = vld [vmem:[%s9951_s7 + $0x68] ss:$12 sps:$4 sm:$0xff]  }
 0x94e   :  { %v2666_v47 = vpop.f32.mrf.mxu0  ;;  %v9122_v56 = vld [vmem:[%s9951_s7 + $0x4c] ss:$12 sps:$4 sm:$0xff]  }
 0x94f   :  { %v2706_v9 = vpop.f32.mrf.mxu1  ;;  %v2462_v22 = vadd.f32 %v2461_v27, %v2199_v23  ;;  %v9129_v23 = vld [vmem:[%s9951_s7 + $0x48] ss:$12 sps:$4 sm:$0xff]   ;;  %v7213_v27 = vld [vmem:[%s9951_s7 + $0x50] ss:$12 sps:$4 sm:$0xff]  }
 0x950   :  { %v2667_v19 = vpop.f32.mrf.mxu0  ;;  %v9139_v47 = vld [vmem:[%s9951_s7 + $0x34] ss:$12 sps:$4 sm:$0xff]   ;;  %v9145_v9 = vld [vmem:[%s9951_s7 + $0x30] ss:$12 sps:$4 sm:$0xff]  }
 0x951   :  { %v6750_v6 = vpop.f32.mrf.mxu1  ;;  %7442 = vtanh.f32 %v2462_v22  ;;  %v7217_v22 = vld [vmem:[%s9951_s7 + $0x38] ss:$12 sps:$4 sm:$0xff]  }
 0x952   :  { %7444 = vrcp.f32 %v2457_v44  ;;  %v9155_v44 = vld [vmem:[%s9951_s7 + $0x1c] ss:$12 sps:$4 sm:$0xff]   ;;  %v9161_v19 = vld [vmem:[%s9951_s7 + $0x18] ss:$12 sps:$4 sm:$0xff]   ;;  %v7221_v6 = vld [vmem:[%s9951_s7 + $0x20] ss:$12 sps:$4 sm:$0xff]  }
 0x95e   :  { %v7443_v16 = vpop.eup %7442 }
 0x95f   :  { %v2464_v7 = vsub.f32 %v8797_v15, %v7443_v16  ;;  %v7445_v17 = vpop.eup %7444 }
 0x961   :  { %v2465_v13 = vmul.f32 %v7445_v17, %v2464_v7  ;;  %v9177_v7 = vld [vmem:[%s9951_s7] ss:$12 sps:$4 sm:$0xff]   ;;  %v7225_v17 = vld [vmem:[%s9951_s7 + $0x8] ss:$12 sps:$4 sm:$0xff]  }
 0x963   :  { %v8924_v62 = vadd.f32 %v7443_v16, %v2465_v13  ;;  %v9171_v16 = vld [vmem:[%s9951_s7 + $0x4] ss:$12 sps:$4 sm:$0xff]   ;;  %v2663_v13 = vadd.f32 %v8914_v46, %v8768_v28 }
 0x965   :  { %v2709_v12 = vpack.c.bf16 %v8924_v62, %v8924_v62 }
 0x967   :  { %2903 = vmatmul.mubr.bf16.vlgmr.msra.gmra.mxu0 %v2709_v12  ;;  %6768 = vmatmul.mubr.bf16.vlgmr.msra.gmra.mxu1 %v2709_v12 }
 0x968   :  { %3134 = vmatpush1.bf16.msra.mxu0 %v8929_v49  ;;  %6772 = vmatpush3.bf16.msra.mxu1 %v7165_v60 }
 0x969   :  { %3135 = vmatprep.subr.bf16.mxu0 %v8939_v29  ;;  %6773 = vmatprep.subr.bf16.mxu1 %v9972_v1 }
 0x96a   :  { %3165 = vmatprep.mubr.bf16.mxu0 %v9973_v34  ;;  %6787 = vmatprep.mubr.msk.bf16.mxu1 %vm7560_vm0, %v9972_v1 }
 0x96c   :  { %3136 = vmatpush1.bf16.msra.mxu0 %v8945_v40  ;;  %6774 = vmatpush3.bf16.msra.mxu1 %v7169_v18 }
 0x96d   :  { %3137 = vmatprep.subr.bf16.mxu0 %v8955_v21  ;;  %6775 = vmatprep.subr.bf16.mxu1 %v9972_v1 }
 0x970   :  { %3138 = vmatpush1.bf16.msra.mxu0 %v8964_v25  ;;  %6776 = vmatpush3.bf16.msra.mxu1 %v7173_v58 }
 0x971   :  { %3139 = vmatprep.subr.bf16.mxu0 %v8974_v26  ;;  %6777 = vmatprep.subr.bf16.mxu1 %v9972_v1 }
 0x974   :  { %3140 = vmatpush1.bf16.msra.mxu0 %v8980_v31  ;;  %6778 = vmatpush3.bf16.msra.mxu1 %v7177_v32 }
 0x975   :  { %3141 = vmatprep.subr.bf16.mxu0 %v8990_v11  ;;  %6779 = vmatprep.subr.bf16.mxu1 %v9972_v1 }
 0x978   :  { %3142 = vmatpush1.bf16.msra.mxu0 %v8996_v14  ;;  %6780 = vmatpush3.bf16.msra.mxu1 %v7181_v24 }
 0x979   :  { %3143 = vmatprep.subr.bf16.mxu0 %v9006_v39  ;;  %6781 = vmatprep.subr.bf16.mxu1 %v9972_v1 }
 0x97c   :  { %3144 = vmatpush1.bf16.msra.mxu0 %v9012_v20  ;;  %6782 = vmatpush3.bf16.msra.mxu1 %v7185_v33 }
 0x97d   :  { %3145 = vmatprep.subr.bf16.mxu0 %v9022_v35  ;;  %6783 = vmatprep.subr.bf16.mxu1 %v9972_v1 }
 0x980   :  { %3146 = vmatpush1.bf16.msra.mxu0 %v9028_v41  ;;  %6784 = vmatpush3.bf16.msra.mxu1 %v7189_v48 }
 0x981   :  { %3147 = vmatprep.subr.bf16.mxu0 %v9038_v38  ;;  %6785 = vmatprep.subr.bf16.mxu1 %v9972_v1 }
 0x984   :  { %3148 = vmatpush1.bf16.msra.mxu0 %v9044_v50  ;;  %6786 = vmatpush3.bf16.msra.mxu1 %v7193_v52 }
 0x985   :  { %6791 = vmatprep.subr.bf16.mxu1 %v9972_v1  ;;  %3375 = vmatprep.subr.bf16.mxu0 %v9061_v53 }
 0x987   :  { %3166 = vmatmul.mubr.bf16.vlgmr.msra.gmra.mxu0 %v8148_v45  ;;  %6788 = vmatmul.mubr.bf16.vlgmr.msra.gmra.mxu1 %v8148_v45  ;;  %v9076_v45 = vld [vmem:[%s9951_s7 + $0x94] ss:$12 sps:$4 sm:$0xff]  }
 0x988   :  { %3407 = vmatprep.mubr.bf16.mxu0 %v9973_v34  ;;  %6807 = vmatprep.mubr.msk.bf16.mxu1 %vm7560_vm0, %v9972_v1 }
 0x989   :  { %3376 = vmatpush1.bf16.msra.mxu0 %v9066_v5  ;;  %6792 = vmatpush3.bf16.msra.mxu1 %v7197_v61 }
 0x98a   :  { %6793 = vmatprep.subr.bf16.mxu1 %v9972_v1  ;;  %3377 = vmatprep.subr.bf16.mxu0 %v9076_v45 }
 0x98d   :  { %3378 = vmatpush1.bf16.msra.mxu0 %v9082_v37  ;;  %6794 = vmatpush3.bf16.msra.mxu1 %v7201_v0  ;;  %v2665_v0 = vadd.f32 %v8919_v42, %v8776_v63  ;;  %v2704_v42 = vadd.f32 %v8916_v30, %v8786_v59  ;;  %v7226_v30 = vld [vmem:[%s9950_s6 + $0xb0] ss:$12 sps:$4 sm:$0xff]  }
 0x98e   :  { %6795 = vmatprep.subr.bf16.mxu1 %v9972_v1  ;;  %3379 = vmatprep.subr.bf16.mxu0 %v9092_v57 }
 0x991   :  { %3380 = vmatpush1.bf16.msra.mxu0 %v9098_v4  ;;  %6796 = vmatpush3.bf16.msra.mxu1 %v7205_v36 }
 0x992   :  { %6797 = vmatprep.subr.bf16.mxu1 %v9972_v1  ;;  %3381 = vmatprep.subr.bf16.mxu0 %v9113_v54 }
 0x995   :  { %3382 = vmatpush1.bf16.msra.mxu0 %v9108_v51  ;;  %6798 = vmatpush3.bf16.msra.mxu1 %v7209_v3 }
 0x996   :  { %3383 = vmatprep.subr.bf16.mxu0 %v9122_v56  ;;  %6799 = vmatprep.subr.bf16.mxu1 %v9972_v1 }
 0x999   :  { %3384 = vmatpush1.bf16.msra.mxu0 %v9129_v23  ;;  %6800 = vmatpush3.bf16.msra.mxu1 %v7213_v27 }
 0x99a   :  { %3385 = vmatprep.subr.bf16.mxu0 %v9139_v47  ;;  %6801 = vmatprep.subr.bf16.mxu1 %v9972_v1 }
 0x99d   :  { %3386 = vmatpush1.bf16.msra.mxu0 %v9145_v9  ;;  %6802 = vmatpush3.bf16.msra.mxu1 %v7217_v22 }
 0x99e   :  { %3387 = vmatprep.subr.bf16.mxu0 %v9155_v44  ;;  %6803 = vmatprep.subr.bf16.mxu1 %v9972_v1 }
 0x9a1   :  { %3388 = vmatpush1.bf16.msra.mxu0 %v9161_v19  ;;  %6804 = vmatpush3.bf16.msra.mxu1 %v7221_v6 }
 0x9a2   :  { %3389 = vmatprep.subr.bf16.mxu0 %v9171_v16  ;;  %6805 = vmatprep.subr.bf16.mxu1 %v9972_v1 }
 0x9a5   :  { %3390 = vmatpush1.bf16.msra.mxu0 %v9177_v7  ;;  %6806 = vmatpush3.bf16.msra.mxu1 %v7225_v17 }
 0x9a6   :  { %3638 = vmatprep.subr.bf16.mxu0 %v8890_v8  ;;  %6811 = vmatprep.subr.bf16.mxu1 %v9972_v1 }
 0xa27   :  { %v2904_v60 = vpop.f32.mrf.mxu0  ;;  %v2945_v12 = vpop.f32.mrf.mxu1 }
 0xa28   :  { %v2951_v18 = vadd.f32 %v2904_v60, %v2663_v13  ;;  %v2965_v13 = vadd.f32 %v8782_v55, %v2945_v12 }
 0xa29   :  { %v2906_v58 = vpop.f32.mrf.mxu0  ;;  %v6769_v32 = vpop.f32.mrf.mxu1 }
 0xa2a   :  { %v5966_v24 = vmul.f32 -1.442695, %v2951_v18  ;;  %v2958_v36 = vadd.f32 %v2906_v58, %v2665_v0 }
 0xa2b   :  { %v2908_v33 = vpop.f32.mrf.mxu0  ;;  %v2948_v48 = vpop.f32.mrf.mxu1 }
 0xa2c   :  { %7446 = vpow2.f32 %v5966_v24  ;;  %v5967_v3 = vmul.f32 -1.442695, %v2958_v36 }
 0xa2d   :  { %v2909_v52 = vpop.f32.mrf.mxu0  ;;  %v6770_v61 = vpop.f32.mrf.mxu1 }
 0xa2e   :  { %7448 = vpow2.f32 %v5967_v3 }
 0xa39   :  { %v7447_v27 = vpop.eup %7446 }
 0xa3a   :  { %v2955_v22 = vadd.f32 1.0, %v7447_v27 }
 0xa3b   :  { %v7449_v17 = vpop.eup %7448 }
 0xa3c   :  { %7450 = vrcp.f32 %v2955_v22  ;;  %v2962_v52 = vadd.f32 1.0, %v7449_v17  ;;  %v7227_v17 = vld [vmem:[%s9950_s6 + $0x98] ss:$12 sps:$4 sm:$0xff]  }
 0xa47   :  { %v9191_v46 = vpop.f32.mrf.mxu0  ;;  %v9193_v6 = vpop.f32.mrf.mxu1 }
 0xa49   :  { %v7451_v60 = vpop.eup %7450  ;;  %v9196_v18 = vpop.f32.mrf.mxu0 }
 0xa4a   :  { %v6789_v32 = vpop.f32.mrf.mxu1  ;;  %v2966_v58 = vmul.f32 %v7451_v60, %v2965_v13  ;;  %v7228_v60 = vld [vmem:[%s9950_s6 + $0x80] ss:$12 sps:$4 sm:$0xff]  }
 0xa4b   :  { %v3171_v24 = vpop.f32.mrf.mxu0  ;;  %v7229_v32 = vld [vmem:[%s9950_s6 + $0x68] ss:$12 sps:$4 sm:$0xff]  }
 0xa4c   :  { %v3211_v33 = vpop.f32.mrf.mxu1  ;;  %v2967_v48 = vadd.f32 %v2966_v58, %v2704_v42  ;;  %v7230_v42 = vld [vmem:[%s9950_s6 + $0x50] ss:$12 sps:$4 sm:$0xff]   ;;  %v7231_v58 = vld [vmem:[%s9950_s6 + $0x38] ss:$12 sps:$4 sm:$0xff]   ;;  %v7232_v24 = vld [vmem:[%s9950_s6 + $0x20] ss:$12 sps:$4 sm:$0xff]  }
 0xa4d   :  { %v3172_v61 = vpop.f32.mrf.mxu0  ;;  %v7233_v33 = vld [vmem:[%s9950_s6 + $0x8] ss:$12 sps:$4 sm:$0xff]  }
 0xa4e   :  { %v6790_v0 = vpop.f32.mrf.mxu1  ;;  %7452 = vtanh.f32 %v2967_v48  ;;  %v7235_v48 = vld [vmem:[%s9951_s7 + $0x98] ss:$12 sps:$4 sm:$0xff]   ;;  %v7238_v61 = vld [vmem:[%s9951_s7 + $0x50] ss:$12 sps:$4 sm:$0xff]  }
 0xa4f   :  { %7454 = vrcp.f32 %v2962_v52  ;;  %v7236_v52 = vld [vmem:[%s9951_s7 + $0x80] ss:$12 sps:$4 sm:$0xff]   ;;  %v7239_v0 = vld [vmem:[%s9951_s7 + $0x38] ss:$12 sps:$4 sm:$0xff]  }
 0xa5b   :  { %v7453_v36 = vpop.eup %7452 }
 0xa5c   :  { %v2969_v3 = vsub.f32 %v8924_v62, %v7453_v36  ;;  %v7455_v12 = vpop.eup %7454 }
 0xa5e   :  { %v2970_v27 = vmul.f32 %v7455_v12, %v2969_v3  ;;  %v7241_v3 = vld [vmem:[%s9951_s7 + $0x8] ss:$12 sps:$4 sm:$0xff]   ;;  %v3168_v12 = vadd.f32 %v9191_v46, %v8768_v28 }
 0xa60   :  { %v9201_v22 = vadd.f32 %v7453_v36, %v2970_v27  ;;  %v7240_v36 = vld [vmem:[%s9951_s7 + $0x20] ss:$12 sps:$4 sm:$0xff]  }
 0xa62   :  { %v3214_v13 = vpack.c.bf16 %v9201_v22, %v9201_v22 }
 0xa64   :  { %3408 = vmatmul.mubr.bf16.vlgmr.msra.gmra.mxu0 %v3214_v13  ;;  %6808 = vmatmul.mubr.bf16.vlgmr.msra.gmra.mxu1 %v3214_v13 }
 0xa65   :  { %3639 = vmatpush1.bf16.msra.mxu0 %v8929_v49  ;;  %6812 = vmatpush3.bf16.msra.mxu1 %v7226_v30 }
 0xa66   :  { %3640 = vmatprep.subr.bf16.mxu0 %v8939_v29  ;;  %6813 = vmatprep.subr.bf16.mxu1 %v9972_v1 }
 0xa67   :  { %3670 = vmatprep.mubr.bf16.mxu0 %v9973_v34  ;;  %6827 = vmatprep.mubr.msk.bf16.mxu1 %vm7560_vm0, %v9972_v1 }
 0xa69   :  { %3641 = vmatpush1.bf16.msra.mxu0 %v8945_v40  ;;  %6814 = vmatpush3.bf16.msra.mxu1 %v7227_v17 }
 0xa6a   :  { %3642 = vmatprep.subr.bf16.mxu0 %v8955_v21  ;;  %6815 = vmatprep.subr.bf16.mxu1 %v9972_v1 }
 0xa6d   :  { %3643 = vmatpush1.bf16.msra.mxu0 %v8964_v25  ;;  %6816 = vmatpush3.bf16.msra.mxu1 %v7228_v60 }
 0xa6e   :  { %3644 = vmatprep.subr.bf16.mxu0 %v8974_v26  ;;  %6817 = vmatprep.subr.bf16.mxu1 %v9972_v1 }
 0xa71   :  { %3645 = vmatpush1.bf16.msra.mxu0 %v8980_v31  ;;  %6818 = vmatpush3.bf16.msra.mxu1 %v7229_v32 }
 0xa72   :  { %3646 = vmatprep.subr.bf16.mxu0 %v8990_v11  ;;  %6819 = vmatprep.subr.bf16.mxu1 %v9972_v1 }
 0xa75   :  { %3647 = vmatpush1.bf16.msra.mxu0 %v8996_v14  ;;  %6820 = vmatpush3.bf16.msra.mxu1 %v7230_v42 }
 0xa76   :  { %3648 = vmatprep.subr.bf16.mxu0 %v9006_v39  ;;  %6821 = vmatprep.subr.bf16.mxu1 %v9972_v1 }
 0xa79   :  { %3649 = vmatpush1.bf16.msra.mxu0 %v9012_v20  ;;  %6822 = vmatpush3.bf16.msra.mxu1 %v7231_v58 }
 0xa7a   :  { %3650 = vmatprep.subr.bf16.mxu0 %v9022_v35  ;;  %6823 = vmatprep.subr.bf16.mxu1 %v9972_v1 }
 0xa7d   :  { %3651 = vmatpush1.bf16.msra.mxu0 %v9028_v41  ;;  %6824 = vmatpush3.bf16.msra.mxu1 %v7232_v24 }
 0xa7e   :  { %3652 = vmatprep.subr.bf16.mxu0 %v9038_v38  ;;  %6825 = vmatprep.subr.bf16.mxu1 %v9972_v1 }
 0xa81   :  { %3653 = vmatpush1.bf16.msra.mxu0 %v9044_v50  ;;  %6826 = vmatpush3.bf16.msra.mxu1 %v7233_v33 }
 0xa82   :  { %3880 = vmatprep.subr.bf16.mxu0 %v9061_v53  ;;  %6831 = vmatprep.subr.bf16.mxu1 %v9972_v1 }
 0xa84   :  { %3671 = vmatmul.mubr.bf16.vlgmr.msra.gmra.mxu0 %v8226_v2  ;;  %6828 = vmatmul.mubr.bf16.vlgmr.msra.gmra.mxu1 %v8226_v2  ;;  %v7234_v2 = vld [vmem:[%s9951_s7 + $0xb0] ss:$12 sps:$4 sm:$0xff]  }
 0xa85   :  { %3881 = vmatpush1.bf16.msra.mxu0 %v9066_v5  ;;  %3912 = vmatprep.mubr.bf16.mxu0 %v9973_v34 }
 0xa86   :  { %3882 = vmatprep.subr.bf16.mxu0 %v9076_v45  ;;  %6847 = vmatprep.mubr.msk.bf16.mxu1 %vm7560_vm0, %v9972_v1 }
 0xa87   :  { %6832 = vmatpush3.bf16.msra.mxu1 %v7234_v2  ;;  %v3170_v2 = vadd.f32 %v9196_v18, %v8776_v63  ;;  %v3209_v18 = vadd.f32 %v9193_v6, %v8786_v59  ;;  %v7242_v6 = vld [vmem:[%s9950_s6 + $0xb0] ss:$12 sps:$4 sm:$0xff]  }
 0xa88   :  { %6833 = vmatprep.subr.bf16.mxu1 %v9972_v1 }
 0xa89   :  { %3883 = vmatpush1.bf16.msra.mxu0 %v9082_v37 }
 0xa8a   :  { %3884 = vmatprep.subr.bf16.mxu0 %v9092_v57 }
 0xa8b   :  { %6834 = vmatpush3.bf16.msra.mxu1 %v7235_v48 }
 0xa8c   :  { %6835 = vmatprep.subr.bf16.mxu1 %v9972_v1 }
 0xa8d   :  { %3885 = vmatpush1.bf16.msra.mxu0 %v9098_v4 }
 0xa8e   :  { %3886 = vmatprep.subr.bf16.mxu0 %v9113_v54 }
 0xa8f   :  { %6836 = vmatpush3.bf16.msra.mxu1 %v7236_v52 }
 0xa90   :  { %6837 = vmatprep.subr.bf16.mxu1 %v9972_v1 }
 0xa91   :  { %3887 = vmatpush1.bf16.msra.mxu0 %v9108_v51 }
 0xa92   :  { %3888 = vmatprep.subr.bf16.mxu0 %v9122_v56 }
 0xa95   :  { %3889 = vmatpush1.bf16.msra.mxu0 %v9129_v23 }
 0xa96   :  { %3890 = vmatprep.subr.bf16.mxu0 %v9139_v47 }
 0xa99   :  { %3891 = vmatpush1.bf16.msra.mxu0 %v9145_v9 }
 0xa9a   :  { %3892 = vmatprep.subr.bf16.mxu0 %v9155_v44 }
 0xa9d   :  { %3893 = vmatpush1.bf16.msra.mxu0 %v9161_v19 }
 0xa9e   :  { %3894 = vmatprep.subr.bf16.mxu0 %v9171_v16 }
 0xaa1   :  { %3895 = vmatpush1.bf16.msra.mxu0 %v9177_v7 }
 0xaa2   :  { %4143 = vmatprep.subr.bf16.mxu0 %v8890_v8  ;;  %v7237_v8 = vld [vmem:[%s9951_s7 + $0x68] ss:$12 sps:$4 sm:$0xff]  }
 0xaa3   :  { %6838 = vmatpush3.bf16.msra.mxu1 %v7237_v8 }
 0xaa4   :  { %6839 = vmatprep.subr.bf16.mxu1 %v9972_v1 }
 0xaa7   :  { %6840 = vmatpush3.bf16.msra.mxu1 %v7238_v61 }
 0xaa8   :  { %6841 = vmatprep.subr.bf16.mxu1 %v9972_v1 }
 0xaab   :  { %6842 = vmatpush3.bf16.msra.mxu1 %v7239_v0 }
 0xaac   :  { %6843 = vmatprep.subr.bf16.mxu1 %v9972_v1 }
 0xaaf   :  { %6844 = vmatpush3.bf16.msra.mxu1 %v7240_v36 }
 0xab0   :  { %6845 = vmatprep.subr.bf16.mxu1 %v9972_v1 }
 0xab3   :  { %6846 = vmatpush3.bf16.msra.mxu1 %v7241_v3 }
 0xab4   :  { %6851 = vmatprep.subr.bf16.mxu1 %v9972_v1 }
 0xb24   :  { %v3409_v27 = vpop.f32.mrf.mxu0  ;;  %v3450_v30 = vpop.f32.mrf.mxu1 }
 0xb25   :  { %v3456_v13 = vadd.f32 %v3409_v27, %v3168_v12  ;;  %v3470_v3 = vadd.f32 %v8782_v55, %v3450_v30 }
 0xb26   :  { %v3411_v17 = vpop.f32.mrf.mxu0  ;;  %v6809_v60 = vpop.f32.mrf.mxu1 }
 0xb27   :  { %v6016_v32 = vmul.f32 -1.442695, %v3456_v13  ;;  %v3463_v48 = vadd.f32 %v3411_v17, %v3170_v2 }
 0xb28   :  { %v3413_v42 = vpop.f32.mrf.mxu0  ;;  %v3453_v58 = vpop.f32.mrf.mxu1 }
 0xb29   :  { %7456 = vpow2.f32 %v6016_v32  ;;  %v6017_v52 = vmul.f32 -1.442695, %v3463_v48 }
 0xb2a   :  { %v3414_v24 = vpop.f32.mrf.mxu0  ;;  %v6810_v33 = vpop.f32.mrf.mxu1 }
 0xb2b   :  { %7458 = vpow2.f32 %v6017_v52 }
 0xb36   :  { %v7457_v8 = vpop.eup %7456 }
 0xb37   :  { %v3460_v61 = vadd.f32 1.0, %v7457_v8 }
 0xb38   :  { %v7459_v36 = vpop.eup %7458 }
 0xb39   :  { %7460 = vrcp.f32 %v3460_v61  ;;  %v3467_v58 = vadd.f32 1.0, %v7459_v36  ;;  %v7243_v61 = vld [vmem:[%s9950_s6 + $0x98] ss:$12 sps:$4 sm:$0xff]  }
 0xb44   :  { %v9313_v46 = vpop.f32.mrf.mxu0  ;;  %v9315_v0 = vpop.f32.mrf.mxu1 }
 0xb46   :  { %v7461_v12 = vpop.eup %7460  ;;  %v9318_v27 = vpop.f32.mrf.mxu0 }
 0xb47   :  { %v6829_v13 = vpop.f32.mrf.mxu1  ;;  %v3471_v17 = vmul.f32 %v7461_v12, %v3470_v3  ;;  %v9447_v3 = vld [vmem:[%s9954_s9] ss:$0 sm:$0xff] }
 0xb48   :  { %v3676_v60 = vpop.f32.mrf.mxu0 }
 0xb49   :  { %v3716_v32 = vpop.f32.mrf.mxu1  ;;  %v3472_v42 = vadd.f32 %v3471_v17, %v3209_v18  ;;  %v3714_v17 = vadd.f32 %v9315_v0, %v8786_v59  ;;  %v9460_v0 = vld [vmem:[%s9950_s6 + $0xa8] ss:$12 sps:$4 sm:$0xff]  }
 0xb4a   :  { %v3677_v24 = vpop.f32.mrf.mxu0 }
 0xb4b   :  { %v6830_v33 = vpop.f32.mrf.mxu1  ;;  %7462 = vtanh.f32 %v3472_v42 }
 0xb4c   :  { %7464 = vrcp.f32 %v3467_v58 }
 0xb58   :  { %v7463_v2 = vpop.eup %7462 }
 0xb59   :  { %v3474_v48 = vsub.f32 %v9201_v22, %v7463_v2  ;;  %v7465_v55 = vpop.eup %7464 }
 0xb5b   :  { %v3475_v30 = vmul.f32 %v7465_v55, %v3474_v48 }
 0xb5d   :  { %v9323_v52 = vadd.f32 %v7463_v2, %v3475_v30 }
 0xb5f   :  { %v3719_v8 = vpack.c.bf16 %v9323_v52, %v9323_v52 }
 0xb61   :  { %3913 = vmatmul.mubr.bf16.vlgmr.msra.gmra.mxu0 %v3719_v8  ;;  %6848 = vmatmul.mubr.bf16.vlgmr.msra.gmra.mxu1 %v3719_v8 }
 0xb62   :  { %4144 = vmatpush1.bf16.msra.mxu0 %v8929_v49  ;;  %6852 = vmatpush3.bf16.msra.mxu1 %v7242_v6  ;;  %v7244_v49 = vld [vmem:[%s9950_s6 + $0x80] ss:$12 sps:$4 sm:$0xff]  }
 0xb63   :  { %4145 = vmatprep.subr.bf16.mxu0 %v8939_v29  ;;  %6853 = vmatprep.subr.bf16.mxu1 %v9972_v1  ;;  %v7245_v29 = vld [vmem:[%s9950_s6 + $0x68] ss:$12 sps:$4 sm:$0xff]  }
 0xb64   :  { %4175 = vmatprep.mubr.bf16.mxu0 %v9973_v34  ;;  %6867 = vmatprep.mubr.msk.bf16.mxu1 %vm7560_vm0, %v9972_v1 }
 0xb66   :  { %4146 = vmatpush1.bf16.msra.mxu0 %v8945_v40  ;;  %6854 = vmatpush3.bf16.msra.mxu1 %v7243_v61  ;;  %v7246_v40 = vld [vmem:[%s9950_s6 + $0x50] ss:$12 sps:$4 sm:$0xff]  }
 0xb67   :  { %4147 = vmatprep.subr.bf16.mxu0 %v8955_v21  ;;  %6855 = vmatprep.subr.bf16.mxu1 %v9972_v1  ;;  %v7247_v21 = vld [vmem:[%s9950_s6 + $0x38] ss:$12 sps:$4 sm:$0xff]   ;;  %v7261_v61 = vld [vmem:[%s9950_s6 + $0xb0] ss:$12 sps:$4 sm:$0xff]  }
 0xb6a   :  { %4148 = vmatpush1.bf16.msra.mxu0 %v8964_v25  ;;  %6856 = vmatpush3.bf16.msra.mxu1 %v7244_v49  ;;  %v7248_v25 = vld [vmem:[%s9950_s6 + $0x20] ss:$12 sps:$4 sm:$0xff]  }
 0xb6b   :  { %4149 = vmatprep.subr.bf16.mxu0 %v8974_v26  ;;  %6857 = vmatprep.subr.bf16.mxu1 %v9972_v1  ;;  %v7249_v26 = vld [vmem:[%s9950_s6 + $0x8] ss:$12 sps:$4 sm:$0xff]  }
 0xb6e   :  { %4150 = vmatpush1.bf16.msra.mxu0 %v8980_v31  ;;  %6858 = vmatpush3.bf16.msra.mxu1 %v7245_v29  ;;  %v7251_v31 = vld [vmem:[%s9951_s7 + $0x98] ss:$12 sps:$4 sm:$0xff]   ;;  %v9470_v29 = vld [vmem:[%s9950_s6 + $0x94] ss:$12 sps:$4 sm:$0xff]  }
 0xb6f   :  { %4151 = vmatprep.subr.bf16.mxu0 %v8990_v11  ;;  %6859 = vmatprep.subr.bf16.mxu1 %v9972_v1  ;;  %v7252_v11 = vld [vmem:[%s9951_s7 + $0x80] ss:$12 sps:$4 sm:$0xff]  }
 0xb72   :  { %4152 = vmatpush1.bf16.msra.mxu0 %v8996_v14  ;;  %6860 = vmatpush3.bf16.msra.mxu1 %v7246_v40  ;;  %v7253_v14 = vld [vmem:[%s9951_s7 + $0x68] ss:$12 sps:$4 sm:$0xff]   ;;  %v9476_v40 = vld [vmem:[%s9950_s6 + $0x90] ss:$12 sps:$4 sm:$0xff]  }
 0xb73   :  { %4153 = vmatprep.subr.bf16.mxu0 %v9006_v39  ;;  %6861 = vmatprep.subr.bf16.mxu1 %v9972_v1  ;;  %v9416_v39 = vld [vmem:[%s9950_s6 + $0xac] ss:$12 sps:$4 sm:$0xff]  }
 0xb76   :  { %4154 = vmatpush1.bf16.msra.mxu0 %v9012_v20  ;;  %6862 = vmatpush3.bf16.msra.mxu1 %v7247_v21  ;;  %v7254_v20 = vld [vmem:[%s9951_s7 + $0x50] ss:$12 sps:$4 sm:$0xff]   ;;  %v7265_v21 = vld [vmem:[%s9950_s6 + $0x98] ss:$12 sps:$4 sm:$0xff]  }
 0xb77   :  { %4155 = vmatprep.subr.bf16.mxu0 %v9022_v35  ;;  %6863 = vmatprep.subr.bf16.mxu1 %v9972_v1  ;;  %v7255_v35 = vld [vmem:[%s9951_s7 + $0x38] ss:$12 sps:$4 sm:$0xff]  }
 0xb7a   :  { %4156 = vmatpush1.bf16.msra.mxu0 %v9028_v41  ;;  %6864 = vmatpush3.bf16.msra.mxu1 %v7248_v25  ;;  %v7256_v41 = vld [vmem:[%s9951_s7 + $0x20] ss:$12 sps:$4 sm:$0xff]   ;;  %v9486_v25 = vld [vmem:[%s9950_s6 + $0x7c] ss:$12 sps:$4 sm:$0xff]  }
 0xb7b   :  { %4157 = vmatprep.subr.bf16.mxu0 %v9038_v38  ;;  %6865 = vmatprep.subr.bf16.mxu1 %v9972_v1  ;;  %v7257_v38 = vld [vmem:[%s9951_s7 + $0x8] ss:$12 sps:$4 sm:$0xff]  }
 0xb7e   :  { %4158 = vmatpush1.bf16.msra.mxu0 %v9044_v50  ;;  %6866 = vmatpush3.bf16.msra.mxu1 %v7249_v26  ;;  %v3673_v50 = vadd.f32 %v9313_v46, %v8768_v28  ;;  %v9495_v26 = vld [vmem:[%s9950_s6 + $0x78] ss:$12 sps:$4 sm:$0xff]  }
 0xb7f   :  { %4385 = vmatprep.subr.bf16.mxu0 %v9061_v53  ;;  %6871 = vmatprep.subr.bf16.mxu1 %v9972_v1 }
 0xb81   :  { %4176 = vmatmul.mubr.bf16.vlgmr.msra.gmra.mxu0 %v8324_v10  ;;  %6868 = vmatmul.mubr.bf16.vlgmr.msra.gmra.mxu1 %v8324_v10  ;;  %v7250_v10 = vld [vmem:[%s9951_s7 + $0xb0] ss:$12 sps:$4 sm:$0xff]  }
 0xb82   :  { %4386 = vmatpush1.bf16.msra.mxu0 %v9066_v5  ;;  %4417 = vmatprep.mubr.bf16.mxu0 %v9973_v34 }
 0xb83   :  { %4387 = vmatprep.subr.bf16.mxu0 %v9076_v45  ;;  %6887 = vmatprep.mubr.msk.bf16.mxu1 %vm7560_vm0, %v9972_v1 }
 0xb84   :  { %6872 = vmatpush3.bf16.msra.mxu1 %v7250_v10  ;;  %v7269_v10 = vld [vmem:[%s9950_s6 + $0x80] ss:$12 sps:$4 sm:$0xff]  }
 0xb85   :  { %6873 = vmatprep.subr.bf16.mxu1 %v9972_v1 }
 0xb86   :  { %4388 = vmatpush1.bf16.msra.mxu0 %v9082_v37 }
 0xb87   :  { %4389 = vmatprep.subr.bf16.mxu0 %v9092_v57 }
 0xb88   :  { %6874 = vmatpush3.bf16.msra.mxu1 %v7251_v31  ;;  %v9505_v31 = vld [vmem:[%s9950_s6 + $0x64] ss:$12 sps:$4 sm:$0xff]  }
 0xb89   :  { %6875 = vmatprep.subr.bf16.mxu1 %v9972_v1 }
 0xb8a   :  { %4390 = vmatpush1.bf16.msra.mxu0 %v9098_v4 }
 0xb8b   :  { %4391 = vmatprep.subr.bf16.mxu0 %v9113_v54 }
 0xb8c   :  { %6876 = vmatpush3.bf16.msra.mxu1 %v7252_v11  ;;  %v9511_v11 = vld [vmem:[%s9950_s6 + $0x60] ss:$12 sps:$4 sm:$0xff]  }
 0xb8d   :  { %6877 = vmatprep.subr.bf16.mxu1 %v9972_v1 }
 0xb8e   :  { %4392 = vmatpush1.bf16.msra.mxu0 %v9108_v51 }
 0xb8f   :  { %4393 = vmatprep.subr.bf16.mxu0 %v9122_v56 }
 0xb90   :  { %6878 = vmatpush3.bf16.msra.mxu1 %v7253_v14  ;;  %v7273_v14 = vld [vmem:[%s9950_s6 + $0x68] ss:$12 sps:$4 sm:$0xff]  }
 0xb91   :  { %6879 = vmatprep.subr.bf16.mxu1 %v9972_v1 }
 0xb92   :  { %4394 = vmatpush1.bf16.msra.mxu0 %v9129_v23 }
 0xb93   :  { %4395 = vmatprep.subr.bf16.mxu0 %v9139_v47  ;;  %v3675_v47 = vadd.f32 %v9318_v27, %v8776_v63 }
 0xb94   :  { %6880 = vmatpush3.bf16.msra.mxu1 %v7254_v20  ;;  %v9521_v20 = vld [vmem:[%s9950_s6 + $0x4c] ss:$12 sps:$4 sm:$0xff]  }
 0xb95   :  { %6881 = vmatprep.subr.bf16.mxu1 %v9972_v1 }
 0xb96   :  { %4396 = vmatpush1.bf16.msra.mxu0 %v9145_v9 }
 0xb97   :  { %4397 = vmatprep.subr.bf16.mxu0 %v9155_v44 }
 0xb98   :  { %6882 = vmatpush3.bf16.msra.mxu1 %v7255_v35  ;;  %v9527_v35 = vld [vmem:[%s9950_s6 + $0x48] ss:$12 sps:$4 sm:$0xff]  }
 0xb99   :  { %6883 = vmatprep.subr.bf16.mxu1 %v9972_v1 }
 0xb9a   :  { %4398 = vmatpush1.bf16.msra.mxu0 %v9161_v19 }
 0xb9b   :  { %4399 = vmatprep.subr.bf16.mxu0 %v9171_v16 }
 0xb9c   :  { %6884 = vmatpush3.bf16.msra.mxu1 %v7256_v41  ;;  %v7277_v41 = vld [vmem:[%s9950_s6 + $0x50] ss:$12 sps:$4 sm:$0xff]  }
 0xb9d   :  { %6885 = vmatprep.subr.bf16.mxu1 %v9972_v1 }
 0xb9e   :  { %4400 = vmatpush1.bf16.msra.mxu0 %v9177_v7 }
 0xb9f   :  { %4648 = vmatprep.subr.bf16.mxu0 %v9416_v39 }
 0xba0   :  { %6886 = vmatpush3.bf16.msra.mxu1 %v7257_v38  ;;  %v9537_v38 = vld [vmem:[%s9950_s6 + $0x34] ss:$12 sps:$4 sm:$0xff]  }
 0xba1   :  { %6891 = vmatprep.subr.bf16.mxu1 %v9972_v1 }
 0xc21   :  { %v3914_v53 = vpop.f32.mrf.mxu0  ;;  %v3955_v5 = vpop.f32.mrf.mxu1 }
 0xc22   :  { %v3961_v45 = vadd.f32 %v3914_v53, %v3673_v50  ;;  %v3975_v12 = vadd.f32 %v9447_v3, %v3955_v5  ;;  %v9543_v50 = vld [vmem:[%s9950_s6 + $0x30] ss:$12 sps:$4 sm:$0xff]   ;;  %v7281_v53 = vld [vmem:[%s9950_s6 + $0x38] ss:$12 sps:$4 sm:$0xff]  }
 0xc23   :  { %v3916_v37 = vpop.f32.mrf.mxu0  ;;  %v6849_v57 = vpop.f32.mrf.mxu1  ;;  %v9553_v5 = vld [vmem:[%s9950_s6 + $0x1c] ss:$12 sps:$4 sm:$0xff]  }
 0xc24   :  { %v6066_v4 = vmul.f32 -1.442695, %v3961_v45  ;;  %v3968_v9 = vadd.f32 %v3916_v37, %v3675_v47  ;;  %v9559_v45 = vld [vmem:[%s9950_s6 + $0x18] ss:$12 sps:$4 sm:$0xff]   ;;  %v7285_v37 = vld [vmem:[%s9950_s6 + $0x20] ss:$12 sps:$4 sm:$0xff]  }
 0xc25   :  { %v3918_v51 = vpop.f32.mrf.mxu0  ;;  %v3958_v54 = vpop.f32.mrf.mxu1  ;;  %v9569_v57 = vld [vmem:[%s9950_s6 + $0x4] ss:$12 sps:$4 sm:$0xff]  }
 0xc26   :  { %7466 = vpow2.f32 %v6066_v4  ;;  %v6067_v44 = vmul.f32 -1.442695, %v3968_v9  ;;  %v9575_v4 = vld [vmem:[%s9950_s6] ss:$12 sps:$4 sm:$0xff]   ;;  %v7289_v51 = vld [vmem:[%s9950_s6 + $0x8] ss:$12 sps:$4 sm:$0xff]  }
 0xc27   :  { %v3919_v56 = vpop.f32.mrf.mxu0  ;;  %v6850_v23 = vpop.f32.mrf.mxu1  ;;  %v9592_v54 = vld [vmem:[%s9951_s7 + $0xac] ss:$12 sps:$4 sm:$0xff]   ;;  %v9613_v47 = vld [vmem:[%s9951_s7 + $0x90] ss:$12 sps:$4 sm:$0xff]  }
 0xc28   :  { %7468 = vpow2.f32 %v6067_v44  ;;  %v9597_v56 = vld [vmem:[%s9951_s7 + $0xa8] ss:$12 sps:$4 sm:$0xff]   ;;  %v7293_v23 = vld [vmem:[%s9951_s7 + $0xb0] ss:$12 sps:$4 sm:$0xff]   ;;  %v7297_v9 = vld [vmem:[%s9951_s7 + $0x98] ss:$12 sps:$4 sm:$0xff]  }
 0xc29   :  { %v9623_v44 = vld [vmem:[%s9951_s7 + $0x7c] ss:$12 sps:$4 sm:$0xff]  }
 0xc33   :  { %v7467_v19 = vpop.eup %7466 }
 0xc34   :  { %v3965_v16 = vadd.f32 1.0, %v7467_v19  ;;  %v9629_v19 = vld [vmem:[%s9951_s7 + $0x78] ss:$12 sps:$4 sm:$0xff]  }
 0xc35   :  { %v7469_v36 = vpop.eup %7468 }
 0xc36   :  { %7470 = vrcp.f32 %v3965_v16  ;;  %v3972_v24 = vadd.f32 1.0, %v7469_v36  ;;  %v7301_v16 = vld [vmem:[%s9951_s7 + $0x80] ss:$12 sps:$4 sm:$0xff]  }
 0xc37   :  { %v9639_v36 = vld [vmem:[%s9951_s7 + $0x60] ss:$12 sps:$4 sm:$0xff]  }
 0xc41   :  { %v9440_v7 = vpop.f32.mrf.mxu0  ;;  %v9442_v46 = vpop.f32.mrf.mxu1 }
 0xc43   :  { %v7471_v13 = vpop.eup %7470  ;;  %v9450_v27 = vpop.f32.mrf.mxu0 }
 0xc44   :  { %v6869_v18 = vpop.f32.mrf.mxu1  ;;  %v3976_v60 = vmul.f32 %v7471_v13, %v3975_v12  ;;  %v9644_v12 = vld [vmem:[%s9951_s7 + $0x64] ss:$12 sps:$4 sm:$0xff]   ;;  %v7305_v13 = vld [vmem:[%s9951_s7 + $0x68] ss:$12 sps:$4 sm:$0xff]  }
 0xc45   :  { %v4181_v32 = vpop.f32.mrf.mxu0  ;;  %v9653_v18 = vld [vmem:[%s9951_s7 + $0x4c] ss:$12 sps:$4 sm:$0xff]  }
 0xc46   :  { %v4221_v42 = vpop.f32.mrf.mxu1  ;;  %v3977_v58 = vadd.f32 %v3976_v60, %v3714_v17  ;;  %v9660_v17 = vld [vmem:[%s9951_s7 + $0x48] ss:$12 sps:$4 sm:$0xff]   ;;  %v7309_v60 = vld [vmem:[%s9951_s7 + $0x50] ss:$12 sps:$4 sm:$0xff]  }
 0xc47   :  { %v4182_v33 = vpop.f32.mrf.mxu0  ;;  %v9670_v32 = vld [vmem:[%s9951_s7 + $0x34] ss:$12 sps:$4 sm:$0xff]   ;;  %v9676_v42 = vld [vmem:[%s9951_s7 + $0x30] ss:$12 sps:$4 sm:$0xff]  }
 0xc48   :  { %v6870_v2 = vpop.f32.mrf.mxu1  ;;  %7472 = vtanh.f32 %v3977_v58  ;;  %v7313_v58 = vld [vmem:[%s9951_s7 + $0x38] ss:$12 sps:$4 sm:$0xff]  }
 0xc49   :  { %7474 = vrcp.f32 %v3972_v24  ;;  %v9686_v24 = vld [vmem:[%s9951_s7 + $0x1c] ss:$12 sps:$4 sm:$0xff]   ;;  %v9692_v33 = vld [vmem:[%s9951_s7 + $0x18] ss:$12 sps:$4 sm:$0xff]   ;;  %v7317_v2 = vld [vmem:[%s9951_s7 + $0x20] ss:$12 sps:$4 sm:$0xff]  }
 0xc55   :  { %v7473_v48 = vpop.eup %7472 }
 0xc56   :  { %v3979_v55 = vsub.f32 %v9323_v52, %v7473_v48  ;;  %v7475_v30 = vpop.eup %7474 }
 0xc58   :  { %v3980_v6 = vmul.f32 %v7475_v30, %v3979_v55  ;;  %v9708_v55 = vld [vmem:[%s9951_s7] ss:$12 sps:$4 sm:$0xff]   ;;  %v7321_v30 = vld [vmem:[%s9951_s7 + $0x8] ss:$12 sps:$4 sm:$0xff]  }
 0xc5a   :  { %v9455_v8 = vadd.f32 %v7473_v48, %v3980_v6  ;;  %v9702_v48 = vld [vmem:[%s9951_s7 + $0x4] ss:$12 sps:$4 sm:$0xff]   ;;  %v4178_v6 = vadd.f32 %v9440_v7, %v8768_v28 }
 0xc5c   :  { %v4224_v49 = vpack.c.bf16 %v9455_v8, %v9455_v8 }
 0xc5e   :  { %4418 = vmatmul.mubr.bf16.vlgmr.msra.gmra.mxu0 %v4224_v49  ;;  %6888 = vmatmul.mubr.bf16.vlgmr.msra.gmra.mxu1 %v4224_v49 }
 0xc5f   :  { %4649 = vmatpush1.bf16.msra.mxu0 %v9460_v0  ;;  %6892 = vmatpush3.bf16.msra.mxu1 %v7261_v61 }
 0xc60   :  { %4650 = vmatprep.subr.bf16.mxu0 %v9470_v29  ;;  %6893 = vmatprep.subr.bf16.mxu1 %v9972_v1 }
 0xc61   :  { %4680 = vmatprep.mubr.bf16.mxu0 %v9973_v34  ;;  %6907 = vmatprep.mubr.msk.bf16.mxu1 %vm7560_vm0, %v9972_v1 }
 0xc63   :  { %4651 = vmatpush1.bf16.msra.mxu0 %v9476_v40  ;;  %6894 = vmatpush3.bf16.msra.mxu1 %v7265_v21 }
 0xc64   :  { %4652 = vmatprep.subr.bf16.mxu0 %v9486_v25  ;;  %6895 = vmatprep.subr.bf16.mxu1 %v9972_v1 }
 0xc67   :  { %4653 = vmatpush1.bf16.msra.mxu0 %v9495_v26  ;;  %6896 = vmatpush3.bf16.msra.mxu1 %v7269_v10 }
 0xc68   :  { %4654 = vmatprep.subr.bf16.mxu0 %v9505_v31  ;;  %6897 = vmatprep.subr.bf16.mxu1 %v9972_v1 }
 0xc6b   :  { %4655 = vmatpush1.bf16.msra.mxu0 %v9511_v11  ;;  %6898 = vmatpush3.bf16.msra.mxu1 %v7273_v14 }
 0xc6c   :  { %4656 = vmatprep.subr.bf16.mxu0 %v9521_v20  ;;  %6899 = vmatprep.subr.bf16.mxu1 %v9972_v1 }
 0xc6f   :  { %4657 = vmatpush1.bf16.msra.mxu0 %v9527_v35  ;;  %6900 = vmatpush3.bf16.msra.mxu1 %v7277_v41 }
 0xc70   :  { %4658 = vmatprep.subr.bf16.mxu0 %v9537_v38  ;;  %6901 = vmatprep.subr.bf16.mxu1 %v9972_v1 }
 0xc73   :  { %4659 = vmatpush1.bf16.msra.mxu0 %v9543_v50  ;;  %6902 = vmatpush3.bf16.msra.mxu1 %v7281_v53 }
 0xc74   :  { %4660 = vmatprep.subr.bf16.mxu0 %v9553_v5  ;;  %6903 = vmatprep.subr.bf16.mxu1 %v9972_v1 }
 0xc77   :  { %4661 = vmatpush1.bf16.msra.mxu0 %v9559_v45  ;;  %6904 = vmatpush3.bf16.msra.mxu1 %v7285_v37 }
 0xc78   :  { %4662 = vmatprep.subr.bf16.mxu0 %v9569_v57  ;;  %6905 = vmatprep.subr.bf16.mxu1 %v9972_v1 }
 0xc7b   :  { %4663 = vmatpush1.bf16.msra.mxu0 %v9575_v4  ;;  %6906 = vmatpush3.bf16.msra.mxu1 %v7289_v51 }
 0xc7c   :  { %6911 = vmatprep.subr.bf16.mxu1 %v9972_v1  ;;  %4890 = vmatprep.subr.bf16.mxu0 %v9592_v54 }
 0xc7e   :  { %4681 = vmatmul.mubr.bf16.vlgmr.msra.gmra.mxu0 %v8390_v43  ;;  %6908 = vmatmul.mubr.bf16.vlgmr.msra.gmra.mxu1 %v8390_v43  ;;  %v9607_v43 = vld [vmem:[%s9951_s7 + $0x94] ss:$12 sps:$4 sm:$0xff]  }
 0xc7f   :  { %4922 = vmatprep.mubr.bf16.mxu0 %v9973_v34  ;;  %6927 = vmatprep.mubr.msk.bf16.mxu1 %vm7560_vm0, %v9972_v1 }
 0xc80   :  { %4891 = vmatpush1.bf16.msra.mxu0 %v9597_v56  ;;  %6912 = vmatpush3.bf16.msra.mxu1 %v7293_v23 }
 0xc81   :  { %6913 = vmatprep.subr.bf16.mxu1 %v9972_v1  ;;  %4892 = vmatprep.subr.bf16.mxu0 %v9607_v43 }
 0xc84   :  { %4893 = vmatpush1.bf16.msra.mxu0 %v9613_v47  ;;  %6914 = vmatpush3.bf16.msra.mxu1 %v7297_v9  ;;  %v4180_v9 = vadd.f32 %v9450_v27, %v8776_v63  ;;  %v4219_v27 = vadd.f32 %v9442_v46, %v8786_v59  ;;  %v7322_v46 = vld [vmem:[%s9950_s6 + $0xb0] ss:$12 sps:$4 sm:$0xff]  }
 0xc85   :  { %6915 = vmatprep.subr.bf16.mxu1 %v9972_v1  ;;  %4894 = vmatprep.subr.bf16.mxu0 %v9623_v44 }
 0xc88   :  { %4895 = vmatpush1.bf16.msra.mxu0 %v9629_v19  ;;  %6916 = vmatpush3.bf16.msra.mxu1 %v7301_v16 }
 0xc89   :  { %6917 = vmatprep.subr.bf16.mxu1 %v9972_v1  ;;  %4896 = vmatprep.subr.bf16.mxu0 %v9644_v12 }
 0xc8c   :  { %4897 = vmatpush1.bf16.msra.mxu0 %v9639_v36  ;;  %6918 = vmatpush3.bf16.msra.mxu1 %v7305_v13 }
 0xc8d   :  { %4898 = vmatprep.subr.bf16.mxu0 %v9653_v18  ;;  %6919 = vmatprep.subr.bf16.mxu1 %v9972_v1 }
 0xc90   :  { %4899 = vmatpush1.bf16.msra.mxu0 %v9660_v17  ;;  %6920 = vmatpush3.bf16.msra.mxu1 %v7309_v60 }
 0xc91   :  { %4900 = vmatprep.subr.bf16.mxu0 %v9670_v32  ;;  %6921 = vmatprep.subr.bf16.mxu1 %v9972_v1 }
 0xc94   :  { %4901 = vmatpush1.bf16.msra.mxu0 %v9676_v42  ;;  %6922 = vmatpush3.bf16.msra.mxu1 %v7313_v58 }
 0xc95   :  { %4902 = vmatprep.subr.bf16.mxu0 %v9686_v24  ;;  %6923 = vmatprep.subr.bf16.mxu1 %v9972_v1 }
 0xc98   :  { %4903 = vmatpush1.bf16.msra.mxu0 %v9692_v33  ;;  %6924 = vmatpush3.bf16.msra.mxu1 %v7317_v2 }
 0xc99   :  { %4904 = vmatprep.subr.bf16.mxu0 %v9702_v48  ;;  %6925 = vmatprep.subr.bf16.mxu1 %v9972_v1 }
 0xc9c   :  { %4905 = vmatpush1.bf16.msra.mxu0 %v9708_v55  ;;  %6926 = vmatpush3.bf16.msra.mxu1 %v7321_v30 }
 0xc9d   :  { %5154 = vmatprep.subr.bf16.mxu0 %v9416_v39  ;;  %6931 = vmatprep.subr.bf16.mxu1 %v9972_v1 }
 0xd1e   :  { %v4419_v61 = vpop.f32.mrf.mxu0  ;;  %v4460_v49 = vpop.f32.mrf.mxu1 }
 0xd1f   :  { %v4466_v21 = vadd.f32 %v4419_v61, %v4178_v6  ;;  %v4480_v30 = vadd.f32 %v9447_v3, %v4460_v49 }
 0xd20   :  { %v4421_v10 = vpop.f32.mrf.mxu0  ;;  %v6889_v14 = vpop.f32.mrf.mxu1 }
 0xd21   :  { %v6116_v41 = vmul.f32 -1.442695, %v4466_v21  ;;  %v4473_v39 = vadd.f32 %v4421_v10, %v4180_v9 }
 0xd22   :  { %v4423_v53 = vpop.f32.mrf.mxu0  ;;  %v4463_v37 = vpop.f32.mrf.mxu1 }
 0xd23   :  { %7476 = vpow2.f32 %v6116_v41  ;;  %v6117_v16 = vmul.f32 -1.442695, %v4473_v39 }
 0xd24   :  { %v4424_v51 = vpop.f32.mrf.mxu0  ;;  %v6890_v23 = vpop.f32.mrf.mxu1 }
 0xd25   :  { %7478 = vpow2.f32 %v6117_v16 }
 0xd30   :  { %v7477_v13 = vpop.eup %7476 }
 0xd31   :  { %v4470_v60 = vadd.f32 1.0, %v7477_v13 }
 0xd32   :  { %v7479_v2 = vpop.eup %7478 }
 0xd33   :  { %7480 = vrcp.f32 %v4470_v60  ;;  %v4477_v37 = vadd.f32 1.0, %v7479_v2  ;;  %v7323_v2 = vld [vmem:[%s9950_s6 + $0x98] ss:$12 sps:$4 sm:$0xff]  }
 0xd3e   :  { %v9722_v7 = vpop.f32.mrf.mxu0  ;;  %v9724_v58 = vpop.f32.mrf.mxu1 }
 0xd40   :  { %v7481_v6 = vpop.eup %7480  ;;  %v9727_v61 = vpop.f32.mrf.mxu0 }
 0xd41   :  { %v6909_v21 = vpop.f32.mrf.mxu1  ;;  %v4481_v10 = vmul.f32 %v7481_v6, %v4480_v30 }
 0xd42   :  { %v4686_v14 = vpop.f32.mrf.mxu0 }
 0xd43   :  { %v4726_v41 = vpop.f32.mrf.mxu1  ;;  %v4482_v53 = vadd.f32 %v4481_v10, %v4219_v27 }
 0xd44   :  { %v4687_v51 = vpop.f32.mrf.mxu0  ;;  %v4724_v41 = vadd.f32 %v9724_v58, %v8786_v59  ;;  %v7339_v58 = vld [vmem:[%s9955_s10 + $0x30] sm:$0xff]  }
 0xd45   :  { %v6910_v23 = vpop.f32.mrf.mxu1  ;;  %7482 = vtanh.f32 %v4482_v53 }
 0xd46   :  { %7484 = vrcp.f32 %v4477_v37 }
 0xd52   :  { %v7483_v9 = vpop.eup %7482 }
 0xd53   :  { %v4484_v39 = vsub.f32 %v9455_v8, %v7483_v9  ;;  %v7485_v49 = vpop.eup %7484 }
 0xd55   :  { %v4485_v16 = vmul.f32 %v7485_v49, %v4484_v39 }
 0xd57   :  { %v9732_v13 = vadd.f32 %v7483_v9, %v4485_v16 }
 0xd59   :  { %v4729_v60 = vpack.c.bf16 %v9732_v13, %v9732_v13 }
 0xd5b   :  { %4923 = vmatmul.mubr.bf16.vlgmr.msra.gmra.mxu0 %v4729_v60  ;;  %6928 = vmatmul.mubr.bf16.vlgmr.msra.gmra.mxu1 %v4729_v60 }
 0xd5c   :  { %5155 = vmatpush1.bf16.msra.mxu0 %v9460_v0  ;;  %6932 = vmatpush3.bf16.msra.mxu1 %v7322_v46  ;;  %v7324_v0 = vld [vmem:[%s9950_s6 + $0x80] ss:$12 sps:$4 sm:$0xff]  }
 0xd5d   :  { %5156 = vmatprep.subr.bf16.mxu0 %v9470_v29  ;;  %6933 = vmatprep.subr.bf16.mxu1 %v9972_v1  ;;  %v7325_v29 = vld [vmem:[%s9950_s6 + $0x68] ss:$12 sps:$4 sm:$0xff]  }
 0xd5e   :  { %5186 = vmatprep.mubr.bf16.mxu0 %v9973_v34  ;;  %6947 = vmatprep.mubr.msk.bf16.mxu1 %vm7560_vm0, %v9972_v1 }
 0xd60   :  { %5157 = vmatpush1.bf16.msra.mxu0 %v9476_v40  ;;  %6934 = vmatpush3.bf16.msra.mxu1 %v7323_v2  ;;  %v7326_v40 = vld [vmem:[%s9950_s6 + $0x50] ss:$12 sps:$4 sm:$0xff]  }
 0xd61   :  { %5158 = vmatprep.subr.bf16.mxu0 %v9486_v25  ;;  %6935 = vmatprep.subr.bf16.mxu1 %v9972_v1  ;;  %v7327_v25 = vld [vmem:[%s9950_s6 + $0x38] ss:$12 sps:$4 sm:$0xff]  }
 0xd64   :  { %5159 = vmatpush1.bf16.msra.mxu0 %v9495_v26  ;;  %6936 = vmatpush3.bf16.msra.mxu1 %v7324_v0  ;;  %v7328_v26 = vld [vmem:[%s9950_s6 + $0x20] ss:$12 sps:$4 sm:$0xff]  }
 0xd65   :  { %5160 = vmatprep.subr.bf16.mxu0 %v9505_v31  ;;  %6937 = vmatprep.subr.bf16.mxu1 %v9972_v1  ;;  %v7329_v31 = vld [vmem:[%s9950_s6 + $0x8] ss:$12 sps:$4 sm:$0xff]  }
 0xd68   :  { %5161 = vmatpush1.bf16.msra.mxu0 %v9511_v11  ;;  %6938 = vmatpush3.bf16.msra.mxu1 %v7325_v29  ;;  %v7557_v11 = vld [vmem:[%s9953_s14] sm:$0xff]  ;;  %v5508_v29 = vpack.c.bf16 %v8924_v62, %v8797_v15  ;;  %v7342_v15 = vld [vmem:[%s9955_s10 + $0x18] sm:$0xff]   ;;  %v7343_v62 = vld [vmem:[%s9955_s10 + $0x10] sm:$0xff]  }
 0xd69   :  { %5162 = vmatprep.subr.bf16.mxu0 %v9521_v20  ;;  %6939 = vmatprep.subr.bf16.mxu1 %v9972_v1  ;;  %v4993_v20 = vpack.c.bf16 %v7557_v11, %v7557_v11  ;;  %v5509_v11 = vpack.c.bf16 %v9323_v52, %v9201_v22 }
 0xd6c   :  { %5163 = vmatpush1.bf16.msra.mxu0 %v9527_v35  ;;  %6940 = vmatpush3.bf16.msra.mxu1 %v7326_v40  ;;  %v7331_v35 = vld [vmem:[%s9951_s7 + $0x98] ss:$12 sps:$4 sm:$0xff]   ;;  %v7340_v40 = vld [vmem:[%s9955_s10 + $0x28] sm:$0xff]  }
 0xd6d   :  { %5164 = vmatprep.subr.bf16.mxu0 %v9537_v38  ;;  %6941 = vmatprep.subr.bf16.mxu1 %v9972_v1  ;;  %v7332_v38 = vld [vmem:[%s9951_s7 + $0x80] ss:$12 sps:$4 sm:$0xff]  }
 0xd70   :  { %5165 = vmatpush1.bf16.msra.mxu0 %v9543_v50  ;;  %6942 = vmatpush3.bf16.msra.mxu1 %v7327_v25  ;;  %v7333_v50 = vld [vmem:[%s9951_s7 + $0x68] ss:$12 sps:$4 sm:$0xff]   ;;  %v7341_v25 = vld [vmem:[%s9955_s10 + $0x20] sm:$0xff]  }
 0xd71   :  { %5166 = vmatprep.subr.bf16.mxu0 %v9553_v5  ;;  %6943 = vmatprep.subr.bf16.mxu1 %v9972_v1  ;;  %v7334_v5 = vld [vmem:[%s9951_s7 + $0x50] ss:$12 sps:$4 sm:$0xff]  }
 0xd74   :  { %5167 = vmatpush1.bf16.msra.mxu0 %v9559_v45  ;;  %6944 = vmatpush3.bf16.msra.mxu1 %v7328_v26  ;;  %v7338_v45 = vld [vmem:[%s9955_s10 + $0x38] sm:$0xff]   ;;  %v7344_v26 = vld [vmem:[%s9955_s10 + $0x8] sm:$0xff]  }
 0xd75   :  { %5168 = vmatprep.subr.bf16.mxu0 %v9569_v57  ;;  %6945 = vmatprep.subr.bf16.mxu1 %v9972_v1  ;;  %v7335_v57 = vld [vmem:[%s9951_s7 + $0x38] ss:$12 sps:$4 sm:$0xff]  }
 0xd78   :  { %5169 = vmatpush1.bf16.msra.mxu0 %v9575_v4  ;;  %6946 = vmatpush3.bf16.msra.mxu1 %v7329_v31  ;;  %v7336_v4 = vld [vmem:[%s9951_s7 + $0x20] ss:$12 sps:$4 sm:$0xff]  }
 0xd79   :  { %5396 = vmatprep.subr.bf16.mxu0 %v9592_v54  ;;  %6951 = vmatprep.subr.bf16.mxu1 %v9972_v1  ;;  %v7337_v54 = vld [vmem:[%s9951_s7 + $0x8] ss:$12 sps:$4 sm:$0xff]   ;;  %v7345_v31 = vld [vmem:[%s9955_s10] sm:$0xff]  }
 0xd7b   :  { %5187 = vmatmul.mubr.bf16.vlgmr.msra.gmra.mxu0 %v4993_v20  ;;  %6948 = vmatmul.mubr.bf16.vlgmr.msra.gmra.mxu1 %v4993_v20  ;;  %v5510_v20 = vpack.c.bf16 %v9732_v13, %v9455_v8 }
 0xd7c   :  { %5397 = vmatpush1.bf16.msra.mxu0 %v9597_v56  ;;  %5428 = vmatprep.mubr.bf16.mxu0 %v9973_v34  ;;  %v7330_v34 = vld [vmem:[%s9951_s7 + $0xb0] ss:$12 sps:$4 sm:$0xff]   ;;  %v4683_v56 = vadd.f32 %v9722_v7, %v8768_v28 }
 0xd7d   :  { %5398 = vmatprep.subr.bf16.mxu0 %v9607_v43  ;;  %6967 = vmatprep.mubr.msk.bf16.mxu1 %vm7560_vm0, %v9972_v1 }
 0xd7e   :  { %6952 = vmatpush3.bf16.msra.mxu1 %v7330_v34 }
 0xd7f   :  { %6953 = vmatprep.subr.bf16.mxu1 %v9972_v1 }
 0xd80   :  { %5399 = vmatpush1.bf16.msra.mxu0 %v9613_v47 }
 0xd81   :  { %5400 = vmatprep.subr.bf16.mxu0 %v9623_v44 }
 0xd82   :  { %6954 = vmatpush3.bf16.msra.mxu1 %v7331_v35 }
 0xd83   :  { %6955 = vmatprep.subr.bf16.mxu1 %v9972_v1 }
 0xd84   :  { %5401 = vmatpush1.bf16.msra.mxu0 %v9629_v19 }
 0xd85   :  { %5402 = vmatprep.subr.bf16.mxu0 %v9644_v12 }
 0xd86   :  { %6956 = vmatpush3.bf16.msra.mxu1 %v7332_v38 }
 0xd87   :  { %6957 = vmatprep.subr.bf16.mxu1 %v9972_v1 }
 0xd88   :  { %5403 = vmatpush1.bf16.msra.mxu0 %v9639_v36 }
 0xd89   :  { %5404 = vmatprep.subr.bf16.mxu0 %v9653_v18 }
 0xd8a   :  { %6958 = vmatpush3.bf16.msra.mxu1 %v7333_v50 }
 0xd8b   :  { %6959 = vmatprep.subr.bf16.mxu1 %v9972_v1 }
 0xd8c   :  { %5405 = vmatpush1.bf16.msra.mxu0 %v9660_v17 }
 0xd8d   :  { %5406 = vmatprep.subr.bf16.mxu0 %v9670_v32 }
 0xd8e   :  { %6960 = vmatpush3.bf16.msra.mxu1 %v7334_v5 }
 0xd8f   :  { %6961 = vmatprep.subr.bf16.mxu1 %v9972_v1 }
 0xd90   :  { %5407 = vmatpush1.bf16.msra.mxu0 %v9676_v42 }
 0xd91   :  { %5408 = vmatprep.subr.bf16.mxu0 %v9686_v24  ;;  %v4685_v24 = vadd.f32 %v9727_v61, %v8776_v63 }
 0xd92   :  { %6962 = vmatpush3.bf16.msra.mxu1 %v7335_v57 }
 0xd93   :  { %6963 = vmatprep.subr.bf16.mxu1 %v9972_v1 }
 0xd94   :  { %5409 = vmatpush1.bf16.msra.mxu0 %v9692_v33 }
 0xd95   :  { %5410 = vmatprep.subr.bf16.mxu0 %v9702_v48 }
 0xd96   :  { %6964 = vmatpush3.bf16.msra.mxu1 %v7336_v4 }
 0xd97   :  { %6965 = vmatprep.subr.bf16.mxu1 %v9972_v1 }
 0xd98   :  { %5411 = vmatpush1.bf16.msra.mxu0 %v9708_v55 }
 0xd99   :  { %6971 = vmatprep.subr.bf16.mxu0 %v7338_v45 }
 0xd9a   :  { %6966 = vmatpush3.bf16.msra.mxu1 %v7337_v54 }
 0xe1b   :  { %v4924_v43 = vpop.f32.mrf.mxu0  ;;  %v4965_v47 = vpop.f32.mrf.mxu1 }
 0xe1c   :  { %v4971_v44 = vadd.f32 %v4924_v43, %v4683_v56  ;;  %v4985_v21 = vadd.f32 %v9447_v3, %v4965_v47 }
 0xe1d   :  { %v4926_v19 = vpop.f32.mrf.mxu0  ;;  %v6929_v36 = vpop.f32.mrf.mxu1 }
 0xe1e   :  { %v6166_v12 = vmul.f32 -1.442695, %v4971_v44  ;;  %v4978_v33 = vadd.f32 %v4926_v19, %v4685_v24 }
 0xe1f   :  { %v4928_v18 = vpop.f32.mrf.mxu0  ;;  %v4968_v17 = vpop.f32.mrf.mxu1 }
 0xe20   :  { %7486 = vpow2.f32 %v6166_v12  ;;  %v6167_v1 = vmul.f32 -1.442695, %v4978_v33 }
 0xe21   :  { %v4929_v32 = vpop.f32.mrf.mxu0  ;;  %v6930_v42 = vpop.f32.mrf.mxu1 }
 0xe22   :  { %7488 = vpow2.f32 %v6167_v1 }
 0xe2d   :  { %v7487_v48 = vpop.eup %7486 }
 0xe2e   :  { %v4975_v55 = vadd.f32 1.0, %v7487_v48 }
 0xe2f   :  { %v7489_v6 = vpop.eup %7488 }
 0xe30   :  { %7490 = vrcp.f32 %v4975_v55  ;;  %v4982_v23 = vadd.f32 1.0, %v7489_v6 }
 0xe3b   :  { %v5188_v7 = vpop.f32.mrf.mxu0  ;;  %v9846_v30 = vpop.f32.mrf.mxu1 }
 0xe3c   :  { %v5189_v34 = vadd.f32 %v5188_v7, %v8768_v28  ;;  %v6218_v28 = vld [vmem:[%s9956_s11] ss:$0 sm:$0xff] }
 0xe3d   :  { %v7491_v27 = vpop.eup %7490  ;;  %v5190_v10 = vpop.f32.mrf.mxu0 }
 0xe3e   :  { %v6949_v14 = vpop.f32.mrf.mxu1  ;;  %v4986_v53 = vmul.f32 %v7491_v27, %v4985_v21  ;;  %v5191_v22 = vadd.f32 %v5190_v10, %v8776_v63  ;;  %v5230_v63 = vadd.f32 %v9846_v30, %v8786_v59 }
 0xe3f   :  { %v5192_v61 = vpop.f32.mrf.mxu0 }
 0xe40   :  { %v5232_v37 = vpop.f32.mrf.mxu1  ;;  %v4987_v51 = vadd.f32 %v4986_v53, %v4724_v41 }
 0xe41   :  { %v5193_v9 = vpop.f32.mrf.mxu0 }
 0xe42   :  { %v6950_v39 = vpop.f32.mrf.mxu1  ;;  %7492 = vtanh.f32 %v4987_v51 }
 0xe43   :  { %7494 = vrcp.f32 %v4982_v23 }
 0xe4f   :  { %v7493_v49 = vpop.eup %7492 }
 0xe50   :  { %v4989_v16 = vsub.f32 %v9732_v13, %v7493_v49  ;;  %v7495_v46 = vpop.eup %7494 }
 0xe52   :  { %v4990_v60 = vmul.f32 %v7495_v46, %v4989_v16 }
 0xe54   :  { %v9852_v2 = vadd.f32 %v7493_v49, %v4990_v60 }
 0xe56   :  { %v5235_v0 = vpack.c.bf16 %v9852_v2, %v9852_v2 }
 0xe58   :  { %5429 = vmatmul.mubr.bf16.vlgmr.msra.gmra.mxu0 %v5235_v0  ;;  %6968 = vmatmul.mubr.bf16.vlgmr.msra.gmra.mxu1 %v5235_v0 }
 0xe59   :  { %6972 = vmatpush3.bf16.msra.mxu0 %v7338_v45  ;;  %6987 = vmatprep.mubr.bf16.mxu0 %v5508_v29 }
 0xe5a   :  { %6973 = vmatprep.subr.bf16.mxu0 %v7339_v58 }
 0xe5d   :  { %6974 = vmatpush3.bf16.msra.mxu0 %v7339_v58 }
 0xe5e   :  { %6975 = vmatprep.subr.bf16.mxu0 %v7340_v40 }
 0xe61   :  { %6976 = vmatpush3.bf16.msra.mxu0 %v7340_v40 }
 0xe62   :  { %6977 = vmatprep.subr.bf16.mxu0 %v7341_v25 }
 0xe65   :  { %6978 = vmatpush3.bf16.msra.mxu0 %v7341_v25 }
 0xe66   :  { %6979 = vmatprep.subr.bf16.mxu0 %v7342_v15 }
 0xe69   :  { %6980 = vmatpush3.bf16.msra.mxu0 %v7342_v15 }
 0xe6a   :  { %6981 = vmatprep.subr.bf16.mxu0 %v7343_v62 }
 0xe6d   :  { %6982 = vmatpush3.bf16.msra.mxu0 %v7343_v62 }
 0xe6e   :  { %6983 = vmatprep.subr.bf16.mxu0 %v7344_v26 }
 0xe71   :  { %6984 = vmatpush3.bf16.msra.mxu0 %v7344_v26 }
 0xe72   :  { %6985 = vmatprep.subr.bf16.mxu0 %v7345_v31 }
 0xe75   :  { %6986 = vmatpush3.bf16.msra.mxu0 %v7345_v31 }
 0xe78   :  { %6988 = vmatmul.mubr.bf16.vlgmr.msra.gmra.mxu0 %v5509_v11 }
 0xe79   :  { %6991 = vmatprep.mubr.bf16.mxu0 %v5510_v20 }
 0xf18   :  { %v5430_v35 = vpop.f32.mrf.mxu0  ;;  %v5471_v38 = vpop.f32.mrf.mxu1 }
 0xf19   :  { %v5477_v50 = vadd.f32 %v5430_v35, %v5189_v34  ;;  %v5491_v36 = vadd.f32 %v9447_v3, %v5471_v38 }
 0xf1a   :  { %v5432_v5 = vpop.f32.mrf.mxu0  ;;  %v6969_v45 = vpop.f32.mrf.mxu1 }
 0xf1b   :  { %v6216_v57 = vmul.f32 -1.442695, %v5477_v50  ;;  %v5484_v52 = vadd.f32 %v5432_v5, %v5191_v22 }
 0xf1c   :  { %v5434_v4 = vpop.f32.mrf.mxu0  ;;  %v5474_v54 = vpop.f32.mrf.mxu1 }
 0xf1d   :  { %7496 = vpow2.f32 %v6216_v57  ;;  %v6217_v47 = vmul.f32 -1.442695, %v5484_v52 }
 0xf1e   :  { %v5435_v56 = vpop.f32.mrf.mxu0  ;;  %v6970_v43 = vpop.f32.mrf.mxu1 }
 0xf1f   :  { %7498 = vpow2.f32 %v6217_v47 }
 0xf2a   :  { %v7497_v8 = vpop.eup %7496 }
 0xf2b   :  { %v5481_v13 = vadd.f32 1.0, %v7497_v8 }
 0xf2c   :  { %v7499_v19 = vpop.eup %7498 }
 0xf2d   :  { %7500 = vrcp.f32 %v5481_v13  ;;  %v5488_v1 = vadd.f32 1.0, %v7499_v19 }
 0xf38   :  { %v6989_v44 = vpop.f32.mrf.mxu0 }
 0xf39   :  { %v5626_v12 = vadd.f32 %v6989_v44, %v6218_v28 }
 0xf3a   :  { %v7501_v18 = vpop.eup %7500  ;;  %v5617_v17 = vpop.f32.mrf.mxu0 }
 0xf3b   :  { %v5492_v32 = vmul.f32 %v7501_v18, %v5491_v36  ;;  %5650 = vst [vmem:[%s9957_s12 + $0x10] sm:$0xff] %v5626_v12  ;;  %v5618_v42 = vadd.f32 %v6218_v28, %v5617_v17  ;;  %5660 = vmax.xlane.f32.xlu1 %v5626_v12 }
 0xf3c   :  { %v6990_v24 = vpop.f32.mrf.mxu0 }
 0xf3d   :  { %v5493_v33 = vadd.f32 %v5492_v32, %v5230_v63  ;;  %5648 = vst [vmem:[%s9957_s12] sm:$0xff] %v5618_v42  ;;  %v5629_v3 = vadd.f32 %v6990_v24, %v6218_v28  ;;  %5656 = vmax.xlane.f32.xlu0 %v5618_v42 }
 0xf3e   :  { %v5620_v48 = vpop.f32.mrf.mxu0 }
 0xf3f   :  { %7502 = vtanh.f32 %v5493_v33  ;;  %5651 = vst [vmem:[%s9957_s12 + $0x18] sm:$0xff] %v5629_v3  ;;  %v5621_v59 = vadd.f32 %v6218_v28, %v5620_v48  ;;  %5662 = vmax.xlane.f32.xlu1 %v5629_v3 }
 0xf40   :  { %7504 = vrcp.f32 %v5488_v1 }
 0xf41   :  { %5649 = vst [vmem:[%s9957_s12 + $0x8] sm:$0xff] %v5621_v59  ;;  %5658 = vmax.xlane.f32.xlu0 %v5621_v59 }
 0xf4c   :  { %v7503_v55 = vpop.eup %7502 }
 0xf4d   :  { %v5495_v7 = vsub.f32 %v9852_v2, %v7503_v55  ;;  %v7505_v30 = vpop.eup %7504 }
 0xf4f   :  { %v5496_v6 = vmul.f32 %v7505_v30, %v5495_v7 }
 0xf51   :  { %v5497_v21 = vadd.f32 %v7503_v55, %v5496_v6 }
 0xf53   :  { %5499 = vst [vmem:[%s9953_s14 + $0x8] sm:$0xff] %v5497_v21  ;;  %v5511_v27 = vpack.c.bf16 %v5497_v21, %v9852_v2 }
 0xf55   :  { %6992 = vmatmul.mubr.bf16.gmra.mxu0 %v5511_v27 }
 0xfc4   :  { %v5661_v14 = vpop.xlane.xlu1 %5660 }
 0xfc5   :  { %v5674_v61 = vsub.f32 %v5626_v12, %v5661_v14 }
 0xfc6   :  { %v5657_v10 = vpop.xlane.xlu0 %5656 }
 0xfc7   :  { %v5672_v41 = vsub.f32 %v5618_v42, %v5657_v10  ;;  %v5684_v9 = vmul.f32 1.442695, %v5674_v61 }
 0xfc8   :  { %v5663_v23 = vpop.xlane.xlu1 %5662 }
 0xfc9   :  { %v5680_v37 = vmul.f32 1.442695, %v5672_v41  ;;  %v5675_v39 = vsub.f32 %v5629_v3, %v5663_v23 }
 0xfca   :  { %v5659_v53 = vpop.xlane.xlu0 %5658 }
 0xfcb   :  { %v5673_v51 = vsub.f32 %v5621_v59, %v5659_v53  ;;  %7506 = vpow2.f32 %v5680_v37  ;;  %v5686_v0 = vmul.f32 1.442695, %v5675_v39 }
 0xfcc   :  { %7508 = vpow2.f32 %v5684_v9 }
 0xfcd   :  { %v5682_v49 = vmul.f32 1.442695, %v5673_v51 }
 0xfcf   :  { %7510 = vpow2.f32 %v5682_v49 }
 0xfd0   :  { %7512 = vpow2.f32 %v5686_v0 }
 0xfd8   :  { %v7507_v15 = vpop.eup %7506 }
 0xfd9   :  { %v7509_v62 = vpop.eup %7508 }
 0xfdc   :  { %v7511_v26 = vpop.eup %7510 }
 0xfdd   :  { %v7513_v31 = vpop.eup %7512 }
0x1015   :  { %v6993_v16 = vpop.f32.mrf.mxu0 }
0x1016   :  { %v5642_v46 = vadd.f32 %v6993_v16, %v6218_v28 }
0x1017   :  { %v5633_v60 = vpop.f32.mrf.mxu0 }
0x1018   :  { %5654 = vst [vmem:[%s9957_s12 + $0x30] sm:$0xff] %v5642_v46  ;;  %v5634_v2 = vadd.f32 %v6218_v28, %v5633_v60 }
0x1019   :  { %v6994_v58 = vpop.f32.mrf.mxu0 }
0x101a   :  { %5652 = vst [vmem:[%s9957_s12 + $0x20] sm:$0xff] %v5634_v2  ;;  %v5645_v29 = vadd.f32 %v6994_v58, %v6218_v28  ;;  %5664 = vmax.xlane.f32.xlu0 %v5634_v2 }
0x101b   :  { %v5636_v40 = vpop.f32.mrf.mxu0 }
0x101c   :  { %5655 = vst [vmem:[%s9957_s12 + $0x38] sm:$0xff] %v5645_v29  ;;  %v5637_v25 = vadd.f32 %v6218_v28, %v5636_v40 }
0x101e   :  { %5653 = vst [vmem:[%s9957_s12 + $0x28] sm:$0xff] %v5637_v25  ;;  %5666 = vmax.xlane.f32.xlu1 %v5637_v25  ;;  %5668 = vmax.xlane.f32.xlu0 %v5642_v46 }
0x1022   :  { %5670 = vmax.xlane.f32.xlu1 %v5645_v29  ;;  %5696 = vadd.xlane.f32.xlu0 %v7507_v15 }
0x1026   :  { %5700 = vadd.xlane.f32.xlu0 %v7509_v62  ;;  %5698 = vadd.xlane.f32.xlu1 %v7511_v26 }
0x102a   :  { %5702 = vadd.xlane.f32.xlu1 %v7513_v31 }
0x10a3   :  { %v5665_v11 = vpop.xlane.xlu0 %5664 }
0x10a4   :  { %v5676_v20 = vsub.f32 %v5634_v2, %v5665_v11 }
0x10a6   :  { %v5688_v34 = vmul.f32 1.442695, %v5676_v20 }
0x10a7   :  { %v5667_v35 = vpop.xlane.xlu1 %5666  ;;  %v5669_v38 = vpop.xlane.xlu0 %5668 }
0x10a8   :  { %7514 = vpow2.f32 %v5688_v34  ;;  %v5677_v50 = vsub.f32 %v5637_v25, %v5667_v35  ;;  %v5678_v5 = vsub.f32 %v5642_v46, %v5669_v38 }
0x10aa   :  { %v5690_v45 = vmul.f32 1.442695, %v5677_v50  ;;  %v5692_v57 = vmul.f32 1.442695, %v5678_v5 }
0x10ab   :  { %v5671_v4 = vpop.xlane.xlu1 %5670  ;;  %v5697_v54 = vpop.xlane.xlu0 %5696 }
0x10ac   :  { %7516 = vpow2.f32 %v5690_v45  ;;  %v5679_v56 = vsub.f32 %v5645_v29, %v5671_v4 }
0x10ad   :  { %7518 = vpow2.f32 %v5692_v57 }
0x10ae   :  { %v5694_v43 = vmul.f32 1.442695, %v5679_v56  ;;  %7520 = vrcp.f32 %v5697_v54 }
0x10af   :  { %v5699_v22 = vpop.xlane.xlu1 %5698  ;;  %v5701_v52 = vpop.xlane.xlu0 %5700 }
0x10b0   :  { %7522 = vpow2.f32 %v5694_v43 }
0x10b1   :  { %7524 = vrcp.f32 %v5699_v22 }
0x10b2   :  { %7526 = vrcp.f32 %v5701_v52 }
0x10b3   :  { %v5703_v47 = vpop.xlane.xlu1 %5702 }
0x10b4   :  { %7528 = vrcp.f32 %v5703_v47 }
0x10b5   :  { %v7515_v8 = vpop.eup %7514 }
0x10b6   :  { %5704 = vadd.xlane.f32.xlu0 %v7515_v8 }
0x10b9   :  { %v7517_v13 = vpop.eup %7516 }
0x10ba   :  { %v7519_v28 = vpop.eup %7518  ;;  %5706 = vadd.xlane.f32.xlu1 %v7517_v13 }
0x10bb   :  { %v7521_v44 = vpop.eup %7520  ;;  %5708 = vadd.xlane.f32.xlu0 %v7519_v28 }
0x10bc   :  { %v5720_v19 = vmul.f32 %v7521_v44, %v7507_v15 }
0x10bd   :  { %v7523_v36 = vpop.eup %7522 }
0x10be   :  { %v7525_v12 = vpop.eup %7524  ;;  %5728 = vst [vmem:[%s9958_s13] sm:$0xff] %v5720_v19  ;;  %5710 = vadd.xlane.f32.xlu1 %v7523_v36 }
0x10bf   :  { %v7527_v18 = vpop.eup %7526  ;;  %v5721_v17 = vmul.f32 %v7525_v12, %v7511_v26 }
0x10c0   :  { %v5722_v63 = vmul.f32 %v7527_v18, %v7509_v62 }
0x10c1   :  { %v7529_v32 = vpop.eup %7528  ;;  %5729 = vst [vmem:[%s9958_s13 + $0x8] sm:$0xff] %v5721_v17 }
0x10c2   :  { %5730 = vst [vmem:[%s9958_s13 + $0x10] sm:$0xff] %v5722_v63  ;;  %v5723_v42 = vmul.f32 %v7529_v32, %v7513_v31 }
0x10c4   :  { %5731 = vst [vmem:[%s9958_s13 + $0x18] sm:$0xff] %v5723_v42 }
0x113f   :  { %v5705_v24 = vpop.xlane.xlu0 %5704 }
0x1140   :  { %7530 = vrcp.f32 %v5705_v24 }
0x1143   :  { %v5707_v33 = vpop.xlane.xlu1 %5706 }
0x1144   :  { %7532 = vrcp.f32 %v5707_v33  ;;  %v5709_v1 = vpop.xlane.xlu0 %5708 }
0x1145   :  { %7534 = vrcp.f32 %v5709_v1 }
0x1147   :  { %v5711_v3 = vpop.xlane.xlu1 %5710 }
0x1148   :  { %7536 = vrcp.f32 %v5711_v3 }
0x114d   :  { %v7531_v48 = vpop.eup %7530 }
0x114e   :  { %v5724_v59 = vmul.f32 %v7531_v48, %v7515_v8 }
0x1150   :  { %5732 = vst [vmem:[%s9958_s13 + $0x20] sm:$0xff] %v5724_v59 }
0x1151   :  { %v7533_v55 = vpop.eup %7532 }
0x1152   :  { %v7535_v7 = vpop.eup %7534  ;;  %v5725_v30 = vmul.f32 %v7533_v55, %v7517_v13 }
0x1153   :  { %v5726_v6 = vmul.f32 %v7535_v7, %v7519_v28 }
0x1154   :  { %5733 = vst [vmem:[%s9958_s13 + $0x28] sm:$0xff] %v5725_v30 }
0x1155   :  { %v7537_v21 = vpop.eup %7536  ;;  %5734 = vst [vmem:[%s9958_s13 + $0x30] sm:$0xff] %v5726_v6 }
0x1156   :  { %v5727_v27 = vmul.f32 %v7537_v21, %v7523_v36 }
0x1158   :  { %5735 = vst [vmem:[%s9958_s13 + $0x38] sm:$0xff] %v5727_v27 }

</bundles_post_ra>
